<compile_context>
chip_gen: v7x
topology: tpu7x:2x2x1
jax: 0.10.0
libtpu: 0.0.40
codegen_flags: <defaults>
</compile_context>

<pallas_src>
import functools
import math

import jax
import jax.numpy as jnp
from jax.experimental import pallas as pl
from jax.experimental.pallas import tpu as pltpu


def _round_up(x, m):
    return (x + m - 1) // m * m


# -----------------------------------------------------------------------------
# Math helpers shared by the kernel body and the pure-JAX reference.
# -----------------------------------------------------------------------------

def _erf_approx(x):
    # Abramowitz-Stegun rational approximation (max abs err ~1.5e-7); only uses ops
    # guaranteed to lower in Mosaic (exp / mul / add / where / abs).
    a1, a2, a3, a4, a5 = 0.254829592, -0.284496736, 1.421413741, -1.453152027, 1.061405429
    p = 0.3275911
    s = jnp.where(x >= 0.0, 1.0, -1.0)
    ax = jnp.abs(x)
    t = 1.0 / (1.0 + p * ax)
    poly = ((((a5 * t + a4) * t + a3) * t + a2) * t + a1) * t
    return s * (1.0 - poly * jnp.exp(-ax * ax))


def _gelu_exact(x):
    # torch nn.GELU() default is the exact erf-based GELU.
    return 0.5 * x * (1.0 + _erf_approx(x * (1.0 / math.sqrt(2.0))))


def _layernorm(x, g, b):
    x = x.astype(jnp.float32)
    mu = jnp.mean(x, axis=-1, keepdims=True)
    xc = x - mu
    var = jnp.mean(xc * xc, axis=-1, keepdims=True)
    return xc * jax.lax.rsqrt(var + 1e-5) * g + b


# -----------------------------------------------------------------------------
# Fused all-layers decoder Pallas kernel (one pallas_call, grid = (num_layers,)).
# -----------------------------------------------------------------------------
# Packed small-vector slab row layout (f32, (17, D)):
#   0 ln1_g  1 ln1_b  2 ln2_g  3 ln2_b  4 ln3_g  5 ln3_b
#   6 ls1    7 ls2    8 ls3
#   9 mha_bq(*scale) 10 mha_bv 11 mha_bo
#  12 gat_bq(*scale) 13 gat_bv 14 gat_bo 15 gat_be
#  16 ffn_b2

def _decoder_stack_kernel(
    vecs_ref, mwq_ref, mwkT_ref, mwv_ref, mwo_ref,
    gwqk_ref, gwv_ref, gwo_ref, gwe_ref,
    fw1_ref, fb1_ref, fw2_ref,
    x0_ref, feat_ref, featT_ref, amask_ref, pe_ref, adj_ref,
    out_ref, x_carry, *, num_heads, n_pad):
    l = pl.program_id(0)
    D = x0_ref.shape[1]
    dh = D // num_heads

    @pl.when(l == 0)
    def _():
        x_carry[...] = x0_ref[...]

    vecs = vecs_ref[...]                                     # (17, D) f32
    ln1_g, ln1_b = vecs[0:1], vecs[1:2]
    ln2_g, ln2_b = vecs[2:3], vecs[3:4]
    ln3_g, ln3_b = vecs[4:5], vecs[5:6]
    ls1, ls2, ls3 = vecs[6:7], vecs[7:8], vecs[8:9]
    mbq, mbv, mbo = vecs[9:10], vecs[10:11], vecs[11:12]
    gbq, gbv, gbo, gbe = vecs[12:13], vecs[13:14], vecs[14:15], vecs[15:16]
    fb2 = vecs[16:17]

    x0 = x_carry[...]
    pe = pe_ref[...]
    amask = amask_ref[...]
    adj = adj_ref[...]

    def mm16(x16, w_ref):
        # bf16 operands on the MXU, f32 accumulation.
        return jnp.dot(x16, w_ref[...], preferred_element_type=jnp.float32)

    def attn(q16, k16, v16, wo16, bias, *, k_transposed):
        # Per-head static slices; bf16 operands cast ONCE by the caller.  The
        # out-projection is accumulated per head (no lane concat of dh-wide pieces).
        rows = q16.shape[0]
        acc = jnp.zeros((rows, D), jnp.float32)
        for h in range(num_heads):
            lo, hi = h * dh, (h + 1) * dh
            if k_transposed:
                # K^T is lane-dense (dh, cols): plain MXU matmul, no relayout.
                s = jnp.dot(q16[:, lo:hi], k16[lo:hi, :],
                            preferred_element_type=jnp.float32)
            else:
                # Small GAT path (n_pad x n_pad); keep rhs-minor contraction.
                s = jax.lax.dot_general(q16[:, lo:hi], k16[:, lo:hi],
                                        (((1,), (1,)), ((), ())),
                                        preferred_element_type=jnp.float32)
            s = s + bias                                     # 1/sqrt(dh) folded into Wq
            m = jnp.max(s, axis=-1, keepdims=True)
            m = jnp.where(m > -jnp.inf, m, 0.0)              # fully-masked-row guard
            p = jnp.exp(s - m)
            denom = jnp.maximum(jnp.sum(p, axis=-1, keepdims=True), 1e-30)
            inv = pl.reciprocal(denom, approx=True)          # EUP slot, ~free
            o = jnp.dot(p.astype(jnp.bfloat16), v16[:, lo:hi],
                        preferred_element_type=jnp.float32) * inv
            acc = acc + jnp.dot(o.astype(jnp.bfloat16), wo16[lo:hi, :],
                                preferred_element_type=jnp.float32)
        return acc

    # --- cross-attention block: x1 = x0 + ls1 * OutProj(MHA(LN1(x0), feat, feat)) ---
    q = mm16(_layernorm(x0, ln1_g, ln1_b).astype(jnp.bfloat16), mwq_ref) + mbq
    # K^T = Wk^T @ feat^T ; the K bias is row-constant in the scores and cancels in
    # softmax, so it is dropped entirely.
    kT = jnp.dot(mwkT_ref[...], featT_ref[...], preferred_element_type=jnp.float32)
    v = mm16(feat_ref[...], mwv_ref) + mbv
    attn_out = attn(q.astype(jnp.bfloat16), kT.astype(jnp.bfloat16),
                    v.astype(jnp.bfloat16), mwo_ref[...], amask, k_transposed=True)
    x1 = x0 + (attn_out + mbo) * ls1

    # --- GAT block.  TODO(synk): exact gnn.GATConv(graphs, embeddings) semantics are
    #     unavailable; approximated as masked multi-head attention over the graph
    #     adjacency (with self loops), positional embeddings feeding Q/K, plus a
    #     learned projection of the (embedding-augmented) edge features. ---
    g = _layernorm(x1, ln2_g, ln2_b)                         # pre_gat_queries (post-LN)
    gn = g[:n_pad]
    qk = mm16((gn + pe[:n_pad]).astype(jnp.bfloat16), gwqk_ref)     # fused GAT Q|K
    gq = (qk[:, :D] + gbq).astype(jnp.bfloat16)              # Q half (scale pre-folded)
    gk = qk[:, D:].astype(jnp.bfloat16)                      # K bias cancels in softmax
    gv = (mm16(gn.astype(jnp.bfloat16), gwv_ref) + gbv).astype(jnp.bfloat16)
    node_out = attn(gq, gk, gv, gwo_ref[...], adj, k_transposed=False) + gbo
    edge_out = mm16((g[n_pad:] + pe[n_pad:]).astype(jnp.bfloat16), gwe_ref) + gbe
    # Reference: post_gat_queries = pre_gat_layernorm(post_cross) + layerscale(gat_out).
    x2 = g + jnp.concatenate([node_out, edge_out], axis=0) * ls2

    # --- FFN block.  NOTE: the reference layernorms pre_gat_queries (g), not x2. ---
    f16 = _layernorm(g, ln3_g, ln3_b).astype(jnp.bfloat16)
    h1 = _gelu_exact(mm16(f16, fw1_ref) + fb1_ref[...])
    y = x2 + (mm16(h1.astype(jnp.bfloat16), fw2_ref) + fb2) * ls3

    x_carry[...] = y
    out_ref[...] = y


def decoder_layers(x0, feat16, featT16, attn_mask, pe, adj, packed, *,
                   num_layers, num_heads, n_pad):
    s_pad, D = x0.shape

    per_layer = [
        packed["vecs"],
        packed["mha_wq"], packed["mha_wkT"], packed["mha_wv"], packed["mha_wo"],
        packed["gat_wqk"], packed["gat_wv"], packed["gat_wo"], packed["gat_we"],
        packed["ffn_w1"], packed["ffn_b1"], packed["ffn_w2"],
    ]
    invariant = [x0, feat16, featT16, attn_mask, pe, adj]

    def layer_spec(a):
        _, r, c = a.shape
        return pl.BlockSpec((None, r, c), lambda l: (l, 0, 0))

    def const_spec(a):
        nd = a.ndim
        return pl.BlockSpec(a.shape, lambda l, nd=nd: (0,) * nd)

    kernel = functools.partial(_decoder_stack_kernel, num_heads=num_heads, n_pad=n_pad)
    return pl.pallas_call(
        kernel,
        out_shape=jax.ShapeDtypeStruct((num_layers, s_pad, D), jnp.float32),
        grid=(num_layers,),
        in_specs=[layer_spec(a) for a in per_layer] + [const_spec(a) for a in invariant],
        out_specs=pl.BlockSpec((None, s_pad, D), lambda l: (l, 0, 0)),
        scratch_shapes=[pltpu.VMEM((s_pad, D), jnp.float32)],
        compiler_params=pltpu.CompilerParams(dimension_semantics=("arbitrary",)),
    )(*per_layer, *invariant)


# -----------------------------------------------------------------------------
# Pure-JAX f32 reference of one decoder layer (for a tolerance check).
# Uses the unfused raw params, explicit scale and K biases (mathematically
# equivalent to the kernel, which folds/cancels them).
# -----------------------------------------------------------------------------

def _decoder_layer_reference(x, feat_f32, attn_mask, pe, adj, lp, *, num_heads, n_pad):
    D = x.shape[1]
    dh = D // num_heads
    scale = 1.0 / math.sqrt(dh)

    def mm(a, w, b):
        return a.astype(jnp.float32) @ w.astype(jnp.float32) + b

    def mha(q, k, v, bias):
        outs = []
        for h in range(num_heads):
            lo, hi = h * dh, (h + 1) * dh
            s = q[:, lo:hi] @ k[:, lo:hi].T * scale + bias
            m = jnp.max(s, axis=-1, keepdims=True)
            m = jnp.where(m > -jnp.inf, m, 0.0)
            p = jnp.exp(s - m)
            denom = jnp.maximum(jnp.sum(p, axis=-1, keepdims=True), 1e-30)
            outs.append((p @ v[:, lo:hi]) / denom)
        return jnp.concatenate(outs, axis=-1)

    mha_p, gat_p = lp["mha"], lp["gat"]
    qn = _layernorm(x, lp["ln1_g"][None], lp["ln1_b"][None])
    q = mm(qn, mha_p["wq"], mha_p["bq"])
    k = mm(feat_f32, mha_p["wk"], mha_p["bk"])
    v = mm(feat_f32, mha_p["wv"], mha_p["bv"])
    attn = mm(mha(q, k, v, attn_mask), mha_p["wo"], mha_p["bo"])
    x1 = x + attn * lp["ls1"][None]

    g = _layernorm(x1, lp["ln2_g"][None], lp["ln2_b"][None])
    gn, pn = g[:n_pad], pe[:n_pad]
    gq = mm(gn + pn, gat_p["wq"], gat_p["bq"])
    gk = mm(gn + pn, gat_p["wk"], gat_p["bk"])
    gv = mm(gn, gat_p["wv"], gat_p["bv"])
    node_out = mm(mha(gq, gk, gv, adj), gat_p["wo"], gat_p["bo"])
    edge_out = mm(g[n_pad:] + pe[n_pad:], gat_p["we"], gat_p["be"])
    x2 = g + jnp.concatenate([node_out, edge_out], axis=0) * lp["ls2"][None]

    f = _layernorm(g, lp["ln3_g"][None], lp["ln3_b"][None])
    h1 = _gelu_exact(mm(f, lp["ffn_w1"], lp["ffn_b1"]))
    return x2 + mm(h1, lp["ffn_w2"], lp["ffn_b2"]) * lp["ls3"][None]


# -----------------------------------------------------------------------------
# Decoder-level glue: heatmaps, positional embeddings, attention / adjacency masks.
# -----------------------------------------------------------------------------

def gaussian_heatmaps(boxes_cxcywh, mask, H, W):
    # TODO(synk): exact position.GaussianHeatmaps formula unavailable; per-box Gaussian
    # with sigma = (w/2, h/2) on normalized pixel-center coordinates.
    cx, cy, w, h = (boxes_cxcywh[:, 0], boxes_cxcywh[:, 1],
                    boxes_cxcywh[:, 2], boxes_cxcywh[:, 3])
    ys = (jnp.arange(H, dtype=jnp.float32) + 0.5) / H
    xs = (jnp.arange(W, dtype=jnp.float32) + 0.5) / W
    yy, xx = jnp.meshgrid(ys, xs, indexing="ij")
    sx = jnp.maximum(w / 2.0, 1e-3)[:, None, None]
    sy = jnp.maximum(h / 2.0, 1e-3)[:, None, None]
    dx = (xx[None] - cx[:, None, None]) / sx
    dy = (yy[None] - cy[:, None, None]) / sy
    hm = jnp.exp(-0.5 * (dx * dx + dy * dy))
    return jnp.where(mask, 0.0, hm)


def sinusoidal_embed(values, dim):
    # TODO(synk): exact Sinusoidal(Pairwise)BoxEmbeddings unavailable; standard sin/cos
    # encoding with dim // n_coords dims per coordinate.
    Q, C = values.shape
    dim_per = dim // C
    freqs = 10000.0 ** (2.0 * jnp.arange(dim_per // 2, dtype=jnp.float32) / dim_per)
    angles = values[:, :, None] * (2.0 * math.pi) / freqs[None, None, :]
    emb = jnp.concatenate([jnp.sin(angles), jnp.cos(angles)], axis=-1)
    return emb.reshape(Q, C * dim_per)


def _xyxy_to_cxcywh(b):
    return jnp.stack([(b[:, 0] + b[:, 2]) * 0.5, (b[:, 1] + b[:, 3]) * 0.5,
                      b[:, 2] - b[:, 0], b[:, 3] - b[:, 1]], axis=-1)


def decoder_forward(packed, raw_layers, features, feat_mask, nodes, edges, boxes_xyxy,
                    edge_index, num_heads, check_reference=False):
    # features: (B, D, H, W) NCHW like the PyTorch module; feat_mask True = padded.
    B, D, H, W = features.shape
    assert B == 1  # TODO(synk): BatchedGraphs padding semantics only exact for B = 1.
    HW = H * W
    feat_f32 = jnp.transpose(features, (0, 2, 3, 1)).reshape(HW, D)
    feat16 = feat_f32.astype(jnp.bfloat16)        # largest activation: ship as bf16
    featT16 = feat_f32.T.astype(jnp.bfloat16)     # pre-transposed for in-kernel K^T
    fmask_row = feat_mask.reshape(HW)

    N, E = nodes.shape[0], edges.shape[0]
    n_pad, e_pad = _round_up(N, 8), _round_up(E, 8)
    s_pad = n_pad + e_pad

    first = boxes_xyxy[edge_index[0]]
    second = boxes_xyxy[edge_index[1]]
    union = jnp.concatenate([jnp.minimum(first[:, :2], second[:, :2]),
                             jnp.maximum(first[:, 2:], second[:, 2:])], axis=-1)
    boxes_c, first_c, second_c, union_c = map(
        _xyxy_to_cxcywh, (boxes_xyxy, first, second, union))

    node_mask = jnp.broadcast_to(feat_mask[0][None], (N, H, W))
    edge_mask = jnp.broadcast_to(feat_mask[0][None], (E, H, W))
    node_hm = gaussian_heatmaps(boxes_c, node_mask, H, W)
    union_hm = gaussian_heatmaps(union_c, edge_mask, H, W)
    edge_hm = jnp.maximum(jnp.maximum(node_hm[edge_index[0]], node_hm[edge_index[1]]),
                          union_hm)

    # Single (Spad, HW) additive mask shared by all heads (torch repeat() copies it).
    heat = (jnp.zeros((s_pad, HW), jnp.float32)
            .at[:N].set(node_hm.reshape(N, HW))
            .at[n_pad:n_pad + E].set(edge_hm.reshape(E, HW)))
    attn_mask = jnp.where(fmask_row[None, :], -jnp.inf, heat)

    pe_nodes = sinusoidal_embed(boxes_c, D)
    pair = jnp.stack([first_c[:, 0] - second_c[:, 0],
                      first_c[:, 1] - second_c[:, 1],
                      jnp.log(first_c[:, 2] / second_c[:, 2]),
                      jnp.log(first_c[:, 3] / second_c[:, 3])], axis=-1)
    pe_edges = sinusoidal_embed(pair, D)
    pe = (jnp.zeros((s_pad, D), jnp.float32)
          .at[:N].set(pe_nodes).at[n_pad:n_pad + E].set(pe_edges))

    # GAT adjacency mask — layer-invariant (depends only on edge_index).
    adj = jnp.full((n_pad, n_pad), -jnp.inf, jnp.float32)
    adj = adj.at[jnp.arange(n_pad), jnp.arange(n_pad)].set(0.0)   # self loops
    adj = adj.at[edge_index[1], edge_index[0]].set(0.0)           # dst attends to src

    x0 = (jnp.zeros((s_pad, D), jnp.float32)
          .at[:N].set(nodes).at[n_pad:n_pad + E].set(edges))

    num_layers = packed["vecs"].shape[0]
    out = decoder_layers(x0, feat16, featT16, attn_mask, pe, adj, packed,
                         num_layers=num_layers, num_heads=num_heads, n_pad=n_pad)

    outputs, max_err = [], 0.0
    x_prev = x0
    for li in range(num_layers):
        x_l = out[li]
        if check_reference:
            x_ref = _decoder_layer_reference(x_prev, feat_f32, attn_mask, pe, adj,
                                             raw_layers[li], num_heads=num_heads,
                                             n_pad=n_pad)
            max_err = max(max_err, float(jnp.max(jnp.abs(x_l - x_ref))))
        outputs.append((x_l[:N], x_l[n_pad:n_pad + E]))
        x_prev = x_l
    return outputs, max_err


# -----------------------------------------------------------------------------
# Deterministic parameter init (synthetic; shapes follow the module __init__)
# and packing into the layer-stacked kernel layout.
# -----------------------------------------------------------------------------

def init_params(key, D, num_layers):
    def dense(k, shape):
        return jax.random.normal(k, shape, jnp.float32) * 0.02

    layers = []
    for lk in jax.random.split(key, num_layers):
        ks = jax.random.split(lk, 22)
        mha = dict(wq=dense(ks[0], (D, D)), bq=dense(ks[1], (D,)),
                   wk=dense(ks[2], (D, D)), bk=dense(ks[3], (D,)),
                   wv=dense(ks[4], (D, D)), bv=dense(ks[5], (D,)),
                   wo=dense(ks[6], (D, D)), bo=dense(ks[7], (D,)))
        gat = dict(wq=dense(ks[8], (D, D)), bq=dense(ks[9], (D,)),
                   wk=dense(ks[10], (D, D)), bk=dense(ks[11], (D,)),
                   wv=dense(ks[12], (D, D)), bv=dense(ks[13], (D,)),
                   wo=dense(ks[14], (D, D)), bo=dense(ks[15], (D,)),
                   we=dense(ks[16], (D, D)), be=dense(ks[17], (D,)))
        # TODO(synk): project's LayerScale init value unknown; using 1e-2.
        layers.append(dict(
            ln1_g=jnp.ones(D, jnp.float32), ln1_b=jnp.zeros(D, jnp.float32),
            ln2_g=jnp.ones(D, jnp.float32), ln2_b=jnp.zeros(D, jnp.float32),
            ln3_g=jnp.ones(D, jnp.float32), ln3_b=jnp.zeros(D, jnp.float32),
            ls1=jnp.full((D,), 1e-2, jnp.float32),
            ls2=jnp.full((D,), 1e-2, jnp.float32),
            ls3=jnp.full((D,), 1e-2, jnp.float32),
            mha=mha, gat=gat,
            ffn_w1=dense(ks[18], (D, 4 * D)), ffn_b1=dense(ks[19], (4 * D,)),
            ffn_w2=dense(ks[20], (4 * D, D)), ffn_b2=dense(ks[21], (D,))))
    return layers


def pack_params(raw_layers, num_heads):
    # Fold the 1/sqrt(dh) scale into Wq/bq (and the GAT Q half), pre-transpose Wk so the
    # kernel produces K^T directly, pack all (D,)-vectors into one f32 slab, cast matmul
    # weights to bf16, and stack everything over a leading layer dim.
    D = raw_layers[0]["ffn_w2"].shape[1]
    scale = 1.0 / math.sqrt(D // num_heads)
    bf16 = lambda w: w.astype(jnp.bfloat16)

    def one(lp):
        mha, gat = lp["mha"], lp["gat"]
        vecs = jnp.stack([
            lp["ln1_g"], lp["ln1_b"], lp["ln2_g"], lp["ln2_b"], lp["ln3_g"], lp["ln3_b"],
            lp["ls1"], lp["ls2"], lp["ls3"],
            mha["bq"] * scale, mha["bv"], mha["bo"],
            gat["bq"] * scale, gat["bv"], gat["bo"], gat["be"],
            lp["ffn_b2"],
        ]).astype(jnp.float32)
        return dict(
            vecs=vecs,
            mha_wq=bf16(mha["wq"] * scale),
            mha_wkT=bf16(mha["wk"].T),          # K bias dropped (cancels in softmax)
            mha_wv=bf16(mha["wv"]),
            mha_wo=bf16(mha["wo"]),
            gat_wqk=bf16(jnp.concatenate([gat["wq"] * scale, gat["wk"]], axis=1)),
            gat_wv=bf16(gat["wv"]),
            gat_wo=bf16(gat["wo"]),
            gat_we=bf16(gat["we"]),
            ffn_w1=bf16(lp["ffn_w1"]),
            ffn_b1=lp["ffn_b1"].reshape(1, -1).astype(jnp.float32),
            ffn_w2=bf16(lp["ffn_w2"]),
        )

    per = [one(lp) for lp in raw_layers]
    return {k: jnp.stack([p[k] for p in per]) for k in per[0]}


# -----------------------------------------------------------------------------

if __name__ == "__main__":
    key = jax.random.PRNGKey(0)
    B, D, H, W = 1, 32, 8, 8
    num_heads, num_layers = 4, 2
    N, E = 6, 8

    k_feat, k_nodes, k_edges, k_box1, k_box2, k_params = jax.random.split(key, 6)

    features = jax.random.normal(k_feat, (B, D, H, W), jnp.float32)   # NCHW
    feat_mask = jnp.zeros((B, H, W), dtype=bool).at[:, :, W - 2:].set(True)  # pad 2 cols

    nodes = jax.random.normal(k_nodes, (N, D), jnp.float32)
    edges = jax.random.normal(k_edges, (E, D), jnp.float32)

    mins = jax.random.uniform(k_box1, (N, 2), minval=0.05, maxval=0.45)
    sizes = jax.random.uniform(k_box2, (N, 2), minval=0.10, maxval=0.40)
    boxes_xyxy = jnp.concatenate([mins, mins + sizes], axis=-1)       # normalized xyxy

    edge_index = jnp.array([[0, 1, 2, 3, 4, 5, 0, 2],
                            [1, 2, 3, 4, 5, 0, 3, 5]], dtype=jnp.int32)

    raw_layers = init_params(k_params, D, num_layers)
    packed = pack_params(raw_layers, num_heads)

    outputs, max_err = decoder_forward(packed, raw_layers, features, feat_mask,
                                       nodes, edges, boxes_xyxy, edge_index,
                                       num_heads, check_reference=True)

    last_nodes, last_edges = outputs[-1]
    jax.block_until_ready(last_nodes)
    jax.block_until_ready(last_edges)
    assert last_nodes.shape == (N, D) and last_edges.shape == (E, D)
    assert len(outputs) == num_layers
    assert bool(jnp.isfinite(last_nodes).all()) and bool(jnp.isfinite(last_edges).all())
    # Loose tolerance: kernel uses bf16 MXU inputs + approx reciprocal vs f32 reference.
    assert max_err < 5e-2, f"kernel vs f32 reference max abs err {max_err}"
    print("KERNEL_OK")
</pallas_src>

<mosaic_0001>
module attributes {stable_mosaic.version = 11 : i64} {
  func.func @_decoder_stack_kernel(%arg0: i32, %arg1: memref<1x17x32xf32, #tpu.memory_space<vmem>>, %arg2: memref<1x32x32xbf16, #tpu.memory_space<vmem>>, %arg3: memref<1x32x32xbf16, #tpu.memory_space<vmem>>, %arg4: memref<1x32x32xbf16, #tpu.memory_space<vmem>>, %arg5: memref<1x32x32xbf16, #tpu.memory_space<vmem>>, %arg6: memref<1x32x64xbf16, #tpu.memory_space<vmem>>, %arg7: memref<1x32x32xbf16, #tpu.memory_space<vmem>>, %arg8: memref<1x32x32xbf16, #tpu.memory_space<vmem>>, %arg9: memref<1x32x32xbf16, #tpu.memory_space<vmem>>, %arg10: memref<1x32x128xbf16, #tpu.memory_space<vmem>>, %arg11: memref<1x1x128xf32, #tpu.memory_space<vmem>>, %arg12: memref<1x128x32xbf16, #tpu.memory_space<vmem>>, %arg13: memref<16x32xf32, #tpu.memory_space<vmem>>, %arg14: memref<64x32xbf16, #tpu.memory_space<vmem>>, %arg15: memref<32x64xbf16, #tpu.memory_space<vmem>>, %arg16: memref<16x64xf32, #tpu.memory_space<vmem>>, %arg17: memref<16x32xf32, #tpu.memory_space<vmem>>, %arg18: memref<8x8xf32, #tpu.memory_space<vmem>>, %arg19: memref<1x16x32xf32, #tpu.memory_space<vmem>>, %arg20: memref<16x32xf32, #tpu.memory_space<vmem>>) attributes {dimension_semantics = [#tpu.dimension_semantics<arbitrary>], iteration_bounds = array<i64: 2>, scalar_prefetch = 0 : i64, scratch_operands = 1 : i64, tpu.core_type = #tpu.core_type<tc>, window_params = [{transform_indices = @transform_0, window_bounds = array<i64: 1, 17, 32>}, {transform_indices = @transform_1, window_bounds = array<i64: 1, 32, 32>}, {transform_indices = @transform_2, window_bounds = array<i64: 1, 32, 32>}, {transform_indices = @transform_3, window_bounds = array<i64: 1, 32, 32>}, {transform_indices = @transform_4, window_bounds = array<i64: 1, 32, 32>}, {transform_indices = @transform_5, window_bounds = array<i64: 1, 32, 64>}, {transform_indices = @transform_6, window_bounds = array<i64: 1, 32, 32>}, {transform_indices = @transform_7, window_bounds = array<i64: 1, 32, 32>}, {transform_indices = @transform_8, window_bounds = array<i64: 1, 32, 32>}, {transform_indices = @transform_9, window_bounds = array<i64: 1, 32, 128>}, {transform_indices = @transform_10, window_bounds = array<i64: 1, 1, 128>}, {transform_indices = @transform_11, window_bounds = array<i64: 1, 128, 32>}, {pipeline_mode = #tpu.pipeline_mode<synchronous>, transform_indices = @transform_12, window_bounds = array<i64: 16, 32>}, {pipeline_mode = #tpu.pipeline_mode<synchronous>, transform_indices = @transform_13, window_bounds = array<i64: 64, 32>}, {pipeline_mode = #tpu.pipeline_mode<synchronous>, transform_indices = @transform_14, window_bounds = array<i64: 32, 64>}, {pipeline_mode = #tpu.pipeline_mode<synchronous>, transform_indices = @transform_15, window_bounds = array<i64: 16, 64>}, {pipeline_mode = #tpu.pipeline_mode<synchronous>, transform_indices = @transform_16, window_bounds = array<i64: 16, 32>}, {pipeline_mode = #tpu.pipeline_mode<synchronous>, transform_indices = @transform_17, window_bounds = array<i64: 8, 8>}, {transform_indices = @transform_18, window_bounds = array<i64: 1, 16, 32>}]} {
    %c0_i32 = arith.constant 0 : i32
    %0 = arith.cmpi eq, %arg0, %c0_i32 : i32
    %1 = arith.extui %0 : i1 to i32
    %c0_i32_0 = arith.constant 0 : i32
    %2 = arith.cmpi ne, %1, %c0_i32_0 : i32
    scf.if %2 {
      %c0_157 = arith.constant 0 : index
      %c0_158 = arith.constant 0 : index
      %429 = vector.load %arg13[%c0_157, %c0_158] : memref<16x32xf32, #tpu.memory_space<vmem>>, vector<16x32xf32>
      %c0_159 = arith.constant 0 : index
      %c0_160 = arith.constant 0 : index
      %430 = vector.load %arg20[%c0_159, %c0_160] : memref<16x32xf32, #tpu.memory_space<vmem>>, vector<16x32xf32>
      tpu.vector_store %arg20[%c0_159, %c0_160], %429 {strides = array<i32>} : memref<16x32xf32, #tpu.memory_space<vmem>>, vector<16x32xf32>,
    } else {
    }
    %c0 = arith.constant 0 : index
    %c0_1 = arith.constant 0 : index
    %c0_2 = arith.constant 0 : index
    %3 = vector.load %arg1[%c0, %c0_1, %c0_2] : memref<1x17x32xf32, #tpu.memory_space<vmem>>, vector<1x17x32xf32>
    %4 = vector.shape_cast %3 : vector<1x17x32xf32> to vector<17x32xf32>
    %5 = vector.extract_strided_slice %4 {offsets = [0, 0], sizes = [1, 32], strides = [1, 1]} : vector<17x32xf32> to vector<1x32xf32>
    %6 = vector.extract_strided_slice %4 {offsets = [1, 0], sizes = [1, 32], strides = [1, 1]} : vector<17x32xf32> to vector<1x32xf32>
    %7 = vector.extract_strided_slice %4 {offsets = [2, 0], sizes = [1, 32], strides = [1, 1]} : vector<17x32xf32> to vector<1x32xf32>
    %8 = vector.extract_strided_slice %4 {offsets = [3, 0], sizes = [1, 32], strides = [1, 1]} : vector<17x32xf32> to vector<1x32xf32>
    %9 = vector.extract_strided_slice %4 {offsets = [4, 0], sizes = [1, 32], strides = [1, 1]} : vector<17x32xf32> to vector<1x32xf32>
    %10 = vector.extract_strided_slice %4 {offsets = [5, 0], sizes = [1, 32], strides = [1, 1]} : vector<17x32xf32> to vector<1x32xf32>
    %11 = vector.extract_strided_slice %4 {offsets = [6, 0], sizes = [1, 32], strides = [1, 1]} : vector<17x32xf32> to vector<1x32xf32>
    %12 = vector.extract_strided_slice %4 {offsets = [7, 0], sizes = [1, 32], strides = [1, 1]} : vector<17x32xf32> to vector<1x32xf32>
    %13 = vector.extract_strided_slice %4 {offsets = [8, 0], sizes = [1, 32], strides = [1, 1]} : vector<17x32xf32> to vector<1x32xf32>
    %14 = vector.extract_strided_slice %4 {offsets = [9, 0], sizes = [1, 32], strides = [1, 1]} : vector<17x32xf32> to vector<1x32xf32>
    %15 = vector.extract_strided_slice %4 {offsets = [10, 0], sizes = [1, 32], strides = [1, 1]} : vector<17x32xf32> to vector<1x32xf32>
    %16 = vector.extract_strided_slice %4 {offsets = [11, 0], sizes = [1, 32], strides = [1, 1]} : vector<17x32xf32> to vector<1x32xf32>
    %17 = vector.extract_strided_slice %4 {offsets = [12, 0], sizes = [1, 32], strides = [1, 1]} : vector<17x32xf32> to vector<1x32xf32>
    %18 = vector.extract_strided_slice %4 {offsets = [13, 0], sizes = [1, 32], strides = [1, 1]} : vector<17x32xf32> to vector<1x32xf32>
    %19 = vector.extract_strided_slice %4 {offsets = [14, 0], sizes = [1, 32], strides = [1, 1]} : vector<17x32xf32> to vector<1x32xf32>
    %20 = vector.extract_strided_slice %4 {offsets = [15, 0], sizes = [1, 32], strides = [1, 1]} : vector<17x32xf32> to vector<1x32xf32>
    %21 = vector.extract_strided_slice %4 {offsets = [16, 0], sizes = [1, 32], strides = [1, 1]} : vector<17x32xf32> to vector<1x32xf32>
    %c0_3 = arith.constant 0 : index
    %c0_4 = arith.constant 0 : index
    %22 = vector.load %arg20[%c0_3, %c0_4] : memref<16x32xf32, #tpu.memory_space<vmem>>, vector<16x32xf32>
    %c0_5 = arith.constant 0 : index
    %c0_6 = arith.constant 0 : index
    %23 = vector.load %arg17[%c0_5, %c0_6] : memref<16x32xf32, #tpu.memory_space<vmem>>, vector<16x32xf32>
    %c0_7 = arith.constant 0 : index
    %c0_8 = arith.constant 0 : index
    %24 = vector.load %arg16[%c0_7, %c0_8] : memref<16x64xf32, #tpu.memory_space<vmem>>, vector<16x64xf32>
    %c0_9 = arith.constant 0 : index
    %c0_10 = arith.constant 0 : index
    %25 = vector.load %arg18[%c0_9, %c0_10] : memref<8x8xf32, #tpu.memory_space<vmem>>, vector<8x8xf32>
    %cst = arith.constant dense<0.000000e+00> : vector<16xf32>
    %26 = vector.multi_reduction <add>, %22, %cst [1] : vector<16x32xf32> to vector<16xf32>
    %27 = vector.shape_cast %26 : vector<16xf32> to vector<16x1xf32>
    %cst_11 = arith.constant 3.200000e+01 : f32
    %28 = vector.broadcast %cst_11 : f32 to vector<16x1xf32>
    %29 = arith.divf %27, %28 : vector<16x1xf32>
    %30 = vector.broadcast %29 : vector<16x1xf32> to vector<16x32xf32>
    %31 = arith.subf %22, %30 : vector<16x32xf32>
    %32 = arith.mulf %31, %31 : vector<16x32xf32>
    %cst_12 = arith.constant dense<0.000000e+00> : vector<16xf32>
    %33 = vector.multi_reduction <add>, %32, %cst_12 [1] : vector<16x32xf32> to vector<16xf32>
    %34 = vector.shape_cast %33 : vector<16xf32> to vector<16x1xf32>
    %cst_13 = arith.constant 3.200000e+01 : f32
    %35 = vector.broadcast %cst_13 : f32 to vector<16x1xf32>
    %36 = arith.divf %34, %35 : vector<16x1xf32>
    %cst_14 = arith.constant 9.99999974E-6 : f32
    %37 = vector.broadcast %cst_14 : f32 to vector<16x1xf32>
    %38 = arith.addf %36, %37 : vector<16x1xf32>
    %39 = math.rsqrt %38 : vector<16x1xf32>
    %40 = vector.broadcast %39 : vector<16x1xf32> to vector<16x32xf32>
    %41 = arith.mulf %31, %40 : vector<16x32xf32>
    %42 = vector.broadcast %5 : vector<1x32xf32> to vector<16x32xf32>
    %43 = arith.mulf %41, %42 : vector<16x32xf32>
    %44 = vector.broadcast %6 : vector<1x32xf32> to vector<16x32xf32>
    %45 = arith.addf %43, %44 : vector<16x32xf32>
    %46 = arith.truncf %45 : vector<16x32xf32> to vector<16x32xbf16>
    %c0_15 = arith.constant 0 : index
    %c0_16 = arith.constant 0 : index
    %c0_17 = arith.constant 0 : index
    %47 = vector.load %arg2[%c0_15, %c0_16, %c0_17] : memref<1x32x32xbf16, #tpu.memory_space<vmem>>, vector<1x32x32xbf16>
    %48 = vector.shape_cast %47 : vector<1x32x32xbf16> to vector<32x32xbf16>
    %cst_18 = arith.constant dense<0.000000e+00> : vector<16x32xf32>
    %49 = tpu.matmul %46, %48, %cst_18 {dimension_numbers = #tpu.dot_dimension_numbers<[1], [0], [0], [1], [0, 0, 1, 1], [], []>} : vector<16x32xbf16>, vector<32x32xbf16>, vector<16x32xf32> -> vector<16x32xf32>
    %50 = vector.broadcast %14 : vector<1x32xf32> to vector<16x32xf32>
    %51 = arith.addf %49, %50 : vector<16x32xf32>
    %c0_19 = arith.constant 0 : index
    %c0_20 = arith.constant 0 : index
    %c0_21 = arith.constant 0 : index
    %52 = vector.load %arg3[%c0_19, %c0_20, %c0_21] : memref<1x32x32xbf16, #tpu.memory_space<vmem>>, vector<1x32x32xbf16>
    %53 = vector.shape_cast %52 : vector<1x32x32xbf16> to vector<32x32xbf16>
    %c0_22 = arith.constant 0 : index
    %c0_23 = arith.constant 0 : index
    %54 = vector.load %arg15[%c0_22, %c0_23] : memref<32x64xbf16, #tpu.memory_space<vmem>>, vector<32x64xbf16>
    %cst_24 = arith.constant dense<0.000000e+00> : vector<32x64xf32>
    %55 = tpu.matmul %53, %54, %cst_24 {dimension_numbers = #tpu.dot_dimension_numbers<[1], [0], [0], [1], [0, 0, 1, 1], [], []>} : vector<32x32xbf16>, vector<32x64xbf16>, vector<32x64xf32> -> vector<32x64xf32>
    %c0_25 = arith.constant 0 : index
    %c0_26 = arith.constant 0 : index
    %56 = vector.load %arg14[%c0_25, %c0_26] : memref<64x32xbf16, #tpu.memory_space<vmem>>, vector<64x32xbf16>
    %c0_27 = arith.constant 0 : index
    %c0_28 = arith.constant 0 : index
    %c0_29 = arith.constant 0 : index
    %57 = vector.load %arg4[%c0_27, %c0_28, %c0_29] : memref<1x32x32xbf16, #tpu.memory_space<vmem>>, vector<1x32x32xbf16>
    %58 = vector.shape_cast %57 : vector<1x32x32xbf16> to vector<32x32xbf16>
    %cst_30 = arith.constant dense<0.000000e+00> : vector<64x32xf32>
    %59 = tpu.matmul %56, %58, %cst_30 {dimension_numbers = #tpu.dot_dimension_numbers<[1], [0], [0], [1], [0, 0, 1, 1], [], []>} : vector<64x32xbf16>, vector<32x32xbf16>, vector<64x32xf32> -> vector<64x32xf32>
    %60 = vector.broadcast %15 : vector<1x32xf32> to vector<64x32xf32>
    %61 = arith.addf %59, %60 : vector<64x32xf32>
    %62 = arith.truncf %51 : vector<16x32xf32> to vector<16x32xbf16>
    %63 = arith.truncf %55 : vector<32x64xf32> to vector<32x64xbf16>
    %64 = arith.truncf %61 : vector<64x32xf32> to vector<64x32xbf16>
    %c0_31 = arith.constant 0 : index
    %c0_32 = arith.constant 0 : index
    %c0_33 = arith.constant 0 : index
    %65 = vector.load %arg5[%c0_31, %c0_32, %c0_33] : memref<1x32x32xbf16, #tpu.memory_space<vmem>>, vector<1x32x32xbf16>
    %66 = vector.shape_cast %65 : vector<1x32x32xbf16> to vector<32x32xbf16>
    %cst_34 = arith.constant 0.000000e+00 : f32
    %67 = vector.broadcast %cst_34 : f32 to vector<16x32xf32>
    %68 = vector.extract_strided_slice %62 {offsets = [0, 0], sizes = [16, 8], strides = [1, 1]} : vector<16x32xbf16> to vector<16x8xbf16>
    %69 = vector.extract_strided_slice %63 {offsets = [0, 0], sizes = [8, 64], strides = [1, 1]} : vector<32x64xbf16> to vector<8x64xbf16>
    %cst_35 = arith.constant dense<0.000000e+00> : vector<16x64xf32>
    %70 = tpu.matmul %68, %69, %cst_35 {dimension_numbers = #tpu.dot_dimension_numbers<[1], [0], [0], [1], [0, 0, 1, 1], [], []>} : vector<16x8xbf16>, vector<8x64xbf16>, vector<16x64xf32> -> vector<16x64xf32>
    %71 = arith.addf %70, %24 : vector<16x64xf32>
    %cst_36 = arith.constant dense<0xFF800000> : vector<16xf32>
    %72 = vector.multi_reduction <maximumf>, %71, %cst_36 [1] : vector<16x64xf32> to vector<16xf32>
    %73 = vector.shape_cast %72 : vector<16xf32> to vector<16x1xf32>
    %cst_37 = arith.constant 0xFF800000 : f32
    %74 = vector.broadcast %cst_37 : f32 to vector<16x1xf32>
    %75 = arith.cmpf ogt, %73, %74 : vector<16x1xf32>
    %cst_38 = arith.constant 0.000000e+00 : f32
    %76 = vector.broadcast %cst_38 : f32 to vector<16x1xf32>
    %77 = arith.select %75, %73, %76 : vector<16x1xi1>, vector<16x1xf32>
    %78 = vector.broadcast %77 : vector<16x1xf32> to vector<16x64xf32>
    %79 = arith.subf %71, %78 : vector<16x64xf32>
    %80 = math.exp %79 : vector<16x64xf32>
    %cst_39 = arith.constant dense<0.000000e+00> : vector<16xf32>
    %81 = vector.multi_reduction <add>, %80, %cst_39 [1] : vector<16x64xf32> to vector<16xf32>
    %82 = vector.shape_cast %81 : vector<16xf32> to vector<16x1xf32>
    %cst_40 = arith.constant 1.000000e-30 : f32
    %83 = vector.broadcast %cst_40 : f32 to vector<16x1xf32>
    %84 = arith.maximumf %82, %83 : vector<16x1xf32>
    %85 = tpu.reciprocal %84 {approx = true} : vector<16x1xf32> -> vector<16x1xf32>
    %86 = arith.truncf %80 : vector<16x64xf32> to vector<16x64xbf16>
    %87 = vector.extract_strided_slice %64 {offsets = [0, 0], sizes = [64, 8], strides = [1, 1]} : vector<64x32xbf16> to vector<64x8xbf16>
    %cst_41 = arith.constant dense<0.000000e+00> : vector<16x8xf32>
    %88 = tpu.matmul %86, %87, %cst_41 {dimension_numbers = #tpu.dot_dimension_numbers<[1], [0], [0], [1], [0, 0, 1, 1], [], []>} : vector<16x64xbf16>, vector<64x8xbf16>, vector<16x8xf32> -> vector<16x8xf32>
    %89 = vector.broadcast %85 : vector<16x1xf32> to vector<16x8xf32>
    %90 = arith.mulf %88, %89 : vector<16x8xf32>
    %91 = arith.truncf %90 : vector<16x8xf32> to vector<16x8xbf16>
    %92 = vector.extract_strided_slice %66 {offsets = [0, 0], sizes = [8, 32], strides = [1, 1]} : vector<32x32xbf16> to vector<8x32xbf16>
    %cst_42 = arith.constant dense<0.000000e+00> : vector<16x32xf32>
    %93 = tpu.matmul %91, %92, %cst_42 {dimension_numbers = #tpu.dot_dimension_numbers<[1], [0], [0], [1], [0, 0, 1, 1], [], []>} : vector<16x8xbf16>, vector<8x32xbf16>, vector<16x32xf32> -> vector<16x32xf32>
    %94 = arith.addf %67, %93 : vector<16x32xf32>
    %95 = vector.extract_strided_slice %62 {offsets = [0, 8], sizes = [16, 8], strides = [1, 1]} : vector<16x32xbf16> to vector<16x8xbf16>
    %96 = vector.extract_strided_slice %63 {offsets = [8, 0], sizes = [8, 64], strides = [1, 1]} : vector<32x64xbf16> to vector<8x64xbf16>
    %cst_43 = arith.constant dense<0.000000e+00> : vector<16x64xf32>
    %97 = tpu.matmul %95, %96, %cst_43 {dimension_numbers = #tpu.dot_dimension_numbers<[1], [0], [0], [1], [0, 0, 1, 1], [], []>} : vector<16x8xbf16>, vector<8x64xbf16>, vector<16x64xf32> -> vector<16x64xf32>
    %98 = arith.addf %97, %24 : vector<16x64xf32>
    %cst_44 = arith.constant dense<0xFF800000> : vector<16xf32>
    %99 = vector.multi_reduction <maximumf>, %98, %cst_44 [1] : vector<16x64xf32> to vector<16xf32>
    %100 = vector.shape_cast %99 : vector<16xf32> to vector<16x1xf32>
    %cst_45 = arith.constant 0xFF800000 : f32
    %101 = vector.broadcast %cst_45 : f32 to vector<16x1xf32>
    %102 = arith.cmpf ogt, %100, %101 : vector<16x1xf32>
    %cst_46 = arith.constant 0.000000e+00 : f32
    %103 = vector.broadcast %cst_46 : f32 to vector<16x1xf32>
    %104 = arith.select %102, %100, %103 : vector<16x1xi1>, vector<16x1xf32>
    %105 = vector.broadcast %104 : vector<16x1xf32> to vector<16x64xf32>
    %106 = arith.subf %98, %105 : vector<16x64xf32>
    %107 = math.exp %106 : vector<16x64xf32>
    %cst_47 = arith.constant dense<0.000000e+00> : vector<16xf32>
    %108 = vector.multi_reduction <add>, %107, %cst_47 [1] : vector<16x64xf32> to vector<16xf32>
    %109 = vector.shape_cast %108 : vector<16xf32> to vector<16x1xf32>
    %cst_48 = arith.constant 1.000000e-30 : f32
    %110 = vector.broadcast %cst_48 : f32 to vector<16x1xf32>
    %111 = arith.maximumf %109, %110 : vector<16x1xf32>
    %112 = tpu.reciprocal %111 {approx = true} : vector<16x1xf32> -> vector<16x1xf32>
    %113 = arith.truncf %107 : vector<16x64xf32> to vector<16x64xbf16>
    %114 = vector.extract_strided_slice %64 {offsets = [0, 8], sizes = [64, 8], strides = [1, 1]} : vector<64x32xbf16> to vector<64x8xbf16>
    %cst_49 = arith.constant dense<0.000000e+00> : vector<16x8xf32>
    %115 = tpu.matmul %113, %114, %cst_49 {dimension_numbers = #tpu.dot_dimension_numbers<[1], [0], [0], [1], [0, 0, 1, 1], [], []>} : vector<16x64xbf16>, vector<64x8xbf16>, vector<16x8xf32> -> vector<16x8xf32>
    %116 = vector.broadcast %112 : vector<16x1xf32> to vector<16x8xf32>
    %117 = arith.mulf %115, %116 : vector<16x8xf32>
    %118 = arith.truncf %117 : vector<16x8xf32> to vector<16x8xbf16>
    %119 = vector.extract_strided_slice %66 {offsets = [8, 0], sizes = [8, 32], strides = [1, 1]} : vector<32x32xbf16> to vector<8x32xbf16>
    %cst_50 = arith.constant dense<0.000000e+00> : vector<16x32xf32>
    %120 = tpu.matmul %118, %119, %cst_50 {dimension_numbers = #tpu.dot_dimension_numbers<[1], [0], [0], [1], [0, 0, 1, 1], [], []>} : vector<16x8xbf16>, vector<8x32xbf16>, vector<16x32xf32> -> vector<16x32xf32>
    %121 = arith.addf %94, %120 : vector<16x32xf32>
    %122 = vector.extract_strided_slice %62 {offsets = [0, 16], sizes = [16, 8], strides = [1, 1]} : vector<16x32xbf16> to vector<16x8xbf16>
    %123 = vector.extract_strided_slice %63 {offsets = [16, 0], sizes = [8, 64], strides = [1, 1]} : vector<32x64xbf16> to vector<8x64xbf16>
    %cst_51 = arith.constant dense<0.000000e+00> : vector<16x64xf32>
    %124 = tpu.matmul %122, %123, %cst_51 {dimension_numbers = #tpu.dot_dimension_numbers<[1], [0], [0], [1], [0, 0, 1, 1], [], []>} : vector<16x8xbf16>, vector<8x64xbf16>, vector<16x64xf32> -> vector<16x64xf32>
    %125 = arith.addf %124, %24 : vector<16x64xf32>
    %cst_52 = arith.constant dense<0xFF800000> : vector<16xf32>
    %126 = vector.multi_reduction <maximumf>, %125, %cst_52 [1] : vector<16x64xf32> to vector<16xf32>
    %127 = vector.shape_cast %126 : vector<16xf32> to vector<16x1xf32>
    %cst_53 = arith.constant 0xFF800000 : f32
    %128 = vector.broadcast %cst_53 : f32 to vector<16x1xf32>
    %129 = arith.cmpf ogt, %127, %128 : vector<16x1xf32>
    %cst_54 = arith.constant 0.000000e+00 : f32
    %130 = vector.broadcast %cst_54 : f32 to vector<16x1xf32>
    %131 = arith.select %129, %127, %130 : vector<16x1xi1>, vector<16x1xf32>
    %132 = vector.broadcast %131 : vector<16x1xf32> to vector<16x64xf32>
    %133 = arith.subf %125, %132 : vector<16x64xf32>
    %134 = math.exp %133 : vector<16x64xf32>
    %cst_55 = arith.constant dense<0.000000e+00> : vector<16xf32>
    %135 = vector.multi_reduction <add>, %134, %cst_55 [1] : vector<16x64xf32> to vector<16xf32>
    %136 = vector.shape_cast %135 : vector<16xf32> to vector<16x1xf32>
    %cst_56 = arith.constant 1.000000e-30 : f32
    %137 = vector.broadcast %cst_56 : f32 to vector<16x1xf32>
    %138 = arith.maximumf %136, %137 : vector<16x1xf32>
    %139 = tpu.reciprocal %138 {approx = true} : vector<16x1xf32> -> vector<16x1xf32>
    %140 = arith.truncf %134 : vector<16x64xf32> to vector<16x64xbf16>
    %141 = vector.extract_strided_slice %64 {offsets = [0, 16], sizes = [64, 8], strides = [1, 1]} : vector<64x32xbf16> to vector<64x8xbf16>
    %cst_57 = arith.constant dense<0.000000e+00> : vector<16x8xf32>
    %142 = tpu.matmul %140, %141, %cst_57 {dimension_numbers = #tpu.dot_dimension_numbers<[1], [0], [0], [1], [0, 0, 1, 1], [], []>} : vector<16x64xbf16>, vector<64x8xbf16>, vector<16x8xf32> -> vector<16x8xf32>
    %143 = vector.broadcast %139 : vector<16x1xf32> to vector<16x8xf32>
    %144 = arith.mulf %142, %143 : vector<16x8xf32>
    %145 = arith.truncf %144 : vector<16x8xf32> to vector<16x8xbf16>
    %146 = vector.extract_strided_slice %66 {offsets = [16, 0], sizes = [8, 32], strides = [1, 1]} : vector<32x32xbf16> to vector<8x32xbf16>
    %cst_58 = arith.constant dense<0.000000e+00> : vector<16x32xf32>
    %147 = tpu.matmul %145, %146, %cst_58 {dimension_numbers = #tpu.dot_dimension_numbers<[1], [0], [0], [1], [0, 0, 1, 1], [], []>} : vector<16x8xbf16>, vector<8x32xbf16>, vector<16x32xf32> -> vector<16x32xf32>
    %148 = arith.addf %121, %147 : vector<16x32xf32>
    %149 = vector.extract_strided_slice %62 {offsets = [0, 24], sizes = [16, 8], strides = [1, 1]} : vector<16x32xbf16> to vector<16x8xbf16>
    %150 = vector.extract_strided_slice %63 {offsets = [24, 0], sizes = [8, 64], strides = [1, 1]} : vector<32x64xbf16> to vector<8x64xbf16>
    %cst_59 = arith.constant dense<0.000000e+00> : vector<16x64xf32>
    %151 = tpu.matmul %149, %150, %cst_59 {dimension_numbers = #tpu.dot_dimension_numbers<[1], [0], [0], [1], [0, 0, 1, 1], [], []>} : vector<16x8xbf16>, vector<8x64xbf16>, vector<16x64xf32> -> vector<16x64xf32>
    %152 = arith.addf %151, %24 : vector<16x64xf32>
    %cst_60 = arith.constant dense<0xFF800000> : vector<16xf32>
    %153 = vector.multi_reduction <maximumf>, %152, %cst_60 [1] : vector<16x64xf32> to vector<16xf32>
    %154 = vector.shape_cast %153 : vector<16xf32> to vector<16x1xf32>
    %cst_61 = arith.constant 0xFF800000 : f32
    %155 = vector.broadcast %cst_61 : f32 to vector<16x1xf32>
    %156 = arith.cmpf ogt, %154, %155 : vector<16x1xf32>
    %cst_62 = arith.constant 0.000000e+00 : f32
    %157 = vector.broadcast %cst_62 : f32 to vector<16x1xf32>
    %158 = arith.select %156, %154, %157 : vector<16x1xi1>, vector<16x1xf32>
    %159 = vector.broadcast %158 : vector<16x1xf32> to vector<16x64xf32>
    %160 = arith.subf %152, %159 : vector<16x64xf32>
    %161 = math.exp %160 : vector<16x64xf32>
    %cst_63 = arith.constant dense<0.000000e+00> : vector<16xf32>
    %162 = vector.multi_reduction <add>, %161, %cst_63 [1] : vector<16x64xf32> to vector<16xf32>
    %163 = vector.shape_cast %162 : vector<16xf32> to vector<16x1xf32>
    %cst_64 = arith.constant 1.000000e-30 : f32
    %164 = vector.broadcast %cst_64 : f32 to vector<16x1xf32>
    %165 = arith.maximumf %163, %164 : vector<16x1xf32>
    %166 = tpu.reciprocal %165 {approx = true} : vector<16x1xf32> -> vector<16x1xf32>
    %167 = arith.truncf %161 : vector<16x64xf32> to vector<16x64xbf16>
    %168 = vector.extract_strided_slice %64 {offsets = [0, 24], sizes = [64, 8], strides = [1, 1]} : vector<64x32xbf16> to vector<64x8xbf16>
    %cst_65 = arith.constant dense<0.000000e+00> : vector<16x8xf32>
    %169 = tpu.matmul %167, %168, %cst_65 {dimension_numbers = #tpu.dot_dimension_numbers<[1], [0], [0], [1], [0, 0, 1, 1], [], []>} : vector<16x64xbf16>, vector<64x8xbf16>, vector<16x8xf32> -> vector<16x8xf32>
    %170 = vector.broadcast %166 : vector<16x1xf32> to vector<16x8xf32>
    %171 = arith.mulf %169, %170 : vector<16x8xf32>
    %172 = arith.truncf %171 : vector<16x8xf32> to vector<16x8xbf16>
    %173 = vector.extract_strided_slice %66 {offsets = [24, 0], sizes = [8, 32], strides = [1, 1]} : vector<32x32xbf16> to vector<8x32xbf16>
    %cst_66 = arith.constant dense<0.000000e+00> : vector<16x32xf32>
    %174 = tpu.matmul %172, %173, %cst_66 {dimension_numbers = #tpu.dot_dimension_numbers<[1], [0], [0], [1], [0, 0, 1, 1], [], []>} : vector<16x8xbf16>, vector<8x32xbf16>, vector<16x32xf32> -> vector<16x32xf32>
    %175 = arith.addf %148, %174 : vector<16x32xf32>
    %176 = vector.broadcast %16 : vector<1x32xf32> to vector<16x32xf32>
    %177 = arith.addf %175, %176 : vector<16x32xf32>
    %178 = vector.broadcast %11 : vector<1x32xf32> to vector<16x32xf32>
    %179 = arith.mulf %177, %178 : vector<16x32xf32>
    %180 = arith.addf %22, %179 : vector<16x32xf32>
    %cst_67 = arith.constant dense<0.000000e+00> : vector<16xf32>
    %181 = vector.multi_reduction <add>, %180, %cst_67 [1] : vector<16x32xf32> to vector<16xf32>
    %182 = vector.shape_cast %181 : vector<16xf32> to vector<16x1xf32>
    %cst_68 = arith.constant 3.200000e+01 : f32
    %183 = vector.broadcast %cst_68 : f32 to vector<16x1xf32>
    %184 = arith.divf %182, %183 : vector<16x1xf32>
    %185 = vector.broadcast %184 : vector<16x1xf32> to vector<16x32xf32>
    %186 = arith.subf %180, %185 : vector<16x32xf32>
    %187 = arith.mulf %186, %186 : vector<16x32xf32>
    %cst_69 = arith.constant dense<0.000000e+00> : vector<16xf32>
    %188 = vector.multi_reduction <add>, %187, %cst_69 [1] : vector<16x32xf32> to vector<16xf32>
    %189 = vector.shape_cast %188 : vector<16xf32> to vector<16x1xf32>
    %cst_70 = arith.constant 3.200000e+01 : f32
    %190 = vector.broadcast %cst_70 : f32 to vector<16x1xf32>
    %191 = arith.divf %189, %190 : vector<16x1xf32>
    %cst_71 = arith.constant 9.99999974E-6 : f32
    %192 = vector.broadcast %cst_71 : f32 to vector<16x1xf32>
    %193 = arith.addf %191, %192 : vector<16x1xf32>
    %194 = math.rsqrt %193 : vector<16x1xf32>
    %195 = vector.broadcast %194 : vector<16x1xf32> to vector<16x32xf32>
    %196 = arith.mulf %186, %195 : vector<16x32xf32>
    %197 = vector.broadcast %7 : vector<1x32xf32> to vector<16x32xf32>
    %198 = arith.mulf %196, %197 : vector<16x32xf32>
    %199 = vector.broadcast %8 : vector<1x32xf32> to vector<16x32xf32>
    %200 = arith.addf %198, %199 : vector<16x32xf32>
    %201 = vector.extract_strided_slice %200 {offsets = [0, 0], sizes = [8, 32], strides = [1, 1]} : vector<16x32xf32> to vector<8x32xf32>
    %202 = vector.extract_strided_slice %23 {offsets = [0, 0], sizes = [8, 32], strides = [1, 1]} : vector<16x32xf32> to vector<8x32xf32>
    %203 = arith.addf %201, %202 : vector<8x32xf32>
    %204 = arith.truncf %203 : vector<8x32xf32> to vector<8x32xbf16>
    %c0_72 = arith.constant 0 : index
    %c0_73 = arith.constant 0 : index
    %c0_74 = arith.constant 0 : index
    %205 = vector.load %arg6[%c0_72, %c0_73, %c0_74] : memref<1x32x64xbf16, #tpu.memory_space<vmem>>, vector<1x32x64xbf16>
    %206 = vector.shape_cast %205 : vector<1x32x64xbf16> to vector<32x64xbf16>
    %cst_75 = arith.constant dense<0.000000e+00> : vector<8x64xf32>
    %207 = tpu.matmul %204, %206, %cst_75 {dimension_numbers = #tpu.dot_dimension_numbers<[1], [0], [0], [1], [0, 0, 1, 1], [], []>} : vector<8x32xbf16>, vector<32x64xbf16>, vector<8x64xf32> -> vector<8x64xf32>
    %208 = vector.extract_strided_slice %207 {offsets = [0, 0], sizes = [8, 32], strides = [1, 1]} : vector<8x64xf32> to vector<8x32xf32>
    %209 = vector.broadcast %17 : vector<1x32xf32> to vector<8x32xf32>
    %210 = arith.addf %208, %209 : vector<8x32xf32>
    %211 = arith.truncf %210 : vector<8x32xf32> to vector<8x32xbf16>
    %212 = vector.extract_strided_slice %207 {offsets = [0, 32], sizes = [8, 32], strides = [1, 1]} : vector<8x64xf32> to vector<8x32xf32>
    %213 = arith.truncf %212 : vector<8x32xf32> to vector<8x32xbf16>
    %214 = arith.truncf %201 : vector<8x32xf32> to vector<8x32xbf16>
    %c0_76 = arith.constant 0 : index
    %c0_77 = arith.constant 0 : index
    %c0_78 = arith.constant 0 : index
    %215 = vector.load %arg7[%c0_76, %c0_77, %c0_78] : memref<1x32x32xbf16, #tpu.memory_space<vmem>>, vector<1x32x32xbf16>
    %216 = vector.shape_cast %215 : vector<1x32x32xbf16> to vector<32x32xbf16>
    %cst_79 = arith.constant dense<0.000000e+00> : vector<8x32xf32>
    %217 = tpu.matmul %214, %216, %cst_79 {dimension_numbers = #tpu.dot_dimension_numbers<[1], [0], [0], [1], [0, 0, 1, 1], [], []>} : vector<8x32xbf16>, vector<32x32xbf16>, vector<8x32xf32> -> vector<8x32xf32>
    %218 = vector.broadcast %18 : vector<1x32xf32> to vector<8x32xf32>
    %219 = arith.addf %217, %218 : vector<8x32xf32>
    %220 = arith.truncf %219 : vector<8x32xf32> to vector<8x32xbf16>
    %c0_80 = arith.constant 0 : index
    %c0_81 = arith.constant 0 : index
    %c0_82 = arith.constant 0 : index
    %221 = vector.load %arg8[%c0_80, %c0_81, %c0_82] : memref<1x32x32xbf16, #tpu.memory_space<vmem>>, vector<1x32x32xbf16>
    %222 = vector.shape_cast %221 : vector<1x32x32xbf16> to vector<32x32xbf16>
    %cst_83 = arith.constant 0.000000e+00 : f32
    %223 = vector.broadcast %cst_83 : f32 to vector<8x32xf32>
    %224 = vector.extract_strided_slice %211 {offsets = [0, 0], sizes = [8, 8], strides = [1, 1]} : vector<8x32xbf16> to vector<8x8xbf16>
    %225 = vector.extract_strided_slice %213 {offsets = [0, 0], sizes = [8, 8], strides = [1, 1]} : vector<8x32xbf16> to vector<8x8xbf16>
    %cst_84 = arith.constant dense<0.000000e+00> : vector<8x8xf32>
    %226 = tpu.matmul %224, %225, %cst_84 {dimension_numbers = #tpu.dot_dimension_numbers<[1], [1], [0], [0], [0, 0, 1, 0], [], []>} : vector<8x8xbf16>, vector<8x8xbf16>, vector<8x8xf32> -> vector<8x8xf32>
    %227 = arith.addf %226, %25 : vector<8x8xf32>
    %cst_85 = arith.constant dense<0xFF800000> : vector<8xf32>
    %228 = vector.multi_reduction <maximumf>, %227, %cst_85 [1] : vector<8x8xf32> to vector<8xf32>
    %229 = vector.shape_cast %228 : vector<8xf32> to vector<8x1xf32>
    %cst_86 = arith.constant 0xFF800000 : f32
    %230 = vector.broadcast %cst_86 : f32 to vector<8x1xf32>
    %231 = arith.cmpf ogt, %229, %230 : vector<8x1xf32>
    %cst_87 = arith.constant 0.000000e+00 : f32
    %232 = vector.broadcast %cst_87 : f32 to vector<8x1xf32>
    %233 = arith.select %231, %229, %232 : vector<8x1xi1>, vector<8x1xf32>
    %234 = vector.broadcast %233 : vector<8x1xf32> to vector<8x8xf32>
    %235 = arith.subf %227, %234 : vector<8x8xf32>
    %236 = math.exp %235 : vector<8x8xf32>
    %cst_88 = arith.constant dense<0.000000e+00> : vector<8xf32>
    %237 = vector.multi_reduction <add>, %236, %cst_88 [1] : vector<8x8xf32> to vector<8xf32>
    %238 = vector.shape_cast %237 : vector<8xf32> to vector<8x1xf32>
    %cst_89 = arith.constant 1.000000e-30 : f32
    %239 = vector.broadcast %cst_89 : f32 to vector<8x1xf32>
    %240 = arith.maximumf %238, %239 : vector<8x1xf32>
    %241 = tpu.reciprocal %240 {approx = true} : vector<8x1xf32> -> vector<8x1xf32>
    %242 = arith.truncf %236 : vector<8x8xf32> to vector<8x8xbf16>
    %243 = vector.extract_strided_slice %220 {offsets = [0, 0], sizes = [8, 8], strides = [1, 1]} : vector<8x32xbf16> to vector<8x8xbf16>
    %cst_90 = arith.constant dense<0.000000e+00> : vector<8x8xf32>
    %244 = tpu.matmul %242, %243, %cst_90 {dimension_numbers = #tpu.dot_dimension_numbers<[1], [0], [0], [1], [0, 0, 1, 1], [], []>} : vector<8x8xbf16>, vector<8x8xbf16>, vector<8x8xf32> -> vector<8x8xf32>
    %245 = vector.broadcast %241 : vector<8x1xf32> to vector<8x8xf32>
    %246 = arith.mulf %244, %245 : vector<8x8xf32>
    %247 = arith.truncf %246 : vector<8x8xf32> to vector<8x8xbf16>
    %248 = vector.extract_strided_slice %222 {offsets = [0, 0], sizes = [8, 32], strides = [1, 1]} : vector<32x32xbf16> to vector<8x32xbf16>
    %cst_91 = arith.constant dense<0.000000e+00> : vector<8x32xf32>
    %249 = tpu.matmul %247, %248, %cst_91 {dimension_numbers = #tpu.dot_dimension_numbers<[1], [0], [0], [1], [0, 0, 1, 1], [], []>} : vector<8x8xbf16>, vector<8x32xbf16>, vector<8x32xf32> -> vector<8x32xf32>
    %250 = arith.addf %223, %249 : vector<8x32xf32>
    %251 = vector.extract_strided_slice %211 {offsets = [0, 8], sizes = [8, 8], strides = [1, 1]} : vector<8x32xbf16> to vector<8x8xbf16>
    %252 = vector.extract_strided_slice %213 {offsets = [0, 8], sizes = [8, 8], strides = [1, 1]} : vector<8x32xbf16> to vector<8x8xbf16>
    %cst_92 = arith.constant dense<0.000000e+00> : vector<8x8xf32>
    %253 = tpu.matmul %251, %252, %cst_92 {dimension_numbers = #tpu.dot_dimension_numbers<[1], [1], [0], [0], [0, 0, 1, 0], [], []>} : vector<8x8xbf16>, vector<8x8xbf16>, vector<8x8xf32> -> vector<8x8xf32>
    %254 = arith.addf %253, %25 : vector<8x8xf32>
    %cst_93 = arith.constant dense<0xFF800000> : vector<8xf32>
    %255 = vector.multi_reduction <maximumf>, %254, %cst_93 [1] : vector<8x8xf32> to vector<8xf32>
    %256 = vector.shape_cast %255 : vector<8xf32> to vector<8x1xf32>
    %cst_94 = arith.constant 0xFF800000 : f32
    %257 = vector.broadcast %cst_94 : f32 to vector<8x1xf32>
    %258 = arith.cmpf ogt, %256, %257 : vector<8x1xf32>
    %cst_95 = arith.constant 0.000000e+00 : f32
    %259 = vector.broadcast %cst_95 : f32 to vector<8x1xf32>
    %260 = arith.select %258, %256, %259 : vector<8x1xi1>, vector<8x1xf32>
    %261 = vector.broadcast %260 : vector<8x1xf32> to vector<8x8xf32>
    %262 = arith.subf %254, %261 : vector<8x8xf32>
    %263 = math.exp %262 : vector<8x8xf32>
    %cst_96 = arith.constant dense<0.000000e+00> : vector<8xf32>
    %264 = vector.multi_reduction <add>, %263, %cst_96 [1] : vector<8x8xf32> to vector<8xf32>
    %265 = vector.shape_cast %264 : vector<8xf32> to vector<8x1xf32>
    %cst_97 = arith.constant 1.000000e-30 : f32
    %266 = vector.broadcast %cst_97 : f32 to vector<8x1xf32>
    %267 = arith.maximumf %265, %266 : vector<8x1xf32>
    %268 = tpu.reciprocal %267 {approx = true} : vector<8x1xf32> -> vector<8x1xf32>
    %269 = arith.truncf %263 : vector<8x8xf32> to vector<8x8xbf16>
    %270 = vector.extract_strided_slice %220 {offsets = [0, 8], sizes = [8, 8], strides = [1, 1]} : vector<8x32xbf16> to vector<8x8xbf16>
    %cst_98 = arith.constant dense<0.000000e+00> : vector<8x8xf32>
    %271 = tpu.matmul %269, %270, %cst_98 {dimension_numbers = #tpu.dot_dimension_numbers<[1], [0], [0], [1], [0, 0, 1, 1], [], []>} : vector<8x8xbf16>, vector<8x8xbf16>, vector<8x8xf32> -> vector<8x8xf32>
    %272 = vector.broadcast %268 : vector<8x1xf32> to vector<8x8xf32>
    %273 = arith.mulf %271, %272 : vector<8x8xf32>
    %274 = arith.truncf %273 : vector<8x8xf32> to vector<8x8xbf16>
    %275 = vector.extract_strided_slice %222 {offsets = [8, 0], sizes = [8, 32], strides = [1, 1]} : vector<32x32xbf16> to vector<8x32xbf16>
    %cst_99 = arith.constant dense<0.000000e+00> : vector<8x32xf32>
    %276 = tpu.matmul %274, %275, %cst_99 {dimension_numbers = #tpu.dot_dimension_numbers<[1], [0], [0], [1], [0, 0, 1, 1], [], []>} : vector<8x8xbf16>, vector<8x32xbf16>, vector<8x32xf32> -> vector<8x32xf32>
    %277 = arith.addf %250, %276 : vector<8x32xf32>
    %278 = vector.extract_strided_slice %211 {offsets = [0, 16], sizes = [8, 8], strides = [1, 1]} : vector<8x32xbf16> to vector<8x8xbf16>
    %279 = vector.extract_strided_slice %213 {offsets = [0, 16], sizes = [8, 8], strides = [1, 1]} : vector<8x32xbf16> to vector<8x8xbf16>
    %cst_100 = arith.constant dense<0.000000e+00> : vector<8x8xf32>
    %280 = tpu.matmul %278, %279, %cst_100 {dimension_numbers = #tpu.dot_dimension_numbers<[1], [1], [0], [0], [0, 0, 1, 0], [], []>} : vector<8x8xbf16>, vector<8x8xbf16>, vector<8x8xf32> -> vector<8x8xf32>
    %281 = arith.addf %280, %25 : vector<8x8xf32>
    %cst_101 = arith.constant dense<0xFF800000> : vector<8xf32>
    %282 = vector.multi_reduction <maximumf>, %281, %cst_101 [1] : vector<8x8xf32> to vector<8xf32>
    %283 = vector.shape_cast %282 : vector<8xf32> to vector<8x1xf32>
    %cst_102 = arith.constant 0xFF800000 : f32
    %284 = vector.broadcast %cst_102 : f32 to vector<8x1xf32>
    %285 = arith.cmpf ogt, %283, %284 : vector<8x1xf32>
    %cst_103 = arith.constant 0.000000e+00 : f32
    %286 = vector.broadcast %cst_103 : f32 to vector<8x1xf32>
    %287 = arith.select %285, %283, %286 : vector<8x1xi1>, vector<8x1xf32>
    %288 = vector.broadcast %287 : vector<8x1xf32> to vector<8x8xf32>
    %289 = arith.subf %281, %288 : vector<8x8xf32>
    %290 = math.exp %289 : vector<8x8xf32>
    %cst_104 = arith.constant dense<0.000000e+00> : vector<8xf32>
    %291 = vector.multi_reduction <add>, %290, %cst_104 [1] : vector<8x8xf32> to vector<8xf32>
    %292 = vector.shape_cast %291 : vector<8xf32> to vector<8x1xf32>
    %cst_105 = arith.constant 1.000000e-30 : f32
    %293 = vector.broadcast %cst_105 : f32 to vector<8x1xf32>
    %294 = arith.maximumf %292, %293 : vector<8x1xf32>
    %295 = tpu.reciprocal %294 {approx = true} : vector<8x1xf32> -> vector<8x1xf32>
    %296 = arith.truncf %290 : vector<8x8xf32> to vector<8x8xbf16>
    %297 = vector.extract_strided_slice %220 {offsets = [0, 16], sizes = [8, 8], strides = [1, 1]} : vector<8x32xbf16> to vector<8x8xbf16>
    %cst_106 = arith.constant dense<0.000000e+00> : vector<8x8xf32>
    %298 = tpu.matmul %296, %297, %cst_106 {dimension_numbers = #tpu.dot_dimension_numbers<[1], [0], [0], [1], [0, 0, 1, 1], [], []>} : vector<8x8xbf16>, vector<8x8xbf16>, vector<8x8xf32> -> vector<8x8xf32>
    %299 = vector.broadcast %295 : vector<8x1xf32> to vector<8x8xf32>
    %300 = arith.mulf %298, %299 : vector<8x8xf32>
    %301 = arith.truncf %300 : vector<8x8xf32> to vector<8x8xbf16>
    %302 = vector.extract_strided_slice %222 {offsets = [16, 0], sizes = [8, 32], strides = [1, 1]} : vector<32x32xbf16> to vector<8x32xbf16>
    %cst_107 = arith.constant dense<0.000000e+00> : vector<8x32xf32>
    %303 = tpu.matmul %301, %302, %cst_107 {dimension_numbers = #tpu.dot_dimension_numbers<[1], [0], [0], [1], [0, 0, 1, 1], [], []>} : vector<8x8xbf16>, vector<8x32xbf16>, vector<8x32xf32> -> vector<8x32xf32>
    %304 = arith.addf %277, %303 : vector<8x32xf32>
    %305 = vector.extract_strided_slice %211 {offsets = [0, 24], sizes = [8, 8], strides = [1, 1]} : vector<8x32xbf16> to vector<8x8xbf16>
    %306 = vector.extract_strided_slice %213 {offsets = [0, 24], sizes = [8, 8], strides = [1, 1]} : vector<8x32xbf16> to vector<8x8xbf16>
    %cst_108 = arith.constant dense<0.000000e+00> : vector<8x8xf32>
    %307 = tpu.matmul %305, %306, %cst_108 {dimension_numbers = #tpu.dot_dimension_numbers<[1], [1], [0], [0], [0, 0, 1, 0], [], []>} : vector<8x8xbf16>, vector<8x8xbf16>, vector<8x8xf32> -> vector<8x8xf32>
    %308 = arith.addf %307, %25 : vector<8x8xf32>
    %cst_109 = arith.constant dense<0xFF800000> : vector<8xf32>
    %309 = vector.multi_reduction <maximumf>, %308, %cst_109 [1] : vector<8x8xf32> to vector<8xf32>
    %310 = vector.shape_cast %309 : vector<8xf32> to vector<8x1xf32>
    %cst_110 = arith.constant 0xFF800000 : f32
    %311 = vector.broadcast %cst_110 : f32 to vector<8x1xf32>
    %312 = arith.cmpf ogt, %310, %311 : vector<8x1xf32>
    %cst_111 = arith.constant 0.000000e+00 : f32
    %313 = vector.broadcast %cst_111 : f32 to vector<8x1xf32>
    %314 = arith.select %312, %310, %313 : vector<8x1xi1>, vector<8x1xf32>
    %315 = vector.broadcast %314 : vector<8x1xf32> to vector<8x8xf32>
    %316 = arith.subf %308, %315 : vector<8x8xf32>
    %317 = math.exp %316 : vector<8x8xf32>
    %cst_112 = arith.constant dense<0.000000e+00> : vector<8xf32>
    %318 = vector.multi_reduction <add>, %317, %cst_112 [1] : vector<8x8xf32> to vector<8xf32>
    %319 = vector.shape_cast %318 : vector<8xf32> to vector<8x1xf32>
    %cst_113 = arith.constant 1.000000e-30 : f32
    %320 = vector.broadcast %cst_113 : f32 to vector<8x1xf32>
    %321 = arith.maximumf %319, %320 : vector<8x1xf32>
    %322 = tpu.reciprocal %321 {approx = true} : vector<8x1xf32> -> vector<8x1xf32>
    %323 = arith.truncf %317 : vector<8x8xf32> to vector<8x8xbf16>
    %324 = vector.extract_strided_slice %220 {offsets = [0, 24], sizes = [8, 8], strides = [1, 1]} : vector<8x32xbf16> to vector<8x8xbf16>
    %cst_114 = arith.constant dense<0.000000e+00> : vector<8x8xf32>
    %325 = tpu.matmul %323, %324, %cst_114 {dimension_numbers = #tpu.dot_dimension_numbers<[1], [0], [0], [1], [0, 0, 1, 1], [], []>} : vector<8x8xbf16>, vector<8x8xbf16>, vector<8x8xf32> -> vector<8x8xf32>
    %326 = vector.broadcast %322 : vector<8x1xf32> to vector<8x8xf32>
    %327 = arith.mulf %325, %326 : vector<8x8xf32>
    %328 = arith.truncf %327 : vector<8x8xf32> to vector<8x8xbf16>
    %329 = vector.extract_strided_slice %222 {offsets = [24, 0], sizes = [8, 32], strides = [1, 1]} : vector<32x32xbf16> to vector<8x32xbf16>
    %cst_115 = arith.constant dense<0.000000e+00> : vector<8x32xf32>
    %330 = tpu.matmul %328, %329, %cst_115 {dimension_numbers = #tpu.dot_dimension_numbers<[1], [0], [0], [1], [0, 0, 1, 1], [], []>} : vector<8x8xbf16>, vector<8x32xbf16>, vector<8x32xf32> -> vector<8x32xf32>
    %331 = arith.addf %304, %330 : vector<8x32xf32>
    %332 = vector.broadcast %19 : vector<1x32xf32> to vector<8x32xf32>
    %333 = arith.addf %331, %332 : vector<8x32xf32>
    %334 = vector.extract_strided_slice %200 {offsets = [8, 0], sizes = [8, 32], strides = [1, 1]} : vector<16x32xf32> to vector<8x32xf32>
    %335 = vector.extract_strided_slice %23 {offsets = [8, 0], sizes = [8, 32], strides = [1, 1]} : vector<16x32xf32> to vector<8x32xf32>
    %336 = arith.addf %334, %335 : vector<8x32xf32>
    %337 = arith.truncf %336 : vector<8x32xf32> to vector<8x32xbf16>
    %c0_116 = arith.constant 0 : index
    %c0_117 = arith.constant 0 : index
    %c0_118 = arith.constant 0 : index
    %338 = vector.load %arg9[%c0_116, %c0_117, %c0_118] : memref<1x32x32xbf16, #tpu.memory_space<vmem>>, vector<1x32x32xbf16>
    %339 = vector.shape_cast %338 : vector<1x32x32xbf16> to vector<32x32xbf16>
    %cst_119 = arith.constant dense<0.000000e+00> : vector<8x32xf32>
    %340 = tpu.matmul %337, %339, %cst_119 {dimension_numbers = #tpu.dot_dimension_numbers<[1], [0], [0], [1], [0, 0, 1, 1], [], []>} : vector<8x32xbf16>, vector<32x32xbf16>, vector<8x32xf32> -> vector<8x32xf32>
    %341 = vector.broadcast %20 : vector<1x32xf32> to vector<8x32xf32>
    %342 = arith.addf %340, %341 : vector<8x32xf32>
    %343 = tpu.concatenate %333, %342 in 0 : vector<8x32xf32>, vector<8x32xf32> -> vector<16x32xf32>
    %344 = vector.broadcast %12 : vector<1x32xf32> to vector<16x32xf32>
    %345 = arith.mulf %343, %344 : vector<16x32xf32>
    %346 = arith.addf %200, %345 : vector<16x32xf32>
    %cst_120 = arith.constant dense<0.000000e+00> : vector<16xf32>
    %347 = vector.multi_reduction <add>, %200, %cst_120 [1] : vector<16x32xf32> to vector<16xf32>
    %348 = vector.shape_cast %347 : vector<16xf32> to vector<16x1xf32>
    %cst_121 = arith.constant 3.200000e+01 : f32
    %349 = vector.broadcast %cst_121 : f32 to vector<16x1xf32>
    %350 = arith.divf %348, %349 : vector<16x1xf32>
    %351 = vector.broadcast %350 : vector<16x1xf32> to vector<16x32xf32>
    %352 = arith.subf %200, %351 : vector<16x32xf32>
    %353 = arith.mulf %352, %352 : vector<16x32xf32>
    %cst_122 = arith.constant dense<0.000000e+00> : vector<16xf32>
    %354 = vector.multi_reduction <add>, %353, %cst_122 [1] : vector<16x32xf32> to vector<16xf32>
    %355 = vector.shape_cast %354 : vector<16xf32> to vector<16x1xf32>
    %cst_123 = arith.constant 3.200000e+01 : f32
    %356 = vector.broadcast %cst_123 : f32 to vector<16x1xf32>
    %357 = arith.divf %355, %356 : vector<16x1xf32>
    %cst_124 = arith.constant 9.99999974E-6 : f32
    %358 = vector.broadcast %cst_124 : f32 to vector<16x1xf32>
    %359 = arith.addf %357, %358 : vector<16x1xf32>
    %360 = math.rsqrt %359 : vector<16x1xf32>
    %361 = vector.broadcast %360 : vector<16x1xf32> to vector<16x32xf32>
    %362 = arith.mulf %352, %361 : vector<16x32xf32>
    %363 = vector.broadcast %9 : vector<1x32xf32> to vector<16x32xf32>
    %364 = arith.mulf %362, %363 : vector<16x32xf32>
    %365 = vector.broadcast %10 : vector<1x32xf32> to vector<16x32xf32>
    %366 = arith.addf %364, %365 : vector<16x32xf32>
    %367 = arith.truncf %366 : vector<16x32xf32> to vector<16x32xbf16>
    %c0_125 = arith.constant 0 : index
    %c0_126 = arith.constant 0 : index
    %c0_127 = arith.constant 0 : index
    %368 = vector.load %arg10[%c0_125, %c0_126, %c0_127] : memref<1x32x128xbf16, #tpu.memory_space<vmem>>, vector<1x32x128xbf16>
    %369 = vector.shape_cast %368 : vector<1x32x128xbf16> to vector<32x128xbf16>
    %cst_128 = arith.constant dense<0.000000e+00> : vector<16x128xf32>
    %370 = tpu.matmul %367, %369, %cst_128 {dimension_numbers = #tpu.dot_dimension_numbers<[1], [0], [0], [1], [0, 0, 1, 1], [], []>} : vector<16x32xbf16>, vector<32x128xbf16>, vector<16x128xf32> -> vector<16x128xf32>
    %c0_129 = arith.constant 0 : index
    %c0_130 = arith.constant 0 : index
    %c0_131 = arith.constant 0 : index
    %371 = vector.load %arg11[%c0_129, %c0_130, %c0_131] : memref<1x1x128xf32, #tpu.memory_space<vmem>>, vector<1x1x128xf32>
    %372 = vector.shape_cast %371 : vector<1x1x128xf32> to vector<1x128xf32>
    %373 = vector.broadcast %372 : vector<1x128xf32> to vector<16x128xf32>
    %374 = arith.addf %370, %373 : vector<16x128xf32>
    %cst_132 = arith.constant 5.000000e-01 : f32
    %375 = vector.broadcast %cst_132 : f32 to vector<16x128xf32>
    %376 = arith.mulf %375, %374 : vector<16x128xf32>
    %cst_133 = arith.constant 0.707106769 : f32
    %377 = vector.broadcast %cst_133 : f32 to vector<16x128xf32>
    %378 = arith.mulf %374, %377 : vector<16x128xf32>
    %cst_134 = arith.constant 0.000000e+00 : f32
    %379 = vector.broadcast %cst_134 : f32 to vector<16x128xf32>
    %380 = arith.cmpf oge, %378, %379 : vector<16x128xf32>
    %cst_135 = arith.constant 1.000000e+00 : f32
    %cst_136 = arith.constant -1.000000e+00 : f32
    %381 = vector.broadcast %cst_135 : f32 to vector<16x128xf32>
    %382 = vector.broadcast %cst_136 : f32 to vector<16x128xf32>
    %383 = arith.select %380, %381, %382 : vector<16x128xi1>, vector<16x128xf32>
    %384 = math.absf %378 : vector<16x128xf32>
    %cst_137 = arith.constant 0.327591091 : f32
    %385 = vector.broadcast %cst_137 : f32 to vector<16x128xf32>
    %386 = arith.mulf %385, %384 : vector<16x128xf32>
    %cst_138 = arith.constant 1.000000e+00 : f32
    %387 = vector.broadcast %cst_138 : f32 to vector<16x128xf32>
    %388 = arith.addf %387, %386 : vector<16x128xf32>
    %cst_139 = arith.constant 1.000000e+00 : f32
    %389 = vector.broadcast %cst_139 : f32 to vector<16x128xf32>
    %390 = arith.divf %389, %388 : vector<16x128xf32>
    %cst_140 = arith.constant 1.06140542 : f32
    %391 = vector.broadcast %cst_140 : f32 to vector<16x128xf32>
    %392 = arith.mulf %391, %390 : vector<16x128xf32>
    %cst_141 = arith.constant -1.45315206 : f32
    %393 = vector.broadcast %cst_141 : f32 to vector<16x128xf32>
    %394 = arith.addf %392, %393 : vector<16x128xf32>
    %395 = arith.mulf %394, %390 : vector<16x128xf32>
    %cst_142 = arith.constant 1.42141378 : f32
    %396 = vector.broadcast %cst_142 : f32 to vector<16x128xf32>
    %397 = arith.addf %395, %396 : vector<16x128xf32>
    %398 = arith.mulf %397, %390 : vector<16x128xf32>
    %cst_143 = arith.constant -0.284496725 : f32
    %399 = vector.broadcast %cst_143 : f32 to vector<16x128xf32>
    %400 = arith.addf %398, %399 : vector<16x128xf32>
    %401 = arith.mulf %400, %390 : vector<16x128xf32>
    %cst_144 = arith.constant 0.254829586 : f32
    %402 = vector.broadcast %cst_144 : f32 to vector<16x128xf32>
    %403 = arith.addf %401, %402 : vector<16x128xf32>
    %404 = arith.mulf %403, %390 : vector<16x128xf32>
    %cst_145 = arith.constant 0.000000e+00 : f32
    %405 = vector.broadcast %cst_145 : f32 to vector<16x128xf32>
    %406 = arith.subf %405, %384 : vector<16x128xf32>
    %407 = arith.mulf %406, %384 : vector<16x128xf32>
    %408 = math.exp %407 : vector<16x128xf32>
    %409 = arith.mulf %404, %408 : vector<16x128xf32>
    %cst_146 = arith.constant 1.000000e+00 : f32
    %410 = vector.broadcast %cst_146 : f32 to vector<16x128xf32>
    %411 = arith.subf %410, %409 : vector<16x128xf32>
    %412 = arith.mulf %383, %411 : vector<16x128xf32>
    %cst_147 = arith.constant 1.000000e+00 : f32
    %413 = vector.broadcast %cst_147 : f32 to vector<16x128xf32>
    %414 = arith.addf %413, %412 : vector<16x128xf32>
    %415 = arith.mulf %376, %414 : vector<16x128xf32>
    %416 = arith.truncf %415 : vector<16x128xf32> to vector<16x128xbf16>
    %c0_148 = arith.constant 0 : index
    %c0_149 = arith.constant 0 : index
    %c0_150 = arith.constant 0 : index
    %417 = vector.load %arg12[%c0_148, %c0_149, %c0_150] : memref<1x128x32xbf16, #tpu.memory_space<vmem>>, vector<1x128x32xbf16>
    %418 = vector.shape_cast %417 : vector<1x128x32xbf16> to vector<128x32xbf16>
    %cst_151 = arith.constant dense<0.000000e+00> : vector<16x32xf32>
    %419 = tpu.matmul %416, %418, %cst_151 {dimension_numbers = #tpu.dot_dimension_numbers<[1], [0], [0], [1], [0, 0, 1, 1], [], []>} : vector<16x128xbf16>, vector<128x32xbf16>, vector<16x32xf32> -> vector<16x32xf32>
    %420 = vector.broadcast %21 : vector<1x32xf32> to vector<16x32xf32>
    %421 = arith.addf %419, %420 : vector<16x32xf32>
    %422 = vector.broadcast %13 : vector<1x32xf32> to vector<16x32xf32>
    %423 = arith.mulf %421, %422 : vector<16x32xf32>
    %424 = arith.addf %346, %423 : vector<16x32xf32>
    %c0_152 = arith.constant 0 : index
    %c0_153 = arith.constant 0 : index
    %425 = vector.load %arg20[%c0_152, %c0_153] : memref<16x32xf32, #tpu.memory_space<vmem>>, vector<16x32xf32>
    tpu.vector_store %arg20[%c0_152, %c0_153], %424 {strides = array<i32>} : memref<16x32xf32, #tpu.memory_space<vmem>>, vector<16x32xf32>,
    %c0_154 = arith.constant 0 : index
    %c0_155 = arith.constant 0 : index
    %c0_156 = arith.constant 0 : index
    %426 = vector.load %arg19[%c0_154, %c0_155, %c0_156] : memref<1x16x32xf32, #tpu.memory_space<vmem>>, vector<1x16x32xf32>
    %427 = vector.shape_cast %426 : vector<1x16x32xf32> to vector<16x32xf32>
    %428 = vector.shape_cast %424 : vector<16x32xf32> to vector<1x16x32xf32>
    tpu.vector_store %arg19[%c0_154, %c0_155, %c0_156], %428 {strides = array<i32>} : memref<1x16x32xf32, #tpu.memory_space<vmem>>, vector<1x16x32xf32>,
    return
  }
  func.func @transform_0(%arg0: i32) -> (i32, i32, i32) {
    %c0_i32 = arith.constant 0 : i32
    %c0_i32_0 = arith.constant 0 : i32
    %c0_i32_1 = arith.constant 0 : i32
    return %arg0, %c0_i32, %c0_i32_0 : i32, i32, i32
  }
  func.func @transform_1(%arg0: i32) -> (i32, i32, i32) {
    %c0_i32 = arith.constant 0 : i32
    %c0_i32_0 = arith.constant 0 : i32
    %c0_i32_1 = arith.constant 0 : i32
    return %arg0, %c0_i32, %c0_i32_0 : i32, i32, i32
  }
  func.func @transform_2(%arg0: i32) -> (i32, i32, i32) {
    %c0_i32 = arith.constant 0 : i32
    %c0_i32_0 = arith.constant 0 : i32
    %c0_i32_1 = arith.constant 0 : i32
    return %arg0, %c0_i32, %c0_i32_0 : i32, i32, i32
  }
  func.func @transform_3(%arg0: i32) -> (i32, i32, i32) {
    %c0_i32 = arith.constant 0 : i32
    %c0_i32_0 = arith.constant 0 : i32
    %c0_i32_1 = arith.constant 0 : i32
    return %arg0, %c0_i32, %c0_i32_0 : i32, i32, i32
  }
  func.func @transform_4(%arg0: i32) -> (i32, i32, i32) {
    %c0_i32 = arith.constant 0 : i32
    %c0_i32_0 = arith.constant 0 : i32
    %c0_i32_1 = arith.constant 0 : i32
    return %arg0, %c0_i32, %c0_i32_0 : i32, i32, i32
  }
  func.func @transform_5(%arg0: i32) -> (i32, i32, i32) {
    %c0_i32 = arith.constant 0 : i32
    %c0_i32_0 = arith.constant 0 : i32
    %c0_i32_1 = arith.constant 0 : i32
    return %arg0, %c0_i32, %c0_i32_0 : i32, i32, i32
  }
  func.func @transform_6(%arg0: i32) -> (i32, i32, i32) {
    %c0_i32 = arith.constant 0 : i32
    %c0_i32_0 = arith.constant 0 : i32
    %c0_i32_1 = arith.constant 0 : i32
    return %arg0, %c0_i32, %c0_i32_0 : i32, i32, i32
  }
  func.func @transform_7(%arg0: i32) -> (i32, i32, i32) {
    %c0_i32 = arith.constant 0 : i32
    %c0_i32_0 = arith.constant 0 : i32
    %c0_i32_1 = arith.constant 0 : i32
    return %arg0, %c0_i32, %c0_i32_0 : i32, i32, i32
  }
  func.func @transform_8(%arg0: i32) -> (i32, i32, i32) {
    %c0_i32 = arith.constant 0 : i32
    %c0_i32_0 = arith.constant 0 : i32
    %c0_i32_1 = arith.constant 0 : i32
    return %arg0, %c0_i32, %c0_i32_0 : i32, i32, i32
  }
  func.func @transform_9(%arg0: i32) -> (i32, i32, i32) {
    %c0_i32 = arith.constant 0 : i32
    %c0_i32_0 = arith.constant 0 : i32
    %c0_i32_1 = arith.constant 0 : i32
    return %arg0, %c0_i32, %c0_i32_0 : i32, i32, i32
  }
  func.func @transform_10(%arg0: i32) -> (i32, i32, i32) {
    %c0_i32 = arith.constant 0 : i32
    %c0_i32_0 = arith.constant 0 : i32
    %c0_i32_1 = arith.constant 0 : i32
    return %arg0, %c0_i32, %c0_i32_0 : i32, i32, i32
  }
  func.func @transform_11(%arg0: i32) -> (i32, i32, i32) {
    %c0_i32 = arith.constant 0 : i32
    %c0_i32_0 = arith.constant 0 : i32
    %c0_i32_1 = arith.constant 0 : i32
    return %arg0, %c0_i32, %c0_i32_0 : i32, i32, i32
  }
  func.func @transform_12(%arg0: i32) -> (i32, i32) {
    %c0_i32 = arith.constant 0 : i32
    %c0_i32_0 = arith.constant 0 : i32
    %c0_i32_1 = arith.constant 0 : i32
    return %c0_i32, %c0_i32_0 : i32, i32
  }
  func.func @transform_13(%arg0: i32) -> (i32, i32) {
    %c0_i32 = arith.constant 0 : i32
    %c0_i32_0 = arith.constant 0 : i32
    %c0_i32_1 = arith.constant 0 : i32
    return %c0_i32, %c0_i32_0 : i32, i32
  }
  func.func @transform_14(%arg0: i32) -> (i32, i32) {
    %c0_i32 = arith.constant 0 : i32
    %c0_i32_0 = arith.constant 0 : i32
    %c0_i32_1 = arith.constant 0 : i32
    return %c0_i32, %c0_i32_0 : i32, i32
  }
  func.func @transform_15(%arg0: i32) -> (i32, i32) {
    %c0_i32 = arith.constant 0 : i32
    %c0_i32_0 = arith.constant 0 : i32
    %c0_i32_1 = arith.constant 0 : i32
    return %c0_i32, %c0_i32_0 : i32, i32
  }
  func.func @transform_16(%arg0: i32) -> (i32, i32) {
    %c0_i32 = arith.constant 0 : i32
    %c0_i32_0 = arith.constant 0 : i32
    %c0_i32_1 = arith.constant 0 : i32
    return %c0_i32, %c0_i32_0 : i32, i32
  }
  func.func @transform_17(%arg0: i32) -> (i32, i32) {
    %c0_i32 = arith.constant 0 : i32
    %c0_i32_0 = arith.constant 0 : i32
    %c0_i32_1 = arith.constant 0 : i32
    return %c0_i32, %c0_i32_0 : i32, i32
  }
  func.func @transform_18(%arg0: i32) -> (i32, i32, i32) {
    %c0_i32 = arith.constant 0 : i32
    %c0_i32_0 = arith.constant 0 : i32
    %c0_i32_1 = arith.constant 0 : i32
    return %arg0, %c0_i32, %c0_i32_0 : i32, i32, i32
  }
}

</mosaic_0001>

<bundles_post_ra>
// kernel: tpu_custom_call.1
= control target key start
LH: loop header
LB: loop body
LE: loop exit
PB: predicated region body
PF: predicated region fallthrough
CT: control target
= control target key end

     0   :  { %s5318_s0 = inlined_call_operand.vmem [shape: f32[2,17,32], index: 0, kind: input, shape index: {}]   ;;  %s5319_s1 = inlined_call_operand.vmem [shape: bf16[2,32,32], index: 1, kind: input, shape index: {}]   ;;  %s5320_s2 = inlined_call_operand.vmem [shape: bf16[2,32,32], index: 2, kind: input, shape index: {}]   ;;  %s5321_s3 = inlined_call_operand.vmem [shape: bf16[2,32,32], index: 3, kind: input, shape index: {}]   ;;  %s5322_s4 = inlined_call_operand.vmem [shape: bf16[2,32,32], index: 4, kind: input, shape index: {}]   ;;  %s5323_s5 = inlined_call_operand.vmem [shape: bf16[2,32,64], index: 5, kind: input, shape index: {}]   ;;  %s5324_s6 = inlined_call_operand.vmem [shape: bf16[2,32,32], index: 6, kind: input, shape index: {}]   ;;  %s5325_s7 = inlined_call_operand.vmem [shape: bf16[2,32,32], index: 7, kind: input, shape index: {}]   ;;  %s5326_s8 = inlined_call_operand.hbm [shape: bf16[2,32,32], index: 8, kind: input, shape index: {}]   ;;  %s5327_s9 = inlined_call_operand.vmem [shape: bf16[2,32,128], index: 9, kind: input, shape index: {}]   ;;  %s5328_s10 = inlined_call_operand.hbm [shape: f32[2,1,128], index: 10, kind: input, shape index: {}]   ;;  %s5329_s11 = inlined_call_operand.vmem [shape: bf16[2,128,32], index: 11, kind: input, shape index: {}]   ;;  %s5330_s12 = inlined_call_operand.hbm [shape: f32[16,32], index: 12, kind: input, shape index: {}]   ;;  %s5331_s13 = inlined_call_operand.vmem [shape: bf16[64,32], index: 13, kind: input, shape index: {}]   ;;  %s5332_s14 = inlined_call_operand.hbm [shape: bf16[32,64], index: 14, kind: input, shape index: {}]   ;;  %s5333_s15 = inlined_call_operand.hbm [shape: f32[16,64], index: 15, kind: input, shape index: {}]   ;;  %s5334_s16 = inlined_call_operand.hbm [shape: f32[16,32], index: 16, kind: input, shape index: {}]   ;;  %s5335_s17 = inlined_call_operand.vmem [shape: f32[8,8], index: 17, kind: input, shape index: {}]   ;;  %s5336_s18 = inlined_call_operand.hbm [shape: f32[2,16,32], index: 18, kind: output, shape index: {}]  }
   0x1   :  { %5355 = sst [smem:[#allocation27_spill]] %s5318_s0 }
   0x2   :  { %5356 = sst [smem:[#allocation28_spill]] %s5319_s1 }
   0x3   :  { %5357 = sst [smem:[#allocation29_spill]] %s5320_s2 }
   0x4   :  { %5358 = sst [smem:[#allocation30_spill]] %s5321_s3 }
   0x5   :  { %5359 = sst [smem:[#allocation31_spill]] %s5322_s4 }
   0x6   :  { %5360 = sst [smem:[#allocation32_spill]] %s5323_s5 }
   0x7   :  { %5361 = sst [smem:[#allocation33_spill]] %s5325_s7 }
   0x8   :  { %5362 = sst [smem:[#allocation34_spill]] %s5326_s8 }
   0x9   :  { %5363 = sst [smem:[#allocation35_spill]] %s5327_s9 }
   0xa   :  { %5364 = sst [smem:[#allocation36_spill]] %s5328_s10 }
   0xb   :  { %5365 = sst [smem:[#allocation37_spill]] %s5329_s11 }
   0xc   :  { %5366 = sst [smem:[#allocation38_spill]] %s5330_s12 }
   0xd   :  { %5367 = sst [smem:[#allocation39_spill]] %s5331_s13 }
   0xe   :  { %5368 = sst [smem:[#allocation40_spill]] %s5332_s14 }
   0xf   :  { %5369 = sst [smem:[#allocation41_spill]] %s5333_s15 }
  0x10   :  { %5370 = sst [smem:[#allocation42_spill]] %s5334_s16 }
  0x11   :  { %5371 = sst [smem:[#allocation43_spill]] %s5335_s17 }
  0x12   :  { %5372 = sst [smem:[#allocation44_spill]] %s5336_s18 }
  0x13   :  { %23 = vsyncpa [#allocation4], 0 }
  0x14   :  { %25 = vsyncpa [#allocation4 + $0x1], 0 }
  0x15   :  { %26 = vsyncpa [#allocation7], 0 }
  0x16   :  { %28 = vsyncpa [#allocation7 + $0x1], 0 }
  0x17   :  { %29 = vsyncpa [#allocation10], 0 }
  0x18   :  { %30 = vsyncpa [#allocation13], 0 }
  0x19   :  { %31 = vsyncpa [#allocation5], 0 }
  0x1a   :  { %33 = vsyncpa [#allocation5 + $0x1], 0  ;;  %s4460_s27 = smov 0   ;;  %s4462_s28 = smov 0  }
  0x1b   :  { %s4464_s29 = smov 0   ;;  %s4466_s30 = smov 0  }
  0x1c LB: > { %5373 = sst [smem:[#allocation21_spill]] %s4328_s27  ;;  %s4481_s0 = sadd.s32 4294967295, %s4340_s30   ;;  %s4340_s30 = sphi %s4466_s30, %s5426_s30   ;;  %s4336_s29 = sphi %s4464_s29, %s5429_s29   ;;  %s4332_s28 = sphi %s4462_s28, %s5428_s28   ;;  %s4328_s27 = sphi %s4460_s27, %s5427_s27  }
  0x1d   : > { %5374 = sst [smem:[#allocation22_spill]] %s4332_s28  ;;  %s3417_s19 = sadd.s32 4294967294, %s4340_s30  }
  0x1e   : > { %5375 = sst [smem:[#allocation23_spill]] %s4336_s29  ;;  %p267_p0 = scmp.ne.s32.totalorder %s4332_s28, %s4328_s27 }
  0x1f   : > { %p5340_p1 = scmp.eq.s32.totalorder %s4481_s0, 0  ;;  %p501_p3 = scmp.eq.s32.totalorder %s3417_s19, 1 }
  0x20   : > { %p3418_p5 = scmp.ge.s32.totalorder %s4340_s30, 1  ;;  %p508_p7 = scmp.lt.s32.totalorder %s4340_s30, 3 }
  0x21   : > { %p4490_p4 = por %p5340_p1, %p267_p0  ;;  %p4495_p6 = por %p501_p3, %p267_p0 }
  0x22   : > { %p4501_p9 = pnand %p3418_p5, %p508_p7  ;;  %s4342_s22 = smov [#allocation8]  }
  0x23   : > { %s5376_s1 = scalar_select %p4490_p4, 1, 0 }
  0x24   : > { %s5377_s20 = scalar_select %p4495_p6, 1, 0 }
  0x25   : > { %s5379_s21 = scalar_select %p4501_p9, 1, 0 }
  0x26   : > { %5378 = sst [smem:[#allocation24_spill]] %s5377_s20  ;;  %s520_s2 = sshll.u32 %s4342_s22, 4  ;;  %s4505_s2 = int_to_ptr.vmem [resolvable:$true] %s520_s2 }
  0x27   : > { %p3901_p10 = pneg %p4501_p9  ;;  %s4343_s24 = smov [#allocation9]  }
  0x28   : > { %s536_s25 = sshll.u32 %s4343_s24, 4  ;;  %s5381_s12 = sld [smem:[#allocation38_spill]]  ;;  %s4516_s25 = int_to_ptr.vmem [resolvable:$true] %s536_s25 }
  0x29   : > { %p4512_p12 = pnand %p3901_p10, %p5340_p1 }
  0x2b   : > { %p4526_p0 = pneg %p4512_p12 }
  0x2e   : > { %s4086_s20 = scalar_lea.hbm %s5381_s12, 256 }
  0x2f   : > { %p4087_p13 = scmp.ne.s32.totalorder %s5381_s12, %s4086_s20  ;;  %p4093_p7 = scmp.lt.u32.totalorder %s4086_s20, %s5381_s12 }
  0x31   : > { %p4089_p3 = pnand %p4526_p0, %p4087_p13 }
  0x33   : > { %p4090_p5 = pneg %p4089_p3 }
  0x35   : > { %p4095_p10 = pnand %p4093_p7, %p4090_p5 }
  0x37   : > { %4098 = shalt.err (!%p4095_p10)
}
  0x38   : > { %s4099_s27 = scalar_lea.vmem %s4505_s2, 256  ;;  %p4107_p2 = scmp.lt.s32.totalorder %s4505_s2, %s4505_s2 }
  0x39   : > { %p4100_p11 = scmp.ne.s32.totalorder %s4505_s2, %s4099_s27  ;;  %p4108_p6 = scmp.lt.s32.totalorder %s4099_s27, %s4099_s27 }
  0x3b   : > { %p4102_p8 = pnand %p4100_p11, %p4526_p0  ;;  %p4109_p13 = por %p4108_p6, %p4107_p2 }
  0x3d   : > { %p4103_p1 = pneg %p4102_p8 }
  0x3f   : > { %p4110_p3 = pnand %p4109_p13, %p4103_p1 }
  0x41   : > { %4113 = shalt.err (!%p4110_p3)
}
  0x42   : > { %s5342_s26 = smov 128   ;;  %s5344_s17 = smov 8  }
  0x43   : > { %3904 = dma.hbm_to_vmem [thread:$0]  (!%p4512_p12), %s5381_s12, 256, %s4505_s2, [#allocation7], %s5342_s26, %s5342_s26, %s5344_s17  }
  0x44   : > { %s5383_s14 = sld [smem:[#allocation40_spill]] }
  0x4a   : > { %s4114_s27 = scalar_lea.hbm %s5383_s14, 256 }
  0x4b   : > { %p4115_p1 = scmp.ne.s32.totalorder %s5383_s14, %s4114_s27  ;;  %p4121_p8 = scmp.lt.u32.totalorder %s4114_s27, %s5383_s14 }
  0x4d   : > { %p4117_p2 = pnand %p4115_p1, %p4526_p0 }
  0x4f   : > { %p4118_p6 = pneg %p4117_p2 }
  0x51   : > { %p4123_p11 = pnand %p4121_p8, %p4118_p6 }
  0x53   : > { %4126 = shalt.err (!%p4123_p11)
}
  0x54   : > { %s4127_s2 = scalar_lea.vmem %s4516_s25, 256  ;;  %p4135_p13 = scmp.lt.s32.totalorder %s4516_s25, %s4516_s25 }
  0x55   : > { %p4128_p5 = scmp.ne.s32.totalorder %s4516_s25, %s4127_s2  ;;  %p4136_p3 = scmp.lt.s32.totalorder %s4127_s2, %s4127_s2 }
  0x57   : > { %p4130_p7 = pnand %p4128_p5, %p4526_p0  ;;  %p4137_p1 = por %p4136_p3, %p4135_p13 }
  0x59   : > { %p4131_p10 = pneg %p4130_p7 }
  0x5b   : > { %p4138_p2 = pnand %p4137_p1, %p4131_p10 }
  0x5d   : > { %4141 = shalt.err (!%p4138_p2)
}
  0x5e   : > { %s5348_s11 = smov 64   ;;  %s4347_s7 = smov 4  }
  0x5f   : > { %3907 = dma.hbm_to_vmem [thread:$0]  (!%p4512_p12), %s5383_s14, 256, %s4516_s25, [#allocation10], %s5348_s11, %s5348_s11, %s4347_s7  }
  0x60   : > { %s4348_s20 = smov [#allocation11]   ;;  %s4349_s22 = smov [#allocation12]  }
  0x61   : > { %s549_s19 = sshll.u32 %s4348_s20, 4  ;;  %s562_s24 = sshll.u32 %s4349_s22, 4  ;;  %s550_s19 = int_to_ptr.vmem [resolvable:$true] %s549_s19  ;;  %s4576_s24 = int_to_ptr.vmem [resolvable:$true] %s562_s24 }
  0x62   : > { %s5384_s15 = sld [smem:[#allocation41_spill]] }
  0x68   : > { %s4142_s26 = scalar_lea.hbm %s5384_s15, 256 }
  0x69   : > { %p4143_p6 = scmp.ne.s32.totalorder %s5384_s15, %s4142_s26  ;;  %p4149_p5 = scmp.lt.u32.totalorder %s4142_s26, %s5384_s15 }
  0x6b   : > { %p4145_p8 = pnand %p4143_p6, %p4526_p0 }
  0x6d   : > { %p4146_p11 = pneg %p4145_p8 }
  0x6f   : > { %p4151_p7 = pnand %p4149_p5, %p4146_p11 }
  0x71   : > { %4154 = shalt.err (!%p4151_p7)
}
  0x72   : > { %s4155_s13 = scalar_lea.vmem %s550_s19, 256  ;;  %p4163_p1 = scmp.lt.s32.totalorder %s550_s19, %s550_s19 }
  0x73   : > { %p4156_p10 = scmp.ne.s32.totalorder %s550_s19, %s4155_s13  ;;  %p4164_p2 = scmp.lt.s32.totalorder %s4155_s13, %s4155_s13 }
  0x75   : > { %p4158_p13 = pnand %p4156_p10, %p4526_p0  ;;  %p4165_p4 = por %p4164_p2, %p4163_p1 }
  0x77   : > { %p4159_p3 = pneg %p4158_p13 }
  0x79   : > { %p4166_p9 = pnand %p4165_p4, %p4159_p3 }
  0x7b   : > { %4169 = shalt.err (!%p4166_p9)
}
  0x7c   : > { %s5385_s12 = smov 8   ;;  %s5386_s17 = smov 128  }
  0x7d   : > { %3910 = dma.hbm_to_vmem [thread:$0]  (!%p4512_p12), %s5384_s15, 256, %s550_s19, [#allocation10], %s5386_s17, %s5386_s17, %s5385_s12  }
  0x7e   : > { %s5387_s16 = sld [smem:[#allocation42_spill]] }
  0x84   : > { %s4170_s2 = scalar_lea.hbm %s5387_s16, 256 }
  0x85   : > { %p4171_p6 = scmp.ne.s32.totalorder %s5387_s16, %s4170_s2  ;;  %p4177_p8 = scmp.lt.u32.totalorder %s4170_s2, %s5387_s16 }
  0x87   : > { %p4173_p4 = pnand %p4171_p6, %p4526_p0 }
  0x89   : > { %p4174_p9 = pneg %p4173_p4 }
  0x8b   : > { %p4179_p11 = pnand %p4177_p8, %p4174_p9 }
  0x8d   : > { %4182 = shalt.err (!%p4179_p11)
}
  0x8e   : > { %s4183_s19 = scalar_lea.vmem %s4576_s24, 256  ;;  %p4191_p13 = scmp.lt.s32.totalorder %s4576_s24, %s4576_s24 }
  0x8f   : > { %p4184_p5 = scmp.ne.s32.totalorder %s4576_s24, %s4183_s19  ;;  %p4192_p3 = scmp.lt.s32.totalorder %s4183_s19, %s4183_s19 }
  0x91   : > { %p4186_p7 = pnand %p4184_p5, %p4526_p0  ;;  %p4193_p1 = por %p4192_p3, %p4191_p13 }
  0x93   : > { %p4187_p10 = pneg %p4186_p7 }
  0x95   : > { %p4194_p2 = pnand %p4193_p1, %p4187_p10 }
  0x97   : > { %4197 = shalt.err (!%p4194_p2)
}
  0x98   : > { %3913 = dma.hbm_to_vmem [thread:$0]  (!%p4512_p12), %s5387_s16, 256, %s4576_s24, [#allocation13], %s5386_s17, %s5386_s17, %s5385_s12  }
  0x99   : > { %s4626_s18 = sadd.s32 1, %s4340_s30   ;;  %s254_s26 = sadd.s32 1, %s4336_s29 }
  0x9a   : > { %5388 = sst [smem:[#allocation25_spill]] %s4626_s18  ;;  %s251_s23 = ssub.s32 %s4340_s30, %s4626_s18 }
  0x9b   : > { %p252_p0 = scmp.eq.s32.totalorder %s251_s23, 0  ;;  %p261_p6 = scmp.ne.s32.totalorder %s4336_s29, %s4332_s28 }
  0x9c   : > { %p262_p4 = scmp.eq.s32.totalorder %s4340_s30, 0  ;;  %p5390_p8 = scmp.eq.s32.totalorder %s4481_s0, 1 }
  0x9d   : > { %s4635_s22 = scalar_select %p252_p0, %s4336_s29, %s254_s26  }
  0x9e   : > { %p263_p9 = por %p262_p4, %p261_p6  ;;  %p4639_p11 = por %p5390_p8, %p261_p6 }
  0x9f   : > { %5389 = sst [smem:[#allocation26_spill]] %s4635_s22  ;;  %p3929_p5 = scmp.lt.s32.totalorder %s4340_s30, 2 }
  0xa0   : > { %s5391_s27 = scalar_select %p4639_p11, 1, 0 }
  0xa1   : > { %s4645_s2 = sand.u32 1, %s4336_s29   ;;  %s3525_s12 = sshll.u32 %s4340_s30, 8 }
  0xa2   : > { %s3424_s24 = sshll.u32 %s4645_s2, 4  ;;  %s5392_s8 = sld [smem:[#allocation34_spill]] }
  0xa3   : > { %s647_s13 = scalar_lea.vmem [#allocation3], %s3424_s24  ;;  %p4656_p12 = pnand %p3929_p5, %p263_p9 }
  0xa4   : > { %s654_s19 = sshll.u32 %s647_s13, 4  ;;  %s644_s23 = scalar_lea.sflag [#allocation4], %s4645_s2  ;;  %s4654_s19 = int_to_ptr.vmem [resolvable:$true] %s654_s19 }
  0xa5   : > { %p4200_p10 = pneg %p4656_p12 }
  0xa8   : > { %s4652_s25 = scalar_lea.hbm %s5392_s8, %s3525_s12  ;;  %s4203_s17 = scalar_lea.hbm %s5392_s8, 512 }
  0xa9   : > { %s4198_s26 = scalar_lea.hbm %s4652_s25, 256  ;;  %p4204_p1 = scmp.lt.u32.totalorder %s4652_s25, %s5392_s8 }
  0xaa   : > { %p4199_p7 = scmp.ne.s32.totalorder %s4652_s25, %s4198_s26  ;;  %p4205_p2 = scmp.lt.u32.totalorder %s4203_s17, %s4198_s26 }
  0xab   : > { %p4207_p6 = scmp.lt.u32.totalorder %s4198_s26, %s4652_s25 }
  0xac   : > { %p4201_p13 = pnand %p4200_p10, %p4199_p7  ;;  %p4206_p0 = por %p4205_p2, %p4204_p1 }
  0xae   : > { %p4202_p3 = pneg %p4201_p13  ;;  %p4208_p4 = por %p4207_p6, %p4206_p0 }
  0xb0   : > { %p4209_p9 = pnand %p4208_p4, %p4202_p3 }
  0xb2   : > { %4212 = shalt.err (!%p4209_p9)
}
  0xb3   : > { %s4213_s20 = scalar_lea.vmem %s4654_s19, 256  ;;  %s4350_s24 = smov [#allocation3]  }
  0xb4   : > { %p4214_p8 = scmp.ne.s32.totalorder %s4654_s19, %s4213_s20  ;;  %s4218_s12 = sshll.u32 %s4350_s24, 4  ;;  %s4219_s12 = int_to_ptr.vmem [resolvable:$false] %s4218_s12 }
  0xb5   : > { %s4220_s9 = scalar_lea.vmem %s4219_s12, 512  ;;  %p4221_p13 = scmp.lt.s32.totalorder %s4654_s19, %s4219_s12 }
  0xb6   : > { %p4216_p5 = pnand %p4214_p8, %p4200_p10  ;;  %p4222_p1 = scmp.lt.s32.totalorder %s4220_s9, %s4213_s20 }
  0xb8   : > { %p4217_p7 = pneg %p4216_p5  ;;  %p4223_p2 = por %p4222_p1, %p4221_p13 }
  0xba   : > { %p4224_p0 = pnand %p4223_p2, %p4217_p7 }
  0xbc   : > { %4227 = shalt.err (!%p4224_p0)
}
  0xbd   : > { %s5394_s26 = smov 64   ;;  %s3427_s17 = sshll.u32 %s4340_s30, 4 }
  0xbe   : > { %3917 = dma.hbm_to_vmem [thread:$0]  (!%p4656_p12), %s4652_s25, 256, %s4654_s19, %s644_s23, %s5394_s26, %s5394_s26, %s4347_s7  }
  0xbf   : > { %s675_s13 = scalar_lea.vmem [#allocation6], %s4645_s2  ;;  %s5395_s10 = sld [smem:[#allocation36_spill]] }
  0xc0   : > { %s682_s20 = sshll.u32 %s675_s13, 4  ;;  %s5396_s8 = sand.u32 1, %s4340_s30   ;;  %s683_s20 = int_to_ptr.vmem [resolvable:$true] %s682_s20 }
  0xc1   : > { %s673_s14 = scalar_lea.sflag [#allocation7], %s5396_s8 }
  0xc5   : > { %s4697_s9 = scalar_lea.hbm %s5395_s10, %s3427_s17  ;;  %s4233_s25 = scalar_lea.hbm %s5395_s10, 32 }
  0xc6   : > { %s4228_s15 = scalar_lea.hbm %s4697_s9, 16  ;;  %p4234_p9 = scmp.lt.u32.totalorder %s4697_s9, %s5395_s10 }
  0xc7   : > { %p4229_p3 = scmp.ne.s32.totalorder %s4697_s9, %s4228_s15  ;;  %p4235_p8 = scmp.lt.u32.totalorder %s4233_s25, %s4228_s15 }
  0xc8   : > { %p4237_p7 = scmp.lt.u32.totalorder %s4228_s15, %s4697_s9 }
  0xc9   : > { %p4231_p6 = pnand %p4229_p3, %p4200_p10  ;;  %p4236_p5 = por %p4235_p8, %p4234_p9 }
  0xcb   : > { %p4232_p4 = pneg %p4231_p6  ;;  %p4238_p13 = por %p4237_p7, %p4236_p5 }
  0xcd   : > { %p4239_p1 = pnand %p4238_p13, %p4232_p4 }
  0xcf   : > { %4242 = shalt.err (!%p4239_p1)
}
  0xd0   : > { %s4243_s8 = scalar_lea.vmem %s683_s20, 16  ;;  %s4351_s26 = smov [#allocation6]  }
  0xd1   : > { %p4244_p2 = scmp.ne.s32.totalorder %s683_s20, %s4243_s8  ;;  %s4248_s17 = sshll.u32 %s4351_s26, 4  ;;  %s4249_s17 = int_to_ptr.vmem [resolvable:$false] %s4248_s17 }
  0xd2   : > { %s4250_s13 = scalar_lea.vmem %s4249_s17, 32  ;;  %p4251_p6 = scmp.lt.s32.totalorder %s683_s20, %s4249_s17 }
  0xd3   : > { %p4246_p0 = pnand %p4244_p2, %p4200_p10  ;;  %p4252_p11 = scmp.lt.s32.totalorder %s4250_s13, %s4243_s8 }
  0xd5   : > { %p4247_p3 = pneg %p4246_p0  ;;  %p4253_p8 = por %p4252_p11, %p4251_p6 }
  0xd7   : > { %p4254_p9 = pnand %p4253_p8, %p4247_p3 }
  0xd9   : > { %4257 = shalt.err (!%p4254_p9)
}
  0xda   : > { %3920 = dma.hbm_to_vmem [thread:$0]  (!%p4656_p12), %s4697_s9, 16, %s683_s20, %s673_s14  }
  0xdb   : > { %p5397_p4 = scmp.ne.s32.totalorder %s5379_s21, 0 }
  0xdc   : > { %s4723_s15 = sand.u32 (!%p5397_p4), 1, %s4332_s28   ;;  %p5398_p11 = scmp.ne.s32.totalorder (!%p5397_p4), %s5376_s1, 0 }
  0xdd   : > { %699 = sbr.rel (%p5397_p4) target bundleno = 5473 (0x1561), region = 92  ;;  %s5350_s24 = sshll.u32 (!%p5397_p4), %s4723_s15, 4 }
  0xde   : > { %s702_s12 = scalar_lea.sflag (!%p5397_p4), [#allocation4], %s4723_s15  ;;  %s4729_s7 = scalar_lea.vmem (!%p5397_p4), [#allocation3], %s5350_s24 }
  0xe4   : > { %4303 = dma.done.wait (%p5398_p11), %s702_s12, 256  }
  0xe5   : > { %4305 = vsyncadd (%p5398_p11), %s702_s12, 4294967040  ;;  %s710_s14 = sand.u32 1, %s4481_s0  }
  0xe6   : > { %s711_s21 = scalar_lea.sflag [#allocation7], %s710_s14 }
  0xe7   : > { %4307 = dma.done.wait (%p5398_p11), %s711_s21, 16  }
  0xe8   : > { %4309 = vsyncadd (%p5398_p11), %s711_s21, 4294967280  ;;  %p5399_p12 = scmp.eq.s32.totalorder %s4481_s0, 0 }
  0xea   : > { %4311 = dma.done.wait (%p5399_p12), [#allocation7], 256   ;;  %p5400_p10 = pmov %p5399_p12 }
  0xec   : > { %4313 = vsyncadd (%p5400_p10), [#allocation7], 4294967040  ;;  %p5401_p5 = pmov %p5400_p10 }
  0xee   : > { %4315 = dma.done.wait (%p5401_p5), [#allocation10], 512   ;;  %p5402_p7 = pmov %p5401_p5 }
  0xef   : > { %p5403_p13 = pmov %p5401_p5 }
  0xf0   : > { %4317 = vsyncadd (%p5402_p7), [#allocation10], 4294966784 }
  0xf1   : > { %4319 = dma.done.wait (%p5403_p13), [#allocation13], 256   ;;  %p5404_p1 = pmov %p5401_p5 }
  0xf2   : > { %p836_p2 = scmp.lt.s32.totalorder %s4481_s0, 1  ;;  %s5405_s19 = sld [smem:[#allocation28_spill]] }
  0xf3   : > { %4321 = vsyncadd (%p5404_p1), [#allocation13], 4294967040  ;;  %s5406_s17 = sld [smem:[#allocation29_spill]]  ;;  %s5407_s21 = sld [smem:[#allocation27_spill]] }
  0xf4   : > { %s837_s1 = scalar_select %p836_p2, %s4481_s0, 1 }
  0xf5   : > { %s5408_s3 = sld [smem:[#allocation30_spill]]  ;;  %s5409_s4 = sld [smem:[#allocation31_spill]] }
  0xf6   : > { %s3878_s20 = smul.u32 24, %s837_s1  ;;  %s3526_s9 = sshll.u32 %s837_s1, 4 }
  0xf7   : > { %s5410_s5 = sld [smem:[#allocation32_spill]]  ;;  %s5411_s10 = sld [smem:[#allocation33_spill]] }
  0xf8   : > { %s4758_s23 = scalar_lea.vmem %s5405_s19, %s3526_s9  ;;  %s5412_s29 = sld [smem:[#allocation35_spill]] }
  0xf9   : > { %s4763_s13 = scalar_lea.vmem %s5406_s17, %s3526_s9  ;;  %s4768_s11 = scalar_lea.vmem %s5407_s21, %s3878_s20 }
  0xfa   : > { %s4788_s20 = scalar_lea.vmem %s5324_s6, %s3526_s9  ;;  %s5413_s19 = sld [smem:[#allocation37_spill]] }
  0xfb   : > { %s4773_s16 = scalar_lea.vmem %s5408_s3, %s3526_s9  ;;  %s4778_s2 = scalar_lea.vmem %s5409_s4, %s3526_s9 }
  0xfc   : > { %s3534_s4 = sshll.u32 %s837_s1, 6  ;;  %s5414_s18 = sshll.u32 %s4723_s15, 4 }
  0xfd   : > { %s4783_s8 = scalar_lea.vmem %s5410_s5, %s3526_s9  ;;  %s4793_s24 = scalar_lea.vmem %s5411_s10, %s3526_s9 }
  0xfe   : > { %s4798_s22 = scalar_lea.vmem %s5412_s29, %s3526_s9  ;;  %s4807_s26 = scalar_lea.vmem [#allocation14], %s5414_s18 }
  0xff   : > { %p5415_p0 = scmp.ne.s32.totalorder %s4481_s0, 0 }
 0x100   : > { %s4803_s5 = scalar_lea.vmem %s5413_s19, %s3534_s4  ;;  %v891_v0 = vld [vmem:[#allocation8] sm:$0xff] (!%p5415_p0)  ;;  %vm893_vm0 = vcmask (!%p5415_p0), 261120   ;;  %v892_v1 = vld [vmem:[#allocation8 + $0x8] sm:$0xff] (!%p5415_p0) }
 0x101   : > { %890 = sbr.rel (%p5415_p0) target bundleno = 264 (0x108), region = 120  ;;  %894 = vst.msk [vmem:[#allocation2] sm:$0xff] (!%p5415_p0), %vm893_vm0, %v891_v0  ;;  %895 = vst.msk [vmem:[#allocation2 + $0x8] sm:$0xff] (!%p5415_p0), %vm893_vm0, %v892_v1 }
 0x108 PF: > { %v4811_v2 = vld [vmem:[#allocation2] sm:$0xff]  ;;  %vm906_vm1 = vcmask 261120   ;;  %v900_v3 = vld [vmem:[#allocation2 + $0x8] sm:$0xff]  ;;  %v4352_v17 = vmov 0.0   ;;  %vm4353_vm2 = vmmov 0   ;;  %v934_v24 = vlaneseq  ;;  %s5416_s28 = sld [smem:[#allocation39_spill]] }
 0x109   : > { %v907_v4 = vsel %vm906_vm1, %v4811_v2, 0.0  ;;  %v910_v5 = vsel %vm906_vm1, %v900_v3, 0.0  ;;  %v3987_v16 = vld [vmem:[%s4758_s23] sm:$0xff]   ;;  %3630 = vmatprep.subr.bf16.mxu0 %v4352_v17  ;;  %3658 = vmatprep.subr.bf16.mxu1 %v4352_v17  ;;  %v3988_v18 = vld [vmem:[%s4758_s23 + $0x8] sm:$0xff]   ;;  %s4354_s12 = smov 120   ;;  %vm1236_vm3 = vcmask 1043456  }
 0x10a   : > { %908 = vadd.xlane.f32.xlu0 %v907_v4  ;;  %3631 = vmatpush3.bf16.msra.mxu0 %v3987_v16  ;;  %v3989_v19 = vld [vmem:[#allocation9] sm:$0xff]   ;;  %v4828_v27 = vshrl.u32 %v934_v24, 7  ;;  %v3990_v43 = vld [vmem:[#allocation9 + $0x8] sm:$0xff]   ;;  %vm1232_vm4 = vcmask 64512   ;;  %vm1281_vm5 = vcmask 523264   ;;  %s4355_s14 = smov 112  }
 0x10b   : > { %3634 = vmatprep.mubr.msk.bf16.mxu0 %vm4353_vm2, %v4352_v17  ;;  %3632 = vmatprep.subr.bf16.mxu0 %v4352_v17  ;;  %v4832_v29 = vld [vmem:[%s4768_s11] sm:$0xff]  ;;  %v3992_v45 = vld [vmem:[%s4763_s13 + $0x8] sm:$0xff]   ;;  %s4356_s10 = smov 104   ;;  %s5418_s29 = sld [smem:[#allocation43_spill]] }
 0x10c   : > { %3660 = vmatprep.mubr.msk.bf16.mxu1 %vm4353_vm2, %v4352_v17  ;;  %v936_v28 = vsub.s32 0, %v4828_v27  ;;  %v942_v33 = vsub.s32 1, %v4828_v27  ;;  %v3991_v41 = vld [vmem:[%s4763_s13] sm:$0xff]   ;;  %v3994_v47 = vld [vmem:[%s4773_s16 + $0x8] sm:$0xff]   ;;  %v1110_v62 = vsub.s32 2, %v4828_v27  ;;  %s4359_s25 = smov 80  }
 0x10d   : > { %v3993_v44 = vld [vmem:[%s4773_s16] sm:$0xff]   ;;  %v4866_v51 = vld [vmem:[%s4768_s11 + $0x8] sm:$0xff]  ;;  %s4360_s19 = smov 72   ;;  %s5420_s3 = sld [smem:[#allocation44_spill]] }
 0x10e   : > { %911 = vadd.xlane.f32.xlu0 %v910_v5  ;;  %3633 = vmatpush3.bf16.msra.mxu0 %v3988_v18  ;;  %v937_v32 = vrot.slane %v4832_v29, %v936_v28  ;;  %v943_v37 = vrot.slane %v4832_v29, %v942_v33  ;;  %s5417_s18 = smov %s5416_s28  ;;  %v3995_v46 = vld [vmem:[%s5416_s28] sm:$0xff]   ;;  %v954_v52 = vrot.slane %v4866_v51, %v942_v33  ;;  %v4912_v33 = vld [vmem:[#allocation11] sm:$0xff]  ;;  %p5421_p6 = scmp.ne.s32.totalorder %s5391_s27, 0 }
 0x10f   : > { %3638 = vmatprep.subr.bf16.mxu0 %v3989_v19  ;;  %v3996_v48 = vld [vmem:[%s5417_s18 + $0x8] sm:$0xff]   ;;  %v3997_v49 = vld [vmem:[%s5417_s18 + $0x10] sm:$0xff]   ;;  %v3998_v50 = vld [vmem:[%s5417_s18 + $0x18] sm:$0xff]   ;;  %v1111_v4 = vrot.slane %v4866_v51, %v1110_v62  ;;  %s4362_s1 = smov [#allocation14]  }
 0x110   : > { %s4262_s9 = sshll.u32 %s4362_s1, 4  ;;  %s4263_s9 = int_to_ptr.vmem [resolvable:$false] %s4262_s9 }
 0x111   : > { %s4264_s23 = scalar_lea.vmem %s4263_s9, 512 }
 0x197   : > { %v909_v6 = vpop.xlane.xlu0 %908 }
 0x198   : > { %v914_v7 = vmul.f32 0.03125, %v909_v6 }
 0x19a   : > { %v916_v8 = vsub.f32 %v4811_v2, %v914_v7 }
 0x19b   : > { %v912_v9 = vpop.xlane.xlu0 %911 }
 0x19c   : > { %v915_v10 = vmul.f32 0.03125, %v912_v9  ;;  %v918_v11 = vmul.f32 %v916_v8, %v916_v8 }
 0x19e   : > { %v917_v12 = vsub.f32 %v900_v3, %v915_v10  ;;  %v920_v13 = vsel %vm906_vm1, %v918_v11, 0.0 }
 0x19f   : > { %921 = vadd.xlane.f32.xlu1 %v920_v13 }
 0x1a0   : > { %v919_v14 = vmul.f32 %v917_v12, %v917_v12 }
 0x1a2   : > { %v923_v15 = vsel %vm906_vm1, %v919_v14, 0.0 }
 0x1a3   : > { %924 = vadd.xlane.f32.xlu1 %v923_v15 }
 0x22c   : > { %v922_v20 = vpop.xlane.xlu1 %921 }
 0x22d   : > { %v926_v21 = vmul.f32 0.03125, %v922_v20 }
 0x22f   : > { %v928_v22 = vadd.f32 1e-05, %v926_v21 }
 0x230   : > { %v925_v23 = vpop.xlane.xlu1 %924 }
 0x231   : > { %4015 = vrsqrt.f32 %v928_v22  ;;  %v927_v25 = vmul.f32 0.03125, %v925_v23 }
 0x233   : > { %v929_v26 = vadd.f32 1e-05, %v927_v25 }
 0x235   : > { %4017 = vrsqrt.f32 %v929_v26 }
 0x23b   : > { %v4016_v30 = vpop.eup %4015 }
 0x23c   : > { %v932_v31 = vmul.f32 %v4016_v30, %v916_v8 }
 0x23e   : > { %v938_v36 = vmul.f32 %v937_v32, %v932_v31 }
 0x23f   : > { %v4018_v34 = vpop.eup %4017 }
 0x240   : > { %v933_v35 = vmul.f32 %v4018_v34, %v917_v12  ;;  %v944_v39 = vadd.f32 %v943_v37, %v938_v36 }
 0x242   : > { %v939_v38 = vmul.f32 %v937_v32, %v933_v35 }
 0x244   : > { %v945_v40 = vadd.f32 %v943_v37, %v939_v38 }
 0x246   : > { %v946_v42 = vpack.c.bf16 %v945_v40, %v944_v39 }
 0x248   : > { %3635 = vmatmul.mubr.msk.bf16.vlgmr.msra.gmra.mrb[0].mxu0 %vm906_vm1, %v946_v42 }
 0x249   : > { %3639 = vmatpush3.bf16.msra.mxu0 %v3989_v19  ;;  %3642 = vmatprep.mubr.msk.bf16.mxu0 %vm906_vm1, %v3991_v41 }
 0x24a   : > { %3640 = vmatprep.subr.bf16.mxu0 %v3990_v43 }
 0x24d   : > { %3641 = vmatpush3.bf16.msra.mxu0 %v3990_v43 }
 0x24e   : > { %3646 = vmatprep.subr.bf16.mxu0 %v3993_v44 }
 0x250   : > { %3643 = vmatmul.mubr.msk.bf16.vlgmr.msra.gmra.mrb[4].mxu0 %vm906_vm1, %v3992_v45  ;;  %v4919_v45 = vld [vmem:[#allocation11 + $0x8] sm:$0xff] }
 0x251   : > { %3647 = vmatpush3.bf16.msra.mxu0 %v3993_v44  ;;  %3650 = vmatprep.mubr.msk.bf16.mxu0 %vm906_vm1, %v3995_v46 }
 0x252   : > { %3648 = vmatprep.subr.bf16.mxu0 %v3994_v47 }
 0x255   : > { %3649 = vmatpush3.bf16.msra.mxu0 %v3994_v47 }
 0x256   : > { %3664 = vmatprep.subr.bf16.mxu0 %v4352_v17 }
 0x258   : > { %3651 = vmatmul.mubr.msk.bf16.vlgmr.msra.gmra.mrb[8].mxu0 %vm906_vm1, %v3996_v48 }
 0x259   : > { %3654 = vmatprep.mubr.msk.bf16.mxu0 %vm906_vm1, %v3997_v49 }
 0x260   : > { %3655 = vmatmul.mubr.msk.bf16.gmra.mrb[12].mxu0 %vm906_vm1, %v3998_v50 }
 0x261   : > { %3672 = vmatprep.mubr.msk.bf16.mxu0 %vm4353_vm2, %v4352_v17 }
 0x31b   : > { %v1004_v53 = vpop.f32.mrb[0].mxu0 }
 0x31c   : > { %v1005_v54 = vadd.f32 %v1004_v53, %v954_v52  ;;  %v3636_v55 = vpop.f32.mrb[1].mxu0 }
 0x31d   : > { %v1007_v56 = vpop.f32.mrb[2].mxu0 }
 0x31e   : > { %v1008_v57 = vadd.f32 %v1007_v56, %v954_v52  ;;  %v3637_v58 = vpop.f32.mrb[3].mxu0 }
 0x320   : > { %v4869_v59 = vpack.c.bf16 %v1008_v57, %v1005_v54 }
 0x322   : > { %1357 = vrot.lane.b32.xlu0 %v4869_v59, %s4354_s12 }
 0x323   : > { %v3644_v60 = vpop.f32.mrb[4].mxu0 }
 0x324   : > { %v1081_v61 = vpop.f32.mrb[5].mxu0 }
 0x325   : > { %v3645_v63 = vpop.f32.mrb[6].mxu0 }
 0x326   : > { %v4874_v0 = vpack.c.bf16 %v3645_v63, %v3644_v60  ;;  %v1084_v1 = vpop.f32.mrb[7].mxu0 }
 0x327   : > { %v1222_v3 = vpack.c.bf16 %v1084_v1, %v1081_v61 }
 0x329   : > { %v1360_v5 = vrot.slane %v1222_v3, 4  ;;  %v1238_v6 = vsel %vm1236_vm3, %v1222_v3, 0 }
 0x32a   : > { %3659 = vmatpush3.bf16.msra.mxu1 %v1238_v6 }
 0x32b   : > { %3676 = vmatprep.subr.bf16.mxu1 %v4352_v17  ;;  %v1365_v7 = vsel %vm1236_vm3, %v1360_v5, 0  ;;  %v3652_v8 = vpop.f32.mrb[8].mxu0 }
 0x32c   : > { %v1199_v9 = vadd.f32 %v3652_v8, %v1111_v4  ;;  %v1190_v10 = vpop.f32.mrb[9].mxu0 }
 0x32d   : > { %3661 = vmatmul.mubr.msk.bf16.vlgmr.msra.gmra.mrb[0].mxu1 %vm1232_vm4, %v4869_v59  ;;  %v1191_v11 = vadd.f32 %v1190_v10, %v1111_v4  ;;  %v3653_v12 = vpop.f32.mrb[10].mxu0 }
 0x32e   : > { %3677 = vmatpush3.bf16.msra.mxu1 %v1365_v7  ;;  %3678 = vmatprep.mubr.msk.bf16.mxu1 %vm4353_vm2, %v4352_v17  ;;  %v1202_v13 = vadd.f32 %v3653_v12, %v1111_v4  ;;  %v1193_v14 = vpop.f32.mrb[11].mxu0 }
 0x32f   : > { %v1194_v15 = vadd.f32 %v1193_v14, %v1111_v4  ;;  %3682 = vmatprep.subr.bf16.mxu1 %v4352_v17  ;;  %v1598_v14 = vsel %vm1236_vm3, %v4874_v0, 0 }
 0x330   : > { %v4887_v16 = vpack.c.bf16 %v1202_v13, %v1199_v9 }
 0x331   : > { %v4889_v18 = vpack.c.bf16 %v1194_v15, %v1191_v11 }
 0x332   : > { %1441 = vrot.lane.b32.xlu0 %v4887_v16, %s4354_s12 }
 0x333   : > { %v3656_v19 = vpop.f32.mrb[12].mxu0  ;;  %1439 = vrot.lane.b32.xlu1 %v4889_v18, %s4354_s12  ;;  %3665 = vmatpush3.bf16.msra.mxu0 %v4889_v18 }
 0x334   : > { %v1215_v20 = vadd.f32 %v3656_v19, %v1111_v4  ;;  %v1206_v21 = vpop.f32.mrb[13].mxu0  ;;  %3666 = vmatprep.subr.bf16.mxu0 %v4352_v17 }
 0x335   : > { %v3657_v22 = vpop.f32.mrb[14].mxu0  ;;  %v1207_v26 = vadd.f32 %v1206_v21, %v1111_v4 }
 0x336   : > { %v1218_v23 = vadd.f32 %v3657_v22, %v1111_v4  ;;  %v1209_v30 = vpop.f32.mrb[15].mxu0 }
 0x337   : > { %3667 = vmatpush3.bf16.msra.mxu0 %v4887_v16  ;;  %v1210_v31 = vadd.f32 %v1209_v30, %v1111_v4 }
 0x338   : > { %v4898_v24 = vpack.c.bf16 %v1218_v23, %v1215_v20  ;;  %3668 = vmatprep.subr.bf16.mxu0 %v4352_v17 }
 0x339   : > { %v4906_v32 = vpack.c.bf16 %v1210_v31, %v1207_v26  ;;  %v1229_v31 = vld [vmem:[%s4778_s2 + $0x4] sm:$0xf] }
 0x33a   : > { %1445 = vrot.lane.b32.xlu0 %v4898_v24, %s4354_s12 }
 0x33b   : > { %3669 = vmatpush3.bf16.msra.mxu0 %v4906_v32 }
 0x33c   : > { %3670 = vmatprep.subr.bf16.mxu0 %v4352_v17 }
 0x33f   : > { %3671 = vmatpush3.bf16.msra.mxu0 %v4898_v24 }
 0x340   : > { %3694 = vmatprep.subr.bf16.mxu0 %v4352_v17 }
 0x394   : > { %v1358_v25 = vpop.permute.xlu0 %1357 }
 0x395   : > { %3679 = vmatmul.mubr.msk.bf16.vlgmr.msra.gmra.mrb[4].mxu1 %vm1232_vm4, %v1358_v25 }
 0x396   : > { %3690 = vmatprep.mubr.msk.bf16.mxu1 %vm4353_vm2, %v4352_v17 }
 0x3a4   : > { %v1442_v41 = vpop.permute.xlu0 %1441 }
 0x3a5   : > { %v1440_v40 = vpop.permute.xlu1 %1439 }
 0x3a6   : > { %3683 = vmatpush3.bf16.msra.mxu1 %v1440_v40 }
 0x3a7   : > { %3684 = vmatprep.subr.bf16.mxu1 %v4352_v17 }
 0x3aa   : > { %3685 = vmatpush3.bf16.msra.mxu1 %v1442_v41 }
 0x3ab   : > { %3686 = vmatprep.subr.bf16.mxu1 %v4352_v17 }
 0x3ac   : > { %v1446_v54 = vpop.permute.xlu0 %1445 }
 0x400   : > { %v1274_v34 = vpop.f32.mrb[0].mxu1 }
 0x401   : > { %v1275_v35 = vadd.f32 %v1274_v34, %v4912_v33  ;;  %v3662_v36 = vpop.f32.mrb[1].mxu1  ;;  %v1502_v34 = vsel %vm1236_vm3, %v1229_v31, 0 }
 0x402   : > { %v1277_v37 = vpop.f32.mrb[2].mxu1 }
 0x403   : > { %v3663_v38 = vpop.f32.mrb[3].mxu1  ;;  %v1282_v39 = vsel %vm1281_vm5, %v1275_v35, -inf  ;;  %v1278_v52 = vadd.f32 %v1277_v37, %v4919_v45 }
 0x404   : > { %1283 = vmax.xlane.f32.xlu0 %v1282_v39 }
 0x405   : > { %v1285_v53 = vsel %vm1281_vm5, %v1278_v52, -inf }
 0x468   : > { %v1401_v42 = vpop.f32.mrb[4].mxu1 }
 0x469   : > { %v1402_v43 = vadd.f32 %v1401_v42, %v4912_v33  ;;  %v3680_v44 = vpop.f32.mrb[5].mxu1 }
 0x46a   : > { %v1404_v46 = vpop.f32.mrb[6].mxu1  ;;  %v1228_v44 = vld [vmem:[%s4778_s2] sm:$0xf] }
 0x46b   : > { %v1405_v47 = vadd.f32 %v1404_v46, %v4919_v45  ;;  %v3681_v48 = vpop.f32.mrb[7].mxu1  ;;  %v1408_v49 = vsel %vm1281_vm5, %v1402_v43, -inf }
 0x46c   : > { %1409 = vmax.xlane.f32.xlu1 %v1408_v49 }
 0x46d   : > { %v1411_v50 = vsel %vm1281_vm5, %v1405_v47, -inf }
 0x470   : > { %1412 = vmax.xlane.f32.xlu1 %v1411_v50  ;;  %v1549_v50 = vsel %vm1236_vm3, %v1228_v44, 0 }
 0x481   : > { %1443 = vrot.lane.b32.xlu1 %v4906_v32, %s4354_s12 }
 0x485   : > { %1592 = vrot.lane.b32.xlu1 %v4869_v59, %s4355_s14 }
 0x491   : > { %v1284_v55 = vpop.xlane.xlu0 %1283 }
 0x492   : > { %vm1288_vm6 = vcmp.gt.f32.partialorder %v1284_v55, -inf }
 0x493   : > { %v1290_v57 = vsel %vm1288_vm6, %v1284_v55, 0.0 }
 0x494   : > { %v1292_v63 = vsub.f32 %v1275_v35, %v1290_v57 }
 0x496   : > { %v1294_v6 = vmul.f32 1.442695, %v1292_v63 }
 0x4a9   : > { %1286 = vmax.xlane.f32.xlu1 %v1285_v53 }
 0x4f9   : > { %v1410_v56 = vpop.xlane.xlu1 %1409 }
 0x4fa   : > { %vm1414_vm7 = vcmp.gt.f32.partialorder %v1410_v56, -inf }
 0x4fb   : > { %v1416_v58 = vsel %vm1414_vm7, %v1410_v56, 0.0 }
 0x4fc   : > { %v1418_v60 = vsub.f32 %v1402_v43, %v1416_v58 }
 0x4fd   : > { %v1413_v61 = vpop.xlane.xlu1 %1412 }
 0x4fe   : > { %v1420_v1 = vmul.f32 1.442695, %v1418_v60  ;;  %vm1415_vm8 = vcmp.gt.f32.partialorder %v1413_v61, -inf }
 0x4ff   : > { %v1417_v3 = vsel %vm1415_vm8, %v1413_v61, 0.0 }
 0x500   : > { %4019 = vpow2.f32 %v1420_v1  ;;  %v1419_v4 = vsub.f32 %v1405_v47, %v1417_v3 }
 0x501   : > { %v1444_v5 = vpop.permute.xlu1 %1443 }
 0x502   : > { %v1422_v7 = vmul.f32 1.442695, %v1419_v4  ;;  %3687 = vmatpush3.bf16.msra.mxu1 %v1444_v5 }
 0x503   : > { %3688 = vmatprep.subr.bf16.mxu1 %v4352_v17 }
 0x504   : > { %4021 = vpow2.f32 %v1422_v7 }
 0x505   : > { %4023 = vpow2.f32 %v1294_v6  ;;  %v1593_v19 = vpop.permute.xlu1 %1592 }
 0x506   : > { %3689 = vmatpush3.bf16.msra.mxu1 %v1446_v54 }
 0x507   : > { %3706 = vmatprep.subr.bf16.mxu1 %v4352_v17 }
 0x50a   : > { %v4020_v8 = vpop.eup %4019 }
 0x50b   : > { %v1424_v9 = vsel %vm1281_vm5, %v4020_v8, 0.0 }
 0x50c   : > { %1425 = vadd.xlane.f32.xlu0 %v1424_v9 }
 0x50e   : > { %v4022_v10 = vpop.eup %4021 }
 0x50f   : > { %v1427_v11 = vsel %vm1281_vm5, %v4022_v10, 0.0  ;;  %v1434_v12 = vpack.c.bf16 %v4022_v10, %v4020_v8  ;;  %v4024_v13 = vpop.eup %4023 }
 0x510   : > { %1428 = vadd.xlane.f32.xlu0 %v1427_v11  ;;  %v1298_v15 = vsel %vm1281_vm5, %v4024_v13, 0.0 }
 0x511   : > { %3691 = vmatmul.mubr.msk.bf16.vlgmr.msra.gmra.mrb[8].mxu1 %vm1281_vm5, %v1434_v12 }
 0x512   : > { %3707 = vmatpush3.bf16.msra.mxu1 %v1598_v14  ;;  %3708 = vmatprep.mubr.msk.bf16.mxu1 %vm4353_vm2, %v4352_v17 }
 0x513   : > { %3724 = vmatprep.subr.bf16.mxu1 %v4352_v17 }
 0x514   : > { %1299 = vadd.xlane.f32.xlu0 %v1298_v15 }
 0x519   : > { %3709 = vmatmul.mubr.msk.bf16.vlgmr.msra.gmra.mrb[12].mxu1 %vm1232_vm4, %v1593_v19 }
 0x51a   : > { %3726 = vmatprep.mubr.msk.bf16.mxu1 %vm4353_vm2, %v4352_v17 }
 0x536   : > { %v1287_v20 = vpop.xlane.xlu1 %1286 }
 0x537   : > { %vm1289_vm9 = vcmp.gt.f32.partialorder %v1287_v20, -inf }
 0x538   : > { %v1291_v21 = vsel %vm1289_vm9, %v1287_v20, 0.0 }
 0x539   : > { %v1293_v22 = vsub.f32 %v1278_v52, %v1291_v21 }
 0x53b   : > { %v1296_v23 = vmul.f32 1.442695, %v1293_v22 }
 0x53d   : > { %4025 = vpow2.f32 %v1296_v23 }
 0x547   : > { %v4026_v25 = vpop.eup %4025 }
 0x548   : > { %v1308_v26 = vpack.c.bf16 %v4026_v25, %v4024_v13  ;;  %v1301_v30 = vsel %vm1281_vm5, %v4026_v25, 0.0 }
 0x549   : > { %1302 = vadd.xlane.f32.xlu1 %v1301_v30 }
 0x54a   : > { %3673 = vmatmul.mubr.msk.bf16.vlgmr.msra.gmra.mrb[16].mxu0 %vm1281_vm5, %v1308_v26 }
 0x54b   : > { %3696 = vmatprep.mubr.msk.bf16.mxu0 %vm4353_vm2, %v4352_v17  ;;  %3695 = vmatpush3.bf16.msra.mxu0 %v1502_v34 }
 0x54c   : > { %3700 = vmatprep.subr.bf16.mxu0 %v4352_v17 }
 0x55a   : > { %1670 = vrot.lane.b32.xlu1 %v4887_v16, %s4355_s14 }
 0x55e   : > { %1672 = vrot.lane.b32.xlu1 %v4906_v32, %s4355_s14 }
 0x599   : > { %v1426_v35 = vpop.xlane.xlu0 %1425 }
 0x59a   : > { %v1430_v37 = vmax.f32 %v1426_v35, 1e-30 }
 0x59c   : > { %4027 = vrcp.f32 %v1430_v37 }
 0x59d   : > { %v1429_v36 = vpop.xlane.xlu0 %1428 }
 0x59e   : > { %v1431_v38 = vmax.f32 %v1429_v36, 1e-30 }
 0x5a0   : > { %4029 = vrcp.f32 %v1431_v38 }
 0x5a1   : > { %v1300_v61 = vpop.xlane.xlu0 %1299 }
 0x5a2   : > { %v1304_v1 = vmax.f32 %v1300_v61, 1e-30 }
 0x5a4   : > { %4031 = vrcp.f32 %v1304_v1 }
 0x5a6   : > { %v4028_v40 = vpop.eup %4027 }
 0x5aa   : > { %v4030_v42 = vpop.eup %4029 }
 0x5ae   : > { %v4032_v5 = vpop.eup %4031 }
 0x5d6   : > { %v1303_v63 = vpop.xlane.xlu1 %1302 }
 0x5d7   : > { %v1305_v3 = vmax.f32 %v1303_v63, 1e-30 }
 0x5d9   : > { %4033 = vrcp.f32 %v1305_v3 }
 0x5da   : > { %v1671_v13 = vpop.permute.xlu1 %1670 }
 0x5de   : > { %v1673_v14 = vpop.permute.xlu1 %1672 }
 0x5e3   : > { %v4034_v7 = vpop.eup %4033 }
 0x5e4   : > { %v1488_v39 = vpop.f32.mrb[8].mxu1 }
 0x5e5   : > { %v3692_v41 = vpop.f32.mrb[9].mxu1  ;;  %v1495_v46 = vmul.f32 %v4028_v40, %v1488_v39 }
 0x5e6   : > { %v1491_v43 = vpop.f32.mrb[10].mxu1 }
 0x5e7   : > { %v1496_v47 = vmul.f32 %v4030_v42, %v1491_v43  ;;  %v3693_v48 = vpop.f32.mrb[11].mxu1  ;;  %v1230_v43 = vld [vmem:[%s4778_s2 + $0x8] sm:$0xf] }
 0x5e8   : > { %v1731_v44 = vsel %vm1236_vm3, %v1230_v43, 0 }
 0x5e9   : > { %v1497_v49 = vpack.c.bf16 %v1496_v47, %v1495_v46  ;;  %3725 = vmatpush3.bf16.msra.mxu1 %v1731_v44 }
 0x5ea   : > { %3730 = vmatprep.subr.bf16.mxu1 %v4352_v17 }
 0x5eb   : > { %3697 = vmatmul.mubr.msk.bf16.vlgmr.msra.gmra.mrb[20].mxu0 %vm1232_vm4, %v1497_v49 }
 0x5ec   : > { %v1634_v52 = vpop.f32.mrb[12].mxu1  ;;  %3701 = vmatpush3.bf16.msra.mxu0 %v1549_v50  ;;  %3702 = vmatprep.mubr.msk.bf16.mxu0 %vm4353_vm2, %v4352_v17 }
 0x5ed   : > { %v1635_v53 = vadd.f32 %v1634_v52, %v4912_v33  ;;  %v3710_v54 = vpop.f32.mrb[13].mxu1  ;;  %3712 = vmatprep.subr.bf16.mxu0 %v4352_v17 }
 0x5ee   : > { %v1637_v55 = vpop.f32.mrb[14].mxu1 }
 0x5ef   : > { %v1638_v56 = vadd.f32 %v1637_v55, %v4919_v45  ;;  %v3711_v57 = vpop.f32.mrb[15].mxu1  ;;  %v1641_v58 = vsel %vm1281_vm5, %v1635_v53, -inf }
 0x5f0   : > { %1642 = vmax.xlane.f32.xlu0 %v1641_v58  ;;  %v1779_v58 = vrot.slane %v4874_v0, 4 }
 0x5f1   : > { %v1644_v60 = vsel %vm1281_vm5, %v1638_v56, -inf }
 0x5f2   : > { %1645 = vmax.xlane.f32.xlu1 %v1644_v60  ;;  %v1784_v3 = vsel %vm1236_vm3, %v1779_v58, 0 }
 0x603   : > { %1674 = vrot.lane.b32.xlu1 %v4898_v24, %s4355_s14 }
 0x606   : > { %1668 = vrot.lane.b32.xlu0 %v4889_v18, %s4355_s14 }
 0x61d   : > { %v1346_v4 = vpop.f32.mrb[16].mxu0 }
 0x61e   : > { %v3674_v6 = vpop.f32.mrb[17].mxu0  ;;  %v1353_v9 = vmul.f32 %v4032_v5, %v1346_v4 }
 0x61f   : > { %v1349_v8 = vpop.f32.mrb[18].mxu0 }
 0x620   : > { %v1354_v10 = vmul.f32 %v4034_v7, %v1349_v8  ;;  %v3675_v11 = vpop.f32.mrb[19].mxu0 }
 0x622   : > { %v1355_v12 = vpack.c.bf16 %v1354_v10, %v1353_v9 }
 0x624   : > { %3703 = vmatmul.mubr.msk.bf16.vlgmr.msra.gmra.mrb[24].mxu0 %vm1232_vm4, %v1355_v12 }
 0x625   : > { %3720 = vmatprep.mubr.msk.bf16.mxu0 %vm4353_vm2, %v4352_v17 }
 0x67d   : > { %v1643_v15 = vpop.xlane.xlu0 %1642 }
 0x67e   : > { %vm1647_vm10 = vcmp.gt.f32.partialorder %v1643_v15, -inf }
 0x67f   : > { %v1649_v19 = vsel %vm1647_vm10, %v1643_v15, 0.0  ;;  %v1646_v20 = vpop.xlane.xlu1 %1645 }
 0x680   : > { %v1651_v21 = vsub.f32 %v1635_v53, %v1649_v19  ;;  %vm1648_vm11 = vcmp.gt.f32.partialorder %v1646_v20, -inf }
 0x681   : > { %v1650_v22 = vsel %vm1648_vm11, %v1646_v20, 0.0  ;;  %v1669_v23 = vpop.permute.xlu0 %1668 }
 0x682   : > { %v1653_v25 = vmul.f32 1.442695, %v1651_v21  ;;  %v1652_v26 = vsub.f32 %v1638_v56, %v1650_v22  ;;  %3713 = vmatpush3.bf16.msra.mxu0 %v1669_v23 }
 0x683   : > { %3714 = vmatprep.subr.bf16.mxu0 %v4352_v17  ;;  %v1675_v31 = vpop.permute.xlu1 %1674 }
 0x684   : > { %4035 = vpow2.f32 %v1653_v25  ;;  %v1655_v30 = vmul.f32 1.442695, %v1652_v26 }
 0x686   : > { %4037 = vpow2.f32 %v1655_v30  ;;  %3715 = vmatpush3.bf16.msra.mxu0 %v1671_v13 }
 0x687   : > { %3716 = vmatprep.subr.bf16.mxu0 %v4352_v17 }
 0x68a   : > { %3717 = vmatpush3.bf16.msra.mxu0 %v1673_v14 }
 0x68b   : > { %3718 = vmatprep.subr.bf16.mxu0 %v4352_v17 }
 0x68e   : > { %v4036_v34 = vpop.eup %4035  ;;  %3719 = vmatpush3.bf16.msra.mxu0 %v1675_v31 }
 0x68f   : > { %v1657_v35 = vsel %vm1281_vm5, %v4036_v34, 0.0  ;;  %3736 = vmatprep.subr.bf16.mxu0 %v4352_v17 }
 0x690   : > { %v4038_v36 = vpop.eup %4037  ;;  %1658 = vadd.xlane.f32.xlu0 %v1657_v35 }
 0x691   : > { %v1660_v37 = vsel %vm1281_vm5, %v4038_v36, 0.0  ;;  %v1667_v38 = vpack.c.bf16 %v4038_v36, %v4036_v34 }
 0x692   : > { %1661 = vadd.xlane.f32.xlu1 %v1660_v37 }
 0x693   : > { %3721 = vmatmul.mubr.msk.bf16.vlgmr.msra.gmra.mrb[28].mxu0 %vm1281_vm5, %v1667_v38 }
 0x694   : > { %3744 = vmatprep.mubr.msk.bf16.mxu0 %vm4353_vm2, %v4352_v17 }
 0x6a6   : > { %1776 = vrot.lane.b32.xlu0 %v4869_v59, %s4356_s10 }
 0x6aa   : > { %1856 = vrot.lane.b32.xlu0 %v4887_v16, %s4356_s10 }
 0x6ae   : > { %1858 = vrot.lane.b32.xlu0 %v4906_v32, %s4356_s10 }
 0x6b2   : > { %1860 = vrot.lane.b32.xlu0 %v4898_v24, %s4356_s10 }
 0x6be   : > { %v1538_v39 = vpop.f32.mrb[20].mxu0 }
 0x6bf   : > { %v3698_v40 = vpop.f32.mrb[21].mxu0 }
 0x6c0   : > { %v1541_v41 = vpop.f32.mrb[22].mxu0 }
 0x6c1   : > { %v3699_v42 = vpop.f32.mrb[23].mxu0 }
 0x6f7   : > { %v1585_v59 = vpop.f32.mrb[24].mxu0 }
 0x6f8   : > { %v1586_v46 = vadd.f32 %v1585_v59, %v1538_v39  ;;  %v3704_v47 = vpop.f32.mrb[25].mxu0 }
 0x6f9   : > { %v1588_v16 = vpop.f32.mrb[26].mxu0 }
 0x6fa   : > { %v1589_v48 = vadd.f32 %v1588_v16, %v1541_v41  ;;  %v3705_v49 = vpop.f32.mrb[27].mxu0  ;;  %v1231_v41 = vld [vmem:[%s4778_s2 + $0xc] sm:$0xf]  ;;  %s4357_s2 = smov 88  }
 0x6fb   : > { %v1917_v42 = vsel %vm1236_vm3, %v1231_v41, 0 }
 0x71d   : > { %v1659_v32 = vpop.xlane.xlu0 %1658 }
 0x71e   : > { %v1663_v52 = vmax.f32 %v1659_v32, 1e-30 }
 0x71f   : > { %v1662_v50 = vpop.xlane.xlu1 %1661 }
 0x720   : > { %v1664_v24 = vmax.f32 %v1662_v50, 1e-30  ;;  %4039 = vrcp.f32 %v1663_v52 }
 0x721   : > { %v1777_v4 = vpop.permute.xlu0 %1776 }
 0x722   : > { %4041 = vrcp.f32 %v1664_v24 }
 0x725   : > { %v1857_v30 = vpop.permute.xlu0 %1856 }
 0x729   : > { %v1859_v35 = vpop.permute.xlu0 %1858 }
 0x72a   : > { %v4040_v54 = vpop.eup %4039 }
 0x72c   : > { %v4042_v56 = vpop.eup %4041 }
 0x72d   : > { %v1861_v37 = vpop.permute.xlu0 %1860 }
 0x766   : > { %v1717_v53 = vpop.f32.mrb[28].mxu0 }
 0x767   : > { %v3722_v55 = vpop.f32.mrb[29].mxu0  ;;  %v1724_v60 = vmul.f32 %v4040_v54, %v1717_v53  ;;  %v1964_v54 = vsub.s32 3, %v4828_v27 }
 0x768   : > { %v1720_v57 = vpop.f32.mrb[30].mxu0  ;;  %v1970_v55 = vsub.s32 6, %v4828_v27 }
 0x769   : > { %v1725_v61 = vmul.f32 %v4042_v56, %v1720_v57  ;;  %v3723_v63 = vpop.f32.mrb[31].mxu0  ;;  %v1965_v56 = vrot.slane %v4866_v51, %v1964_v54 }
 0x76b   : > { %v1726_v1 = vpack.c.bf16 %v1725_v61, %v1724_v60  ;;  %v1971_v61 = vrot.slane %v4832_v29, %v1970_v55 }
 0x76d   : > { %3727 = vmatmul.mubr.msk.bf16.vlgmr.msra.gmra.mrb[16].mxu1 %vm1232_vm4, %v1726_v1 }
 0x76e   : > { %3731 = vmatpush3.bf16.msra.mxu1 %v1784_v3  ;;  %3732 = vmatprep.mubr.msk.bf16.mxu1 %vm4353_vm2, %v4352_v17 }
 0x76f   : > { %3748 = vmatprep.subr.bf16.mxu1 %v4352_v17 }
 0x775   : > { %3733 = vmatmul.mubr.msk.bf16.vlgmr.msra.gmra.mrb[20].mxu1 %vm1232_vm4, %v1777_v4 }
 0x776   : > { %3750 = vmatprep.mubr.msk.bf16.mxu1 %vm4353_vm2, %v4352_v17  ;;  %3749 = vmatpush3.bf16.msra.mxu1 %v1917_v42 }
 0x777   : > { %3754 = vmatprep.subr.bf16.mxu1 %v4352_v17 }
 0x840   : > { %v1767_v0 = vpop.f32.mrb[16].mxu1 }
 0x841   : > { %v5001_v5 = vadd.f32 %v1767_v0, %v1586_v46  ;;  %v3728_v6 = vpop.f32.mrb[17].mxu1 }
 0x842   : > { %v1770_v7 = vpop.f32.mrb[18].mxu1 }
 0x843   : > { %v5003_v8 = vadd.f32 %v1770_v7, %v1589_v48  ;;  %v3729_v9 = vpop.f32.mrb[19].mxu1 }
 0x848   : > { %v1820_v10 = vpop.f32.mrb[20].mxu1 }
 0x849   : > { %v1821_v11 = vadd.f32 %v1820_v10, %v4912_v33  ;;  %v3734_v12 = vpop.f32.mrb[21].mxu1 }
 0x84a   : > { %v1823_v13 = vpop.f32.mrb[22].mxu1 }
 0x84b   : > { %v1824_v14 = vadd.f32 %v1823_v13, %v4919_v45  ;;  %v3735_v15 = vpop.f32.mrb[23].mxu1  ;;  %v1827_v19 = vsel %vm1281_vm5, %v1821_v11, -inf }
 0x84c   : > { %1828 = vmax.xlane.f32.xlu1 %v1827_v19  ;;  %v4000_v15 = vld [vmem:[%s4783_s8] sm:$0xff]   ;;  %v4002_v19 = vld [vmem:[%s4783_s8 + $0x8] sm:$0xff]   ;;  %s4358_s8 = smov 96  }
 0x84d   : > { %v1830_v20 = vsel %vm1281_vm5, %v1824_v14, -inf }
 0x850   : > { %1831 = vmax.xlane.f32.xlu1 %v1830_v20 }
 0x861   : > { %1854 = vrot.lane.b32.xlu1 %v4889_v18, %s4356_s10 }
 0x8d9   : > { %v1829_v21 = vpop.xlane.xlu1 %1828 }
 0x8da   : > { %vm1833_vm12 = vcmp.gt.f32.partialorder %v1829_v21, -inf }
 0x8db   : > { %v1835_v22 = vsel %vm1833_vm12, %v1829_v21, 0.0 }
 0x8dc   : > { %v1837_v23 = vsub.f32 %v1821_v11, %v1835_v22 }
 0x8dd   : > { %v1832_v25 = vpop.xlane.xlu1 %1831 }
 0x8de   : > { %v1839_v33 = vmul.f32 1.442695, %v1837_v23  ;;  %vm1834_vm13 = vcmp.gt.f32.partialorder %v1832_v25, -inf  ;;  %v5050_v23 = vrot.slane %v4832_v29, %v1110_v62 }
 0x8df   : > { %v1836_v26 = vsel %vm1834_vm13, %v1832_v25, 0.0 }
 0x8e0   : > { %4043 = vpow2.f32 %v1839_v33  ;;  %v1838_v45 = vsub.f32 %v1824_v14, %v1836_v26  ;;  %v5053_v33 = vrot.slane %v4832_v29, %v1964_v54  ;;  %v2089_v29 = vsub.s32 5, %v4828_v27  ;;  %v5103_v54 = vld [vmem:[%s5418_s29] sm:$0xff] }
 0x8e1   : > { %v1855_v31 = vpop.permute.xlu1 %1854 }
 0x8e2   : > { %v1841_v34 = vmul.f32 1.442695, %v1838_v45  ;;  %3737 = vmatpush3.bf16.msra.mxu0 %v1855_v31 }
 0x8e3   : > { %3738 = vmatprep.subr.bf16.mxu0 %v4352_v17 }
 0x8e4   : > { %4045 = vpow2.f32 %v1841_v34 }
 0x8e6   : > { %3739 = vmatpush3.bf16.msra.mxu0 %v1857_v30  ;;  %v901_v30 = vld [vmem:[#allocation12] sm:$0xff] }
 0x8e7   : > { %3740 = vmatprep.subr.bf16.mxu0 %v4352_v17 }
 0x8ea   : > { %v4044_v18 = vpop.eup %4043  ;;  %3741 = vmatpush3.bf16.msra.mxu0 %v1859_v35 }
 0x8eb   : > { %v1843_v36 = vsel %vm1281_vm5, %v4044_v18, 0.0  ;;  %3742 = vmatprep.subr.bf16.mxu0 %v4352_v17 }
 0x8ec   : > { %1844 = vadd.xlane.f32.xlu1 %v1843_v36  ;;  %v2090_v36 = vrot.slane %v4866_v51, %v2089_v29 }
 0x8ee   : > { %v4046_v38 = vpop.eup %4045  ;;  %3743 = vmatpush3.bf16.msra.mxu0 %v1861_v37 }
 0x8ef   : > { %v1846_v39 = vsel %vm1281_vm5, %v4046_v38, 0.0  ;;  %v1853_v40 = vpack.c.bf16 %v4046_v38, %v4044_v18  ;;  %3762 = vmatprep.subr.bf16.mxu0 %v4352_v17  ;;  %v2077_v18 = vsub.s32 4, %v4828_v27 }
 0x8f0   : > { %1847 = vadd.xlane.f32.xlu0 %v1846_v39 }
 0x8f1   : > { %3745 = vmatmul.mubr.msk.bf16.vlgmr.msra.gmra.mrb[32].mxu0 %vm1281_vm5, %v1853_v40  ;;  %v2078_v37 = vrot.slane %v4866_v51, %v2077_v18 }
 0x8f2   : > { %3766 = vmatprep.mubr.msk.bf16.mxu0 %vm4353_vm2, %v4352_v17 }
 0x979   : > { %v1845_v43 = vpop.xlane.xlu1 %1844 }
 0x97a   : > { %v1849_v59 = vmax.f32 %v1845_v43, 1e-30 }
 0x97c   : > { %4047 = vrcp.f32 %v1849_v59 }
 0x97d   : > { %v1848_v44 = vpop.xlane.xlu0 %1847 }
 0x97e   : > { %v1850_v46 = vmax.f32 %v1848_v44, 1e-30 }
 0x980   : > { %4049 = vrcp.f32 %v1850_v46 }
 0x986   : > { %v4048_v16 = vpop.eup %4047 }
 0x98a   : > { %v4050_v49 = vpop.eup %4049 }
 0x9c4   : > { %v1903_v47 = vpop.f32.mrb[32].mxu0 }
 0x9c5   : > { %v3746_v48 = vpop.f32.mrb[33].mxu0  ;;  %v1910_v50 = vmul.f32 %v4048_v16, %v1903_v47 }
 0x9c6   : > { %v1906_v32 = vpop.f32.mrb[34].mxu0 }
 0x9c7   : > { %v1911_v52 = vmul.f32 %v4050_v49, %v1906_v32  ;;  %v3747_v24 = vpop.f32.mrb[35].mxu0 }
 0x9c9   : > { %v1912_v53 = vpack.c.bf16 %v1911_v52, %v1910_v50 }
 0x9cb   : > { %3751 = vmatmul.mubr.msk.bf16.vlgmr.msra.gmra.mrb[24].mxu1 %vm1232_vm4, %v1912_v53 }
 0x9cc   : > { %3758 = vmatprep.mubr.msk.bf16.mxu1 %vm4353_vm2, %v4352_v17  ;;  %3755 = vmatpush3.bf16.msra.mxu1 %v4000_v15 }
 0x9cd   : > { %3756 = vmatprep.subr.bf16.mxu1 %v4352_v17 }
 0x9d0   : > { %3757 = vmatpush3.bf16.msra.mxu1 %v4002_v19 }
 0x9d1   : > { %3770 = vmatprep.subr.bf16.mxu1 %v4352_v17 }
 0xa9e   : > { %v1953_v57 = vpop.f32.mrb[24].mxu1 }
 0xa9f   : > { %v1960_v58 = vadd.f32 %v1953_v57, %v5001_v5  ;;  %v3752_v60 = vpop.f32.mrb[25].mxu1 }
 0xaa0   : > { %v1956_v63 = vpop.f32.mrb[26].mxu1 }
 0xaa1   : > { %v1966_v1 = vadd.f32 %v1965_v56, %v1960_v58  ;;  %v1961_v3 = vadd.f32 %v1956_v63, %v5003_v8  ;;  %v3753_v4 = vpop.f32.mrb[27].mxu1  ;;  %v3999_v8 = vld [vmem:[%s4788_s20] sm:$0xff]  }
 0xaa2   : > { %3763 = vmatpush3.bf16.msra.mxu0 %v3999_v8 }
 0xaa3   : > { %v1967_v0 = vadd.f32 %v1965_v56, %v1961_v3  ;;  %v1972_v6 = vmul.f32 %v1971_v61, %v1966_v1  ;;  %3764 = vmatprep.subr.bf16.mxu0 %v4352_v17 }
 0xaa5   : > { %v1974_v7 = vadd.f32 %v1972_v6, %v4811_v2  ;;  %v5035_v9 = vmul.f32 %v1971_v61, %v1967_v0  ;;  %v4001_v2 = vld [vmem:[%s4788_s20 + $0x8] sm:$0xff]  }
 0xaa6   : > { %3765 = vmatpush3.bf16.msra.mxu0 %v4001_v2 }
 0xaa7   : > { %v1976_v5 = vsel %vm906_vm1, %v1974_v7, 0.0  ;;  %3776 = vmatprep.subr.bf16.mxu0 %v4352_v17 }
 0xaa8   : > { %1977 = vadd.xlane.f32.xlu0 %v1976_v5 }
 0xb35   : > { %v1978_v10 = vpop.xlane.xlu0 %1977 }
 0xb36   : > { %v1982_v11 = vmul.f32 0.03125, %v1978_v10 }
 0xb38   : > { %v1984_v12 = vsub.f32 %v1974_v7, %v1982_v11 }
 0xb3a   : > { %v1986_v13 = vmul.f32 %v1984_v12, %v1984_v12 }
 0xb3c   : > { %v1988_v14 = vsel %vm906_vm1, %v1986_v13, 0.0 }
 0xb3d   : > { %1989 = vadd.xlane.f32.xlu0 %v1988_v14 }
 0xbca   : > { %v1990_v20 = vpop.xlane.xlu0 %1989 }
 0xbcb   : > { %v1994_v21 = vmul.f32 0.03125, %v1990_v20 }
 0xbcd   : > { %v1996_v22 = vadd.f32 1e-05, %v1994_v21 }
 0xbcf   : > { %4051 = vrsqrt.f32 %v1996_v22 }
 0xbd9   : > { %v4052_v25 = vpop.eup %4051 }
 0xbda   : > { %v2000_v26 = vmul.f32 %v4052_v25, %v1984_v12 }
 0xbdc   : > { %v2006_v45 = vmul.f32 %v5050_v23, %v2000_v26 }
 0xbde   : > { %v5057_v31 = vadd.f32 %v5053_v33, %v2006_v45 }
 0xbe0   : > { %v2082_v34 = vpack.c.bf16 %v5057_v31, %v5057_v31  ;;  %v2014_v35 = vadd.f32 %v5057_v31, %v901_v30  ;;  %v2147_v30 = vld [vmem:[%s4793_s24] sm:$0xf] }
 0xbe2   : > { %3767 = vmatmul.mubr.msk.bf16.vlgmr.msra.gmra.mrb[36].mxu0 %vm906_vm1, %v2082_v34  ;;  %v2015_v62 = vpack.c.bf16 %v2014_v35, %v2014_v35  ;;  %v2428_v34 = vsel %vm1236_vm3, %v2147_v30, 0  ;;  %v2148_v35 = vld [vmem:[%s4793_s24 + $0x4] sm:$0xf] }
 0xbe3   : > { %3778 = vmatprep.mubr.msk.bf16.mxu0 %vm4353_vm2, %v4352_v17 }
 0xbe4   : > { %3759 = vmatmul.mubr.msk.bf16.vlgmr.msra.gmra.mrb[28].mxu1 %vm906_vm1, %v2015_v62  ;;  %v2382_v62 = vsel %vm1236_vm3, %v2148_v35, 0 }
 0xbe5   : > { %3772 = vmatprep.mubr.msk.bf16.mxu1 %vm4353_vm2, %v4352_v17 }
 0xcb5   : > { %v2140_v38 = vpop.f32.mrb[36].mxu0 }
 0xcb6   : > { %v2141_v39 = vadd.f32 %v2140_v38, %v2090_v36  ;;  %v3768_v40 = vpop.f32.mrb[37].mxu0 }
 0xcb7   : > { %v2069_v41 = vpop.f32.mrb[28].mxu1  ;;  %v2143_v42 = vpop.f32.mrb[38].mxu0 }
 0xcb8   : > { %v5076_v43 = vpack.c.bf16 %v2141_v39, %v2141_v39  ;;  %v2079_v44 = vadd.f32 %v2078_v37, %v2069_v41  ;;  %v5078_v59 = vpack.c.bf16 %v2069_v41, %v2069_v41  ;;  %v3760_v46 = vpop.f32.mrb[29].mxu1  ;;  %v3769_v47 = vpop.f32.mrb[39].mxu0 }
 0xcb9   : > { %v2072_v16 = vpop.f32.mrb[30].mxu1 }
 0xcba   : > { %2265 = vrot.lane.b32.xlu0 %v5078_v59, %s4357_s2  ;;  %2152 = vrot.lane.b32.xlu1 %v5078_v59, %s4358_s8  ;;  %v3761_v51 = vpop.f32.mrb[31].mxu1  ;;  %v2218_v48 = vsel %vm1236_vm3, %v5076_v43, 0  ;;  %v5084_v49 = vpack.c.bf16 %v2079_v44, %v2079_v44 }
 0xcbb   : > { %3777 = vmatpush3.bf16.msra.mxu0 %v2218_v48 }
 0xcbc   : > { %3788 = vmatprep.subr.bf16.mxu0 %v4352_v17 }
 0xcbe   : > { %2263 = vrot.lane.b32.xlu1 %v5084_v49, %s4354_s12 }
 0xd2c   : > { %v2153_v32 = vpop.permute.xlu1 %2152  ;;  %v2266_v52 = vpop.permute.xlu0 %2265 }
 0xd2d   : > { %v2158_v50 = vsel %vm1232_vm4, %v2153_v32, 0  ;;  %v2271_v24 = vsel %vm1232_vm4, %v2266_v52, 0 }
 0xd2e   : > { %3771 = vmatpush3.bf16.xpose.msra.mxu1 %v2158_v50 }
 0xd2f   : > { %3782 = vmatprep.subr.bf16.mxu1 %v4352_v17 }
 0xd30   : > { %v2264_v53 = vpop.permute.xlu1 %2263 }
 0xd35   : > { %3773 = vmatmul.mubr.msk.bf16.vlgmr.msra.gmra.mrb[32].mxu1 %vm1232_vm4, %v5084_v49 }
 0xd36   : > { %3783 = vmatpush3.bf16.xpose.msra.mxu1 %v2271_v24  ;;  %3784 = vmatprep.mubr.msk.bf16.mxu1 %vm4353_vm2, %v4352_v17 }
 0xd37   : > { %3794 = vmatprep.subr.bf16.mxu1 %v4352_v17 }
 0xd3d   : > { %3785 = vmatmul.mubr.msk.bf16.vlgmr.msra.gmra.mrb[36].mxu1 %vm1232_vm4, %v2264_v53 }
 0xd3e   : > { %3796 = vmatprep.mubr.msk.bf16.mxu1 %vm4353_vm2, %v4352_v17  ;;  %3795 = vmatpush3.bf16.msra.mxu1 %v2382_v62 }
 0xd3f   : > { %3806 = vmatprep.subr.bf16.mxu1 %v4352_v17 }
 0xe08   : > { %v2194_v56 = vpop.f32.mrb[32].mxu1 }
 0xe09   : > { %v2195_v57 = vadd.f32 %v2194_v56, %v5103_v54  ;;  %v3774_v58 = vpop.f32.mrb[33].mxu1 }
 0xe0a   : > { %v2197_v60 = vpop.f32.mrb[34].mxu1 }
 0xe0b   : > { %v3775_v61 = vpop.f32.mrb[35].mxu1  ;;  %v2200_v63 = vsel %vm1232_vm4, %v2195_v57, -inf }
 0xe0c   : > { %2201 = vmax.xlane.f32.xlu1 %v2200_v63 }
 0xe10   : > { %v2307_v1 = vpop.f32.mrb[36].mxu1 }
 0xe11   : > { %v2308_v3 = vadd.f32 %v2307_v1, %v5103_v54  ;;  %v3786_v4 = vpop.f32.mrb[37].mxu1 }
 0xe12   : > { %v2310_v0 = vpop.f32.mrb[38].mxu1 }
 0xe13   : > { %v3787_v6 = vpop.f32.mrb[39].mxu1  ;;  %v2313_v7 = vsel %vm1232_vm4, %v2308_v3, -inf }
 0xe14   : > { %2314 = vmax.xlane.f32.xlu0 %v2313_v7 }
 0xe2a   : > { %2328 = vrot.lane.b32.xlu0 %v5076_v43, %s4354_s12 }
 0xe99   : > { %v2202_v5 = vpop.xlane.xlu1 %2201 }
 0xe9a   : > { %vm2203_vm14 = vcmp.gt.f32.partialorder %v2202_v5, -inf }
 0xe9b   : > { %v2204_v10 = vsel %vm2203_vm14, %v2202_v5, 0.0 }
 0xe9c   : > { %v2205_v11 = vsub.f32 %v2195_v57, %v2204_v10 }
 0xe9e   : > { %v2206_v12 = vmul.f32 1.442695, %v2205_v11 }
 0xea0   : > { %4053 = vpow2.f32 %v2206_v12 }
 0xea1   : > { %v2315_v13 = vpop.xlane.xlu0 %2314 }
 0xea2   : > { %vm2316_vm15 = vcmp.gt.f32.partialorder %v2315_v13, -inf }
 0xea3   : > { %v2317_v14 = vsel %vm2316_vm15, %v2315_v13, 0.0 }
 0xea4   : > { %v2318_v8 = vsub.f32 %v2308_v3, %v2317_v14 }
 0xea5   : > { %v2329_v19 = vpop.permute.xlu0 %2328 }
 0xea6   : > { %v2319_v15 = vmul.f32 1.442695, %v2318_v8  ;;  %v2334_v22 = vsel %vm1236_vm3, %v2329_v19, 0 }
 0xea8   : > { %4055 = vpow2.f32 %v2319_v15  ;;  %v4083_v15 = vld [vmem:[#allocation2 + $0x8] sm:$0xff] }
 0xeaa   : > { %v4054_v2 = vpop.eup %4053 }
 0xeab   : > { %v2208_v20 = vsel %vm1232_vm4, %v4054_v2, 0.0  ;;  %v2213_v21 = vpack.c.bf16 %v4054_v2, %v4054_v2  ;;  %v1975_v2 = vadd.f32 %v4083_v15, %v5035_v9 }
 0xeac   : > { %2209 = vadd.xlane.f32.xlu0 %v2208_v20 }
 0xead   : > { %3779 = vmatmul.mubr.msk.bf16.vlgmr.msra.gmra.mrb[40].mxu0 %vm1232_vm4, %v2213_v21  ;;  %v1979_v19 = vsel %vm906_vm1, %v1975_v2, 0.0 }
 0xeae   : > { %3789 = vmatpush3.bf16.msra.mxu0 %v2334_v22  ;;  %3790 = vmatprep.mubr.msk.bf16.mxu0 %vm4353_vm2, %v4352_v17 }
 0xeaf   : > { %3800 = vmatprep.subr.bf16.mxu0 %v4352_v17 }
 0xeb2   : > { %v4056_v25 = vpop.eup %4055 }
 0xeb3   : > { %v2321_v26 = vsel %vm1232_vm4, %v4056_v25, 0.0  ;;  %v2326_v45 = vpack.c.bf16 %v4056_v25, %v4056_v25 }
 0xeb4   : > { %2322 = vadd.xlane.f32.xlu1 %v2321_v26 }
 0xeb5   : > { %3791 = vmatmul.mubr.msk.bf16.vlgmr.msra.gmra.mrb[44].mxu0 %vm1232_vm4, %v2326_v45 }
 0xeb6   : > { %3802 = vmatprep.mubr.msk.bf16.mxu0 %vm4353_vm2, %v4352_v17  ;;  %3801 = vmatpush3.bf16.msra.mxu0 %v2428_v34 }
 0xeb7   : > { %3812 = vmatprep.subr.bf16.mxu0 %v4352_v17 }
 0xec2   : > { %2534 = vrot.lane.b32.xlu0 %v5076_v43, %s4355_s14 }
 0xec5   : > { %2472 = vrot.lane.b32.xlu1 %v5078_v59, %s4359_s25 }
 0xec6   : > { %2631 = vrot.lane.b32.xlu0 %v5084_v49, %s4356_s10 }
 0xec9   : > { %2470 = vrot.lane.b32.xlu1 %v5084_v49, %s4355_s14 }
 0xf39   : > { %v2210_v36 = vpop.xlane.xlu0 %2209 }
 0xf3a   : > { %v2211_v37 = vmax.f32 %v2210_v36, 1e-30 }
 0xf3c   : > { %4057 = vrcp.f32 %v2211_v37 }
 0xf3d   : > { %v2535_v46 = vpop.permute.xlu0 %2534 }
 0xf3e   : > { %v2540_v48 = vsel %vm1236_vm3, %v2535_v46, 0 }
 0xf41   : > { %v2323_v38 = vpop.xlane.xlu1 %2322  ;;  %v2632_v9 = vpop.permute.xlu0 %2631 }
 0xf42   : > { %v2324_v39 = vmax.f32 %v2323_v38, 1e-30 }
 0xf44   : > { %4059 = vrcp.f32 %v2324_v39  ;;  %v2870_v39 = vsel %vm906_vm1, %v5057_v31, 0.0 }
 0xf45   : > { %v2473_v24 = vpop.permute.xlu1 %2472 }
 0xf46   : > { %v4058_v40 = vpop.eup %4057  ;;  %v2478_v58 = vsel %vm1232_vm4, %v2473_v24, 0 }
 0xf49   : > { %v2471_v60 = vpop.permute.xlu1 %2470 }
 0xf4e   : > { %v4060_v49 = vpop.eup %4059 }
 0xf80   : > { %v2254_v41 = vpop.f32.mrb[40].mxu0 }
 0xf81   : > { %v2260_v42 = vmul.f32 %v4058_v40, %v2254_v41  ;;  %v3780_v44 = vpop.f32.mrb[41].mxu0  ;;  %v2149_v40 = vld [vmem:[%s4793_s24 + $0x8] sm:$0xf] }
 0xf82   : > { %v2257_v47 = vpop.f32.mrb[42].mxu0  ;;  %v2588_v41 = vsel %vm1236_vm3, %v2149_v40, 0 }
 0xf83   : > { %v2261_v16 = vpack.c.bf16 %v2260_v42, %v2260_v42  ;;  %v3781_v51 = vpop.f32.mrb[43].mxu0 }
 0xf85   : > { %3803 = vmatmul.mubr.msk.bf16.vlgmr.msra.gmra.mrb[48].mxu0 %vm1232_vm4, %v2261_v16 }
 0xf86   : > { %3813 = vmatpush3.bf16.msra.mxu0 %v2540_v48  ;;  %3814 = vmatprep.mubr.msk.bf16.mxu0 %vm4353_vm2, %v4352_v17 }
 0xf87   : > { %3824 = vmatprep.subr.bf16.mxu0 %v4352_v17 }
 0xf88   : > { %v2370_v32 = vpop.f32.mrb[44].mxu0 }
 0xf89   : > { %v2376_v50 = vmul.f32 %v4060_v49, %v2370_v32  ;;  %v3792_v52 = vpop.f32.mrb[45].mxu0 }
 0xf8a   : > { %v2373_v53 = vpop.f32.mrb[46].mxu0 }
 0xf8b   : > { %v2377_v56 = vpack.c.bf16 %v2376_v50, %v2376_v50  ;;  %v3793_v57 = vpop.f32.mrb[47].mxu0 }
 0xf8d   : > { %3797 = vmatmul.mubr.msk.bf16.vlgmr.msra.gmra.mrb[40].mxu1 %vm1232_vm4, %v2377_v56 }
 0xf8e   : > { %3807 = vmatpush3.bf16.xpose.msra.mxu1 %v2478_v58  ;;  %3808 = vmatprep.mubr.msk.bf16.mxu1 %vm4353_vm2, %v4352_v17 }
 0xf8f   : > { %3818 = vmatprep.subr.bf16.mxu1 %v4352_v17 }
 0xf95   : > { %3809 = vmatmul.mubr.msk.bf16.vlgmr.msra.gmra.mrb[44].mxu1 %vm1232_vm4, %v2471_v60 }
 0xf96   : > { %3820 = vmatprep.mubr.msk.bf16.mxu1 %vm4353_vm2, %v4352_v17  ;;  %3819 = vmatpush3.bf16.msra.mxu1 %v2588_v41 }
 0xf97   : > { %3830 = vmatprep.subr.bf16.mxu1 %v4352_v17 }
0x1058   : > { %v2464_v61 = vpop.f32.mrb[48].mxu0 }
0x1059   : > { %v3804_v63 = vpop.f32.mrb[49].mxu0 }
0x105a   : > { %v2467_v1 = vpop.f32.mrb[50].mxu0 }
0x105b   : > { %v3805_v3 = vpop.f32.mrb[51].mxu0 }
0x1060   : > { %v2418_v4 = vpop.f32.mrb[40].mxu1 }
0x1061   : > { %v5147_v0 = vadd.f32 %v2464_v61, %v2418_v4  ;;  %v3798_v6 = vpop.f32.mrb[41].mxu1 }
0x1062   : > { %v2421_v7 = vpop.f32.mrb[42].mxu1 }
0x1063   : > { %v3799_v5 = vpop.f32.mrb[43].mxu1 }
0x1068   : > { %v2514_v10 = vpop.f32.mrb[44].mxu1 }
0x1069   : > { %v2515_v11 = vadd.f32 %v2514_v10, %v5103_v54  ;;  %v3810_v12 = vpop.f32.mrb[45].mxu1 }
0x106a   : > { %v2517_v13 = vpop.f32.mrb[46].mxu1 }
0x106b   : > { %v3811_v14 = vpop.f32.mrb[47].mxu1  ;;  %v2520_v8 = vsel %vm1232_vm4, %v2515_v11, -inf }
0x106c   : > { %2521 = vmax.xlane.f32.xlu1 %v2520_v8 }
0x107d   : > { %2633 = vrot.lane.b32.xlu1 %v5078_v59, %s4360_s19 }
0x10a1   : > { %1980 = vadd.xlane.f32.xlu1 %v1979_v19 }
0x10f9   : > { %v2522_v20 = vpop.xlane.xlu1 %2521 }
0x10fa   : > { %vm2523_vm0 = vcmp.gt.f32.partialorder %v2522_v20, -inf }
0x10fb   : > { %v2524_v21 = vsel %vm2523_vm0, %v2522_v20, 0.0 }
0x10fc   : > { %v2525_v22 = vsub.f32 %v2515_v11, %v2524_v21  ;;  %v4003_v21 = vld [vmem:[%s4729_s7] sm:$0xff]  }
0x10fd   : > { %v2634_v45 = vpop.permute.xlu1 %2633 }
0x10fe   : > { %v2526_v25 = vmul.f32 1.442695, %v2525_v22  ;;  %v2639_v59 = vsel %vm1232_vm4, %v2634_v45, 0  ;;  %v4004_v45 = vld [vmem:[%s4729_s7 + $0x8] sm:$0xff]   ;;  %s5419_s7 = scalar_lea.vmem [#allocation6], %s4723_s15 }
0x1100   : > { %4061 = vpow2.f32 %v2526_v25 }
0x110a   : > { %v4062_v26 = vpop.eup %4061 }
0x110b   : > { %v2528_v30 = vsel %vm1232_vm4, %v4062_v26, 0.0  ;;  %v2533_v34 = vpack.c.bf16 %v4062_v26, %v4062_v26  ;;  %v902_v26 = vld [vmem:[#allocation12 + $0x8] sm:$0xff] }
0x110c   : > { %2529 = vadd.xlane.f32.xlu0 %v2528_v30 }
0x110d   : > { %3815 = vmatmul.mubr.msk.bf16.vlgmr.msra.gmra.mrb[52].mxu0 %vm1232_vm4, %v2533_v34 }
0x110e   : > { %3825 = vmatpush3.bf16.xpose.msra.mxu0 %v2639_v59  ;;  %3826 = vmatprep.mubr.msk.bf16.mxu0 %vm4353_vm2, %v4352_v17 }
0x110f   : > { %3836 = vmatprep.subr.bf16.mxu0 %v4352_v17 }
0x1115   : > { %3827 = vmatmul.mubr.msk.bf16.vlgmr.msra.gmra.mrb[56].mxu0 %vm1232_vm4, %v2632_v9  ;;  %v2150_v9 = vld [vmem:[%s4793_s24 + $0xc] sm:$0xf] }
0x1116   : > { %3838 = vmatprep.mubr.msk.bf16.mxu0 %vm4353_vm2, %v4352_v17 }
0x112e   : > { %v1981_v35 = vpop.xlane.xlu1 %1980 }
0x112f   : > { %v1983_v62 = vmul.f32 0.03125, %v1981_v35  ;;  %v2749_v35 = vsel %vm1236_vm3, %v2150_v9, 0 }
0x1130   : > { %3837 = vmatpush3.bf16.msra.mxu0 %v2749_v35 }
0x1131   : > { %v1985_v36 = vsub.f32 %v1975_v2, %v1983_v62  ;;  %3850 = vmatprep.subr.bf16.mxu0 %v4352_v17 }
0x1133   : > { %v1987_v37 = vmul.f32 %v1985_v36, %v1985_v36 }
0x1135   : > { %v1991_v38 = vsel %vm906_vm1, %v1987_v37, 0.0 }
0x1136   : > { %1992 = vadd.xlane.f32.xlu1 %v1991_v38 }
0x113a   : > { %2871 = vadd.xlane.f32.xlu1 %v2870_v39 }
0x1199   : > { %v2530_v16 = vpop.xlane.xlu0 %2529 }
0x119a   : > { %v2531_v49 = vmax.f32 %v2530_v16, 1e-30 }
0x11c3   : > { %v1993_v42 = vpop.xlane.xlu1 %1992 }
0x11c4   : > { %v1995_v44 = vmul.f32 0.03125, %v1993_v42 }
0x11c6   : > { %v1997_v46 = vadd.f32 1e-05, %v1995_v44 }
0x11c7   : > { %v2872_v47 = vpop.xlane.xlu1 %2871 }
0x11c8   : > { %4063 = vrsqrt.f32 %v1997_v46  ;;  %v2876_v51 = vmul.f32 0.03125, %v2872_v47 }
0x11c9   : > { %4065 = vrcp.f32 %v2531_v49 }
0x11ca   : > { %v5170_v50 = vsub.f32 %v5057_v31, %v2876_v51 }
0x11cc   : > { %v2880_v56 = vmul.f32 %v5170_v50, %v5170_v50 }
0x11ce   : > { %v2882_v57 = vsel %vm906_vm1, %v2880_v56, 0.0 }
0x11d2   : > { %v4064_v48 = vpop.eup %4063 }
0x11d3   : > { %v2001_v32 = vmul.f32 %v4064_v48, %v1985_v36  ;;  %v4066_v58 = vpop.eup %4065 }
0x11d5   : > { %v2007_v52 = vmul.f32 %v5050_v23, %v2001_v32 }
0x11d7   : > { %v5174_v24 = vadd.f32 %v5053_v33, %v2007_v52 }
0x11d9   : > { %v2873_v53 = vsel %vm906_vm1, %v5174_v24, 0.0  ;;  %v2797_v34 = vadd.f32 %v5174_v24, %v902_v26  ;;  %v3507_v26 = vld [vmem:[%s5419_s7] ss:$0 sm:$0xff] }
0x11da   : > { %2874 = vadd.xlane.f32.xlu1 %v2873_v53  ;;  %v5211_v53 = vld [vmem:[%s4768_s11] sm:$0xff] }
0x11db   : > { %v2798_v59 = vpack.c.bf16 %v2797_v34, %v2797_v34  ;;  %v2899_v56 = vrot.slane %v5211_v53, %v2077_v18  ;;  %v4006_v18 = vld [vmem:[%s4798_s22 + $0x8] sm:$0xff]  }
0x11de   : > { %2883 = vadd.xlane.f32.xlu1 %v2882_v57 }
0x11e0   : > { %v2576_v60 = vpop.f32.mrb[52].mxu0 }
0x11e1   : > { %v2582_v61 = vmul.f32 %v4066_v58, %v2576_v60  ;;  %v3816_v63 = vpop.f32.mrb[53].mxu0 }
0x11e2   : > { %v2579_v1 = vpop.f32.mrb[54].mxu0  ;;  %v4005_v63 = vld [vmem:[%s4798_s22] sm:$0xff]  }
0x11e3   : > { %v2583_v23 = vpack.c.bf16 %v2582_v61, %v2582_v61  ;;  %v3817_v3 = vpop.f32.mrb[55].mxu0 }
0x11e5   : > { %3821 = vmatmul.mubr.msk.bf16.vlgmr.msra.gmra.mrb[48].mxu1 %vm1232_vm4, %v2583_v23 }
0x11e6   : > { %3832 = vmatprep.mubr.msk.bf16.mxu1 %vm4353_vm2, %v4352_v17 }
0x11e8   : > { %v2675_v33 = vpop.f32.mrb[56].mxu0 }
0x11e9   : > { %v2676_v4 = vadd.f32 %v2675_v33, %v5103_v54  ;;  %v3828_v6 = vpop.f32.mrb[57].mxu0  ;;  %v2905_v33 = vrot.slane %v5211_v53, %v2089_v29 }
0x11ea   : > { %v2678_v7 = vpop.f32.mrb[58].mxu0 }
0x11eb   : > { %v3829_v5 = vpop.f32.mrb[59].mxu0  ;;  %v2681_v10 = vsel %vm1232_vm4, %v2676_v4, -inf }
0x11ec   : > { %2682 = vmax.xlane.f32.xlu0 %v2681_v10 }
0x1202   : > { %2695 = vrot.lane.b32.xlu0 %v5076_v43, %s4356_s10 }
0x1267   : > { %v2875_v54 = vpop.xlane.xlu1 %2874 }
0x1268   : > { %v2877_v2 = vmul.f32 0.03125, %v2875_v54  ;;  %v4012_v54 = vld [vmem:[%s4803_s5 + $0x28] sm:$0xff]  }
0x126a   : > { %v2879_v19 = vsub.f32 %v5174_v24, %v2877_v2  ;;  %v4013_v2 = vld [vmem:[%s4803_s5 + $0x30] sm:$0xff]  }
0x126b   : > { %v2884_v40 = vpop.xlane.xlu1 %2883 }
0x126c   : > { %v2881_v25 = vmul.f32 %v2879_v19, %v2879_v19  ;;  %v2888_v46 = vmul.f32 0.03125, %v2884_v40 }
0x126e   : > { %v2885_v30 = vsel %vm906_vm1, %v2881_v25, 0.0  ;;  %v2890_v16 = vadd.f32 1e-05, %v2888_v46 }
0x1279   : > { %v2683_v11 = vpop.xlane.xlu0 %2682 }
0x127a   : > { %vm2684_vm5 = vcmp.gt.f32.partialorder %v2683_v11, -inf }
0x127b   : > { %v2685_v12 = vsel %vm2684_vm5, %v2683_v11, 0.0 }
0x127c   : > { %v2686_v13 = vsub.f32 %v2676_v4, %v2685_v12  ;;  %v4007_v12 = vld [vmem:[%s4803_s5] sm:$0xff]  }
0x127d   : > { %v2696_v14 = vpop.permute.xlu0 %2695 }
0x127e   : > { %v2687_v8 = vmul.f32 1.442695, %v2686_v13  ;;  %v2701_v15 = vsel %vm1236_vm3, %v2696_v14, 0  ;;  %v4008_v13 = vld [vmem:[%s4803_s5 + $0x8] sm:$0xff]   ;;  %v4009_v14 = vld [vmem:[%s4803_s5 + $0x10] sm:$0xff]  }
0x127f   : > { %3831 = vmatpush3.bf16.msra.mxu1 %v2701_v15  ;;  %v4011_v15 = vld [vmem:[%s4803_s5 + $0x20] sm:$0xff]  }
0x1280   : > { %4067 = vpow2.f32 %v2687_v8  ;;  %3842 = vmatprep.subr.bf16.mxu1 %v4352_v17  ;;  %v4010_v8 = vld [vmem:[%s4803_s5 + $0x18] sm:$0xff]  }
0x128a   : > { %v4068_v20 = vpop.eup %4067 }
0x128b   : > { %v2689_v43 = vsel %vm1232_vm4, %v4068_v20, 0.0  ;;  %v2694_v22 = vpack.c.bf16 %v4068_v20, %v4068_v20 }
0x128c   : > { %2690 = vadd.xlane.f32.xlu1 %v2689_v43 }
0x128d   : > { %3833 = vmatmul.mubr.msk.bf16.vlgmr.msra.gmra.mrb[52].mxu1 %vm1232_vm4, %v2694_v22 }
0x128e   : > { %3843 = vmatpush3.bf16.msra.mxu1 %v4003_v21  ;;  %3846 = vmatprep.mubr.msk.bf16.mxu1 %vm4353_vm2, %v4352_v17 }
0x128f   : > { %3844 = vmatprep.subr.bf16.mxu1 %v4352_v17 }
0x1290   : > { %2886 = vadd.xlane.f32.xlu1 %v2885_v30 }
0x1292   : > { %3845 = vmatpush3.bf16.msra.mxu1 %v4004_v45 }
0x1293   : > { %3858 = vmatprep.subr.bf16.mxu1 %v4352_v17 }
0x1295   : > { %3847 = vmatmul.mubr.msk.bf16.vlgmr.msra.gmra.mrb[56].mxu1 %vm906_vm1, %v2798_v59 }
0x1296   : > { %3874 = vmatprep.mubr.msk.bf16.mxu1 %vm4353_vm2, %v4352_v17  ;;  %3859 = vmatpush3.bf16.msra.mxu1 %v4007_v12 }
0x1297   : > { %3860 = vmatprep.subr.bf16.mxu1 %v4352_v17 }
0x129a   : > { %3861 = vmatpush3.bf16.msra.mxu1 %v4008_v13  ;;  %v4361_v13 = vmov -1.0  }
0x129b   : > { %3862 = vmatprep.subr.bf16.mxu1 %v4352_v17 }
0x129e   : > { %3863 = vmatpush3.bf16.msra.mxu1 %v4009_v14 }
0x129f   : > { %3864 = vmatprep.subr.bf16.mxu1 %v4352_v17 }
0x12a2   : > { %3865 = vmatpush3.bf16.msra.mxu1 %v4010_v8 }
0x12a3   : > { %3866 = vmatprep.subr.bf16.mxu1 %v4352_v17 }
0x12a6   : > { %3867 = vmatpush3.bf16.msra.mxu1 %v4011_v15 }
0x12a7   : > { %3868 = vmatprep.subr.bf16.mxu1 %v4352_v17 }
0x12aa   : > { %3869 = vmatpush3.bf16.msra.mxu1 %v4012_v54 }
0x12ab   : > { %3870 = vmatprep.subr.bf16.mxu1 %v4352_v17 }
0x12ae   : > { %3871 = vmatpush3.bf16.msra.mxu1 %v4013_v2 }
0x12af   : > { %3872 = vmatprep.subr.bf16.mxu1 %v4352_v17 }
0x12b8   : > { %v2624_v62 = vpop.f32.mrb[48].mxu1 }
0x12b9   : > { %v5208_v36 = vadd.f32 %v2624_v62, %v5147_v0  ;;  %v3822_v37 = vpop.f32.mrb[49].mxu1 }
0x12ba   : > { %v2627_v38 = vpop.f32.mrb[50].mxu1 }
0x12bb   : > { %v3823_v39 = vpop.f32.mrb[51].mxu1 }
0x1319   : > { %v2691_v41 = vpop.xlane.xlu1 %2690 }
0x131a   : > { %v2692_v51 = vmax.f32 %v2691_v41, 1e-30 }
0x131d   : > { %v2887_v42 = vpop.xlane.xlu1 %2886 }
0x131e   : > { %v2889_v44 = vmul.f32 0.03125, %v2887_v42 }
0x1320   : > { %v2891_v47 = vadd.f32 1e-05, %v2889_v44 }
0x1322   : > { %4069 = vrsqrt.f32 %v2891_v47 }
0x1323   : > { %4071 = vrsqrt.f32 %v2890_v16 }
0x1324   : > { %4073 = vrcp.f32 %v2692_v51 }
0x132c   : > { %v4070_v48 = vpop.eup %4069 }
0x132d   : > { %v4072_v49 = vpop.eup %4071  ;;  %v2895_v0 = vmul.f32 %v4070_v48, %v2879_v19  ;;  %v4014_v19 = vld [vmem:[%s4803_s5 + $0x38] sm:$0xff]   ;;  %s3535_s5 = sshll.u32 %s4481_s0, 8  ;;  %s3153_s0 = scalar_lea.sflag [#allocation5], %s4723_s15 }
0x132e   : > { %v4074_v32 = vpop.eup %4073  ;;  %v2894_v57 = vmul.f32 %v4072_v49, %v5170_v50  ;;  %3873 = vmatpush3.bf16.msra.mxu1 %v4014_v19  ;;  %s5266_s4 = scalar_lea.hbm %s5420_s3, %s3535_s5 }
0x132f   : > { %v2901_v1 = vmul.f32 %v2899_v56, %v2895_v0 }
0x1330   : > { %v2900_v4 = vmul.f32 %v2899_v56, %v2894_v57 }
0x1331   : > { %v2907_v50 = vadd.f32 %v2905_v33, %v2901_v1 }
0x1332   : > { %v2906_v5 = vadd.f32 %v2905_v33, %v2900_v4 }
0x1334   : > { %v2908_v11 = vpack.c.bf16 %v2907_v50, %v2906_v5 }
0x1360   : > { %v2737_v52 = vpop.f32.mrb[52].mxu1 }
0x1361   : > { %v2743_v58 = vmul.f32 %v4074_v32, %v2737_v52  ;;  %v3834_v60 = vpop.f32.mrb[53].mxu1 }
0x1362   : > { %v2740_v61 = vpop.f32.mrb[54].mxu1 }
0x1363   : > { %v2744_v23 = vpack.c.bf16 %v2743_v58, %v2743_v58  ;;  %v3835_v3 = vpop.f32.mrb[55].mxu1 }
0x1365   : > { %3839 = vmatmul.mubr.msk.bf16.vlgmr.msra.gmra.mrb[60].mxu0 %vm1232_vm4, %v2744_v23 }
0x1366   : > { %3851 = vmatpush3.bf16.msra.mxu0 %v4005_v63  ;;  %3854 = vmatprep.mubr.msk.bf16.mxu0 %vm4353_vm2, %v4352_v17 }
0x1367   : > { %3852 = vmatprep.subr.bf16.mxu0 %v4352_v17 }
0x1368   : > { %v5226_v6 = vpop.f32.mrb[56].mxu1 }
0x1369   : > { %v3848_v7 = vpop.f32.mrb[57].mxu1 }
0x136a   : > { %v2859_v29 = vpop.f32.mrb[58].mxu1  ;;  %3853 = vmatpush3.bf16.msra.mxu0 %v4006_v18 }
0x136b   : > { %v3849_v10 = vpop.f32.mrb[59].mxu1 }
0x136d   : > { %3855 = vmatmul.mubr.msk.bf16.vlgmr.msra.gmra.mrb[64].mxu0 %vm906_vm1, %v2908_v11 }
0x1438   : > { %v2785_v20 = vpop.f32.mrb[60].mxu0 }
0x1439   : > { %v5245_v21 = vadd.f32 %v2785_v20, %v5208_v36  ;;  %v3840_v43 = vpop.f32.mrb[61].mxu0 }
0x143a   : > { %v2788_v22 = vpop.f32.mrb[62].mxu0 }
0x143b   : > { %v3841_v25 = vpop.f32.mrb[63].mxu0 }
0x1440   : > { %v2969_v45 = vpop.f32.mrb[64].mxu0 }
0x1441   : > { %v2970_v30 = vadd.f32 %v3507_v26, %v2969_v45  ;;  %v3856_v34 = vpop.f32.mrb[65].mxu0 }
0x1442   : > { %v2972_v59 = vpop.f32.mrb[66].mxu0 }
0x1443   : > { %v2978_v9 = vmul.f32 0.70710677, %v2970_v30  ;;  %v2973_v35 = vadd.f32 %v3507_v26, %v2972_v59  ;;  %v3857_v62 = vpop.f32.mrb[67].mxu0  ;;  %v2976_v43 = vmul.f32 0.5, %v2970_v30  ;;  %v2805_v59 = vsub.s32 7, %v4828_v27 }
0x1445   : > { %v2984_v37 = vand.u32 2147483647, %v2978_v9  ;;  %v2979_v17 = vmul.f32 0.70710677, %v2973_v35  ;;  %vm2980_vm2 = vcmp.ge.f32.partialorder %v2978_v9, 0.0  ;;  %v2977_v22 = vmul.f32 0.5, %v2973_v35 }
0x1446   : > { %v2982_v14 = vsel %vm2980_vm2, 1.0, %v4361_v13  ;;  %v4085_v9 = vld [vmem:[%s4768_s11 + $0x8] sm:$0xff]  ;;  %v2865_v30 = vrot.slane %v5211_v53, %v2805_v59  ;;  %v3511_v35 = vld [vmem:[%s4768_s11 + $0x10] ss:$0 sm:$0xff]  ;;  %s3166_s11 = sshll.u32 %s4807_s26, 4  ;;  %s5268_s11 = int_to_ptr.vmem [resolvable:$true] %s3166_s11 }
0x1447   : > { %v2986_v38 = vmul.f32 0.3275911, %v2984_v37  ;;  %v2985_v39 = vand.u32 2147483647, %v2979_v17  ;;  %v3012_v42 = vsub.f32 0.0, %v2984_v37  ;;  %vm2981_vm3 = vcmp.ge.f32.partialorder %v2979_v17, 0.0  ;;  %p4265_p4 = scmp.lt.s32.totalorder %s5268_s11, %s4263_s9 }
0x1448   : > { %v2983_v2 = vsel %vm2981_vm3, 1.0, %v4361_v13  ;;  %v2795_v62 = vrot.slane %v4085_v9, %v1970_v55  ;;  %s4258_s28 = scalar_lea.vmem %s5268_s11, 256 }
0x1449   : > { %v2988_v40 = vadd.f32 1.0, %v2986_v38  ;;  %v2987_v41 = vmul.f32 0.3275911, %v2985_v39  ;;  %v3013_v44 = vsub.f32 0.0, %v2985_v39  ;;  %v3014_v47 = vmul.f32 %v3012_v42, %v2984_v37  ;;  %p4259_p3 = scmp.ne.s32.totalorder %s5268_s11, %s4258_s28  ;;  %p4266_p11 = scmp.lt.s32.totalorder %s4264_s23, %s4258_s28 }
0x144a   : > { %v2806_v37 = vrot.slane %v4085_v9, %v2805_v59  ;;  %v2796_v17 = vadd.f32 %v2795_v62, %v5245_v21 }
0x144b   : > { %4075 = vrcp.f32 %v2988_v40  ;;  %v2989_v36 = vadd.f32 1.0, %v2987_v41  ;;  %v3015_v49 = vmul.f32 %v3013_v44, %v2985_v39  ;;  %v3016_v0 = vmul.f32 1.442695, %v3014_v47  ;;  %p4260_p8 = pnand %p4259_p3, %p5421_p6  ;;  %p4267_p12 = por %p4266_p11, %p4265_p4 }
0x144c   : > { %v2857_v38 = vadd.f32 %v5226_v6, %v2806_v37  ;;  %v2866_v39 = vmul.f32 %v2865_v30, %v2796_v17  ;;  %v3143_v40 = vrot.slane %v4085_v9, %v936_v28 }
0x144d   : > { %4077 = vrcp.f32 %v2989_v36  ;;  %v3018_v58 = vmul.f32 1.442695, %v3015_v49  ;;  %p4261_p9 = pneg %p4260_p8 }
0x144e   : > { %4079 = vpow2.f32 %v3016_v0  ;;  %v2867_v36 = vmul.f32 %v2865_v30, %v2857_v38 }
0x144f   : > { %4081 = vpow2.f32 %v3018_v58  ;;  %p4268_p10 = pnand %p4267_p12, %p4261_p9 }
0x1450   : > { %v2869_v53 = vadd.f32 %v2867_v36, %v5174_v24 }
0x1455   : > { %v4076_v46 = vpop.eup %4075 }
0x1456   : > { %v2994_v16 = vmul.f32 1.0614054, %v4076_v46 }
0x1457   : > { %v4078_v51 = vpop.eup %4077 }
0x1458   : > { %v2996_v48 = vadd.f32 -1.4531521, %v2994_v16  ;;  %v2995_v32 = vmul.f32 1.0614054, %v4078_v51  ;;  %v4080_v7 = vpop.eup %4079 }
0x1459   : > { %v4082_v11 = vpop.eup %4081 }
0x145a   : > { %v2998_v52 = vmul.f32 %v4076_v46, %v2996_v48  ;;  %v2997_v56 = vadd.f32 -1.4531521, %v2995_v32 }
0x145c   : > { %v3000_v57 = vadd.f32 1.4214138, %v2998_v52  ;;  %v2999_v60 = vmul.f32 %v4078_v51, %v2997_v56 }
0x145e   : > { %v3002_v61 = vmul.f32 %v4076_v46, %v3000_v57  ;;  %v3001_v63 = vadd.f32 1.4214138, %v2999_v60 }
0x1460   : > { %v3004_v1 = vadd.f32 -0.28449672, %v3002_v61  ;;  %v3003_v23 = vmul.f32 %v4078_v51, %v3001_v63 }
0x1462   : > { %v3006_v3 = vmul.f32 %v4076_v46, %v3004_v1  ;;  %v3005_v33 = vadd.f32 -0.28449672, %v3003_v23 }
0x1464   : > { %v3008_v4 = vadd.f32 0.2548296, %v3006_v3  ;;  %v3007_v18 = vmul.f32 %v4078_v51, %v3005_v33 }
0x1466   : > { %v3010_v50 = vmul.f32 %v4076_v46, %v3008_v4  ;;  %v3009_v5 = vadd.f32 0.2548296, %v3007_v18  ;;  %v2868_v46 = vadd.f32 %v2866_v39, %v5057_v31 }
0x1468   : > { %v3020_v29 = vmul.f32 %v4080_v7, %v3010_v50  ;;  %v3011_v10 = vmul.f32 %v4078_v51, %v3009_v5 }
0x146a   : > { %v3022_v12 = vsub.f32 1.0, %v3020_v29  ;;  %v3021_v8 = vmul.f32 %v4082_v11, %v3011_v10 }
0x146c   : > { %v3024_v15 = vmul.f32 %v3022_v12, %v2982_v14  ;;  %v3023_v54 = vsub.f32 1.0, %v3021_v8 }
0x146e   : > { %v3026_v19 = vadd.f32 1.0, %v3024_v15  ;;  %v3025_v20 = vmul.f32 %v3023_v54, %v2983_v2 }
0x1470   : > { %v3027_v25 = vadd.f32 1.0, %v3025_v20  ;;  %v3028_v26 = vmul.f32 %v3026_v19, %v2976_v43 }
0x1472   : > { %v3029_v45 = vmul.f32 %v3027_v25, %v2977_v22 }
0x1474   : > { %v3030_v34 = vpack.c.bf16 %v3029_v45, %v3028_v26 }
0x1476   : > { %3875 = vmatmul.mubr.bf16.vlgmr.msra.gmra.mrb[60].mxu1 %v3030_v34 }
0x1549   : > { %v3133_v41 = vpop.f32.mrb[60].mxu1 }
0x154a   : > { %v3134_v42 = vadd.f32 %v3511_v35, %v3133_v41  ;;  %v3876_v44 = vpop.f32.mrb[61].mxu1 }
0x154b   : > { %v3136_v55 = vpop.f32.mrb[62].mxu1 }
0x154c   : > { %v3144_v21 = vmul.f32 %v3143_v40, %v3134_v42  ;;  %v3137_v47 = vadd.f32 %v3511_v35, %v3136_v55  ;;  %v3877_v6 = vpop.f32.mrb[63].mxu1 }
0x154e   : > { %v3146_v27 = vadd.f32 %v3144_v21, %v2868_v46  ;;  %v3145_v28 = vmul.f32 %v3143_v40, %v3137_v47 }
0x1550   : > { %3148 = vst.msk [vmem:[#allocation2] sm:$0xff] %vm906_vm1, %v3146_v27  ;;  %3150 = vst.msk [vmem:[%s4807_s26] sm:$0xff] %vm906_vm1, %v3146_v27  ;;  %v3147_v31 = vadd.f32 %v3145_v28, %v2869_v53 }
0x1552   : > { %3149 = vst.msk [vmem:[#allocation2 + $0x8] sm:$0xff] %vm906_vm1, %v3147_v31  ;;  %3151 = vst.msk [vmem:[%s4807_s26 + $0x8] sm:$0xff] %vm906_vm1, %v3147_v31 }
0x1553   : > { %4271 = shalt.err (!%p4268_p10)
}
0x1554   : > { %s4272_s26 = scalar_lea.hbm %s5266_s4, 256  ;;  %s4276_s17 = scalar_lea.hbm %s5420_s3, 512 }
0x1555   : > { %p4273_p5 = scmp.ne.s32.totalorder %s5266_s4, %s4272_s26  ;;  %p4277_p1 = scmp.lt.u32.totalorder %s5266_s4, %s5420_s3 }
0x1556   : > { %p4278_p2 = scmp.lt.u32.totalorder %s4276_s17, %s4272_s26  ;;  %p4280_p3 = scmp.lt.u32.totalorder %s4272_s26, %s5266_s4 }
0x1557   : > { %p4274_p7 = pnand %p4273_p5, %p5421_p6 }
0x1558   : > { %p4279_p0 = por %p4278_p2, %p4277_p1 }
0x1559   : > { %p4275_p13 = pneg %p4274_p7 }
0x155a   : > { %p4281_p8 = por %p4280_p3, %p4279_p0 }
0x155c   : > { %p4282_p9 = pnand %p4281_p8, %p4275_p13 }
0x155e   : > { %4285 = shalt.err (!%p4282_p9)
}
0x155f   : > { %s4363_s10 = smov 128   ;;  %s4364_s2 = smov 8  }
0x1560   : > { %3899 = dma.vmem_to_hbm [thread:$0]  (%p5421_p6), %s5268_s11, 256, %s5266_s4, %s3153_s0, %s4363_s10, %s4363_s10, %s4364_s2  }
0x1561 PF: > { %s5422_s8 = sld [smem:[#allocation21_spill]]  ;;  %s5423_s20 = sld [smem:[#allocation24_spill]] }
0x1562   : > { %p5425_p11 = scmp.ge.s32.totalorder %s4340_s30, 2 }
0x1567   : > { %s3181_s21 = sand.u32 1, %s5422_s8   ;;  %p5424_p4 = scmp.ne.s32.totalorder %s5423_s20, 0 }
0x1568   : > { %s3182_s29 = scalar_lea.sflag [#allocation5], %s3181_s21 }
0x1569   : > { %p3922_p12 = pnand %p5425_p11, %p5424_p4 }
0x156b   : > { %4323 = dma.done.wait (!%p3922_p12), %s3182_s29, 256  }
0x156c   : > { %4325 = vsyncadd (!%p3922_p12), %s3182_s29, 4294967040  ;;  %s5426_s30 = sld [smem:[#allocation25_spill]]  ;;  %s5427_s27 = sld [smem:[#allocation22_spill]] }
0x156d   : > { %s5428_s28 = sld [smem:[#allocation23_spill]]  ;;  %s5429_s29 = sld [smem:[#allocation26_spill]] }
0x1572   : > { %p36_p10 = scmp.ge.s32.totalorder %s5426_s30, 4  }
0x1574   :  { %38 = sbr.rel (!%p36_p10) target bundleno = 28 (0x1c), region = 200 }
0x157b   :  { %3187 = vsyncpa [#allocation4], 1 }
0x157c   :  { %3189 = vsyncpa [#allocation4 + $0x1], 1 }
0x157d   :  { %3190 = vsyncpa [#allocation7], 1 }
0x157e   :  { %3192 = vsyncpa [#allocation7 + $0x1], 1 }
0x157f   :  { %3193 = vsyncpa [#allocation10], 1 }
0x1580   :  { %3194 = vsyncpa [#allocation13], 1 }
0x1581   :  { %3195 = vsyncpa [#allocation5], 1 }
0x1582   :  { %3197 = vsyncpa [#allocation5 + $0x1], 1 }

</bundles_post_ra>
